<compile_context>
chip_gen: v7x
topology: tpu7x:2x2x1
jax: 0.10.0
libtpu: 0.0.40
codegen_flags: <defaults>
</compile_context>

<pallas_src>
import functools
import math

import jax
import jax.numpy as jnp
from jax.experimental import pallas as pl
from jax.experimental.pallas import tpu as pltpu


# TODO(synk): PyTorch nn.GELU() defaults to the exact erf form; the tanh approximation is
# used here (and in the reference, so the self-test is apples-to-apples) since erf has no
# reliable Mosaic lowering.  Max deviation from exact GELU is ~1e-3.
def _gelu_tanh(x):
    c = math.sqrt(2.0 / math.pi)
    return 0.5 * x * (1.0 + jnp.tanh(c * (x + 0.044715 * x * x * x)))


# ---------------------------------------------------------------------------
# In-kernel helpers
# ---------------------------------------------------------------------------
def _split_heads(t2, B, L, H, hd):
    """(B*L, H*hd) -> (H*B, L, hd), head-major (lane slices + leading-axis concat only)."""
    t3 = t2.reshape(B, L, H * hd)
    parts = [t3[:, :, h * hd:(h + 1) * hd] for h in range(H)]
    return jnp.concatenate(parts, axis=0)


def _attention(q2, k2, v2, B, Lq, Lk, H, hd):
    """Per-head scaled-dot-product attention (scale already folded into q2).

    q2: (B*Lq, D), k2/v2: (B*Lk, D).  Returns lane-merged heads, shape (B*Lq, D)."""
    qn = _split_heads(q2, B, Lq, H, hd)     # (H*B, Lq, hd)
    kn = _split_heads(k2, B, Lk, H, hd)     # (H*B, Lk, hd)
    vn = _split_heads(v2, B, Lk, H, hd)     # (H*B, Lk, hd)
    s = jnp.einsum('nqd,nkd->nqk', qn, kn, preferred_element_type=jnp.float32)
    m = jnp.max(s, axis=-1, keepdims=True)
    e = jnp.exp(s - m)
    p = e * pl.reciprocal(jnp.sum(e, axis=-1, keepdims=True), approx=True)
    o = jnp.einsum('nqk,nkd->nqd', p, vn, preferred_element_type=jnp.float32)
    o = o.reshape(H, B, Lq, hd)
    # Merge heads back onto the lane axis (cheap concats) so the following output
    # projection is a single full-width (BS, D) @ (D, D) matmul.
    return jnp.concatenate([o[h].reshape(B * Lq, hd) for h in range(H)], axis=-1)


# ---------------------------------------------------------------------------
# Kernel
# ---------------------------------------------------------------------------
def emergence_core_kernel(x_ref, ctx_ref, w_ref, b_ref, out_ref, *, num_heads, wl, bl):
    f32 = jnp.float32
    B, S, D = x_ref.shape
    H = num_heads
    hd = D // H
    BS = B * S

    def W(name):                       # static slab slice -> (rows, cols) weight, (in,out)
        r0, nr, nc = wl[name]
        return w_ref[r0:r0 + nr, :nc]

    def Bv(name):                      # static slab slice -> (1, cols) bias row
        r0, nc = bl[name]
        return b_ref[r0:r0 + 1, :nc]

    def lin(t, wname, bname):
        return jnp.dot(t, W(wname), preferred_element_type=f32) + Bv(bname)

    x2 = x_ref[...].reshape(BS, D)
    c2 = ctx_ref[...].reshape(BS, D)

    # ---- PhaseTransitionLayer:  x *= sigmoid(energy_net([x, ctx]) / T) ----------------
    # cat([x, ctx]) @ W1 computed as x @ W1[:D] + ctx @ W1[D:]  (no lane concatenate).
    h1 = (jnp.dot(x2, W('pt_w1x'), preferred_element_type=f32)
          + jnp.dot(c2, W('pt_w1c'), preferred_element_type=f32)
          + Bv('pt_b1'))
    h1 = _gelu_tanh(h1)
    h2 = lin(h1, 'pt_w2', 'pt_b2')
    mu = jnp.mean(h2, axis=-1, keepdims=True)
    var = jnp.mean(jnp.square(h2 - mu), axis=-1, keepdims=True)
    h2 = (h2 - mu) * jax.lax.rsqrt(var + 1e-5) * Bv('pt_ln_g') + Bv('pt_ln_b')
    h2 = _gelu_tanh(h2)
    # Final Linear(2D -> 1) as broadcast-mul + lane reduction; 1/temperature is already
    # folded into 'pt_w3' / 'pt_b3' at prepare time.
    energy = jnp.sum(h2 * Bv('pt_w3'), axis=-1, keepdims=True) + Bv('pt_b3')
    phase = pl.reciprocal(1.0 + jnp.exp(-energy), approx=True)        # sigmoid
    xg = x2 * phase                                                   # (BS, D), expand_as(x)

    # ---- CriticalTransformer: 8-head self-attention -> GELU MLP -> residual -----------
    q = lin(xg, 'sa_wq', 'sa_bq')      # 1/sqrt(hd) pre-folded into sa_wq / sa_bq
    k = lin(xg, 'sa_wk', 'sa_bk')
    v = lin(xg, 'sa_wv', 'sa_bv')
    attn = lin(_attention(q, k, v, B, S, S, H, hd), 'sa_wo', 'sa_bo')
    m1 = _gelu_tanh(lin(attn, 'cm_w1', 'cm_b1'))
    m2 = _gelu_tanh(lin(m1, 'cm_w2', 'cm_b2'))
    critical = lin(m2, 'cm_w3', 'cm_b3') + xg

    # ---- CrossModalAttention(critical, ctx) + residual ---------------------------------
    tq = lin(critical, 'xm_wq', 'xm_bq')   # 1/sqrt(hd) pre-folded
    ik = lin(c2, 'xm_wk', 'xm_bk')
    iv = lin(c2, 'xm_wv', 'xm_bv')
    cross = lin(_attention(tq, ik, iv, B, S, S, H, hd), 'xm_wf', 'xm_bf')
    critical = cross + critical

    # ---- EmergencePredictor: Linear -> ReLU -> Linear -----------------------------------
    p1 = jnp.maximum(lin(critical, 'ep_w1', 'ep_b1'), 0.0)
    emerged = lin(p1, 'ep_w2', 'ep_b2')

    out_ref[...] = emerged.reshape(B, S, D)


# ---------------------------------------------------------------------------
# One-time weight preparation (hoisted off the forward path)
# ---------------------------------------------------------------------------
def prepare_emergence_params(params, num_heads, dim):
    """Transpose weights to (in, out), fold the attention 1/sqrt(hd) scale into the Q
    projections and 1/temperature into the energy head, and pack everything into two
    contiguous device slabs plus a static layout description.  Call once, reuse."""
    p = params
    f32 = jnp.float32
    D, H = dim, num_heads
    assert D % H == 0
    hd = D // H
    scale = 1.0 / math.sqrt(hd)
    inv_temp = 1.0 / jnp.asarray(p['pt_temp'], f32).reshape(())

    def T(name):
        return jnp.asarray(p[name], f32).T

    pt_w1_t = T('pt_w1')                           # (2D, 4D)
    weights = [
        ('pt_w1x', pt_w1_t[:D]), ('pt_w1c', pt_w1_t[D:]),
        ('pt_w2', T('pt_w2')),
        ('sa_wq', T('sa_wq') * scale), ('sa_wk', T('sa_wk')),
        ('sa_wv', T('sa_wv')), ('sa_wo', T('sa_wo')),
        ('cm_w1', T('cm_w1')), ('cm_w2', T('cm_w2')), ('cm_w3', T('cm_w3')),
        ('xm_wq', T('xm_wq') * scale), ('xm_wk', T('xm_wk')),
        ('xm_wv', T('xm_wv')), ('xm_wf', T('xm_wf')),
        ('ep_w1', T('ep_w1')), ('ep_w2', T('ep_w2')),
    ]
    lane = max(128, max(w.shape[1] for _, w in weights))
    lane = -(-lane // 128) * 128                   # lane-dense slab width

    wl, wblocks, r = {}, [], 0
    for name, w in weights:
        nr, nc = w.shape
        wl[name] = (r, nr, nc)
        nr_pad = -(-nr // 8) * 8                   # sublane-align every block start
        wblocks.append(jnp.zeros((nr_pad, lane), f32).at[:nr, :nc].set(w))
        r += nr_pad
    wslab = jnp.concatenate(wblocks, axis=0)       # (768, 128) for D=32

    def vec(name, mult=None):
        v = jnp.asarray(p[name], f32).reshape(1, -1)
        return v if mult is None else v * mult

    biases = [
        ('pt_b1', vec('pt_b1')), ('pt_b2', vec('pt_b2')),
        ('pt_ln_g', vec('pt_ln_g')), ('pt_ln_b', vec('pt_ln_b')),
        ('pt_w3', vec('pt_w3', inv_temp)), ('pt_b3', vec('pt_b3', inv_temp)),
        ('sa_bq', vec('sa_bq', scale)), ('sa_bk', vec('sa_bk')),
        ('sa_bv', vec('sa_bv')), ('sa_bo', vec('sa_bo')),
        ('cm_b1', vec('cm_b1')), ('cm_b2', vec('cm_b2')), ('cm_b3', vec('cm_b3')),
        ('xm_bq', vec('xm_bq', scale)), ('xm_bk', vec('xm_bk')),
        ('xm_bv', vec('xm_bv')), ('xm_bf', vec('xm_bf')),
        ('ep_b1', vec('ep_b1')), ('ep_b2', vec('ep_b2')),
    ]
    bl, brows = {}, []
    for i, (name, v) in enumerate(biases):
        nc = v.shape[1]
        bl[name] = (i, nc)
        brows.append(jnp.zeros((1, lane), f32).at[:, :nc].set(v))
    bslab = jnp.concatenate(brows, axis=0)         # (19, 128)

    return {
        'wslab': jax.device_put(wslab),
        'bslab': jax.device_put(bslab),
        'wl': wl,
        'bl': bl,
        'num_heads': H,
    }


# ---------------------------------------------------------------------------
# Forward wrapper (single gridless pallas_call, 4 input DMAs)
# ---------------------------------------------------------------------------
def emergence_core_forward(x, context, prepared):
    """x, context: (B, S, D) float32.  prepared: output of prepare_emergence_params."""
    # TODO(synk): context=None path (skip phase-transition & cross-modal) not wired; this
    # kernel implements the context-present branch of EmergenceCore.forward.
    B, S, D = x.shape
    kernel = functools.partial(
        emergence_core_kernel,
        num_heads=prepared['num_heads'], wl=prepared['wl'], bl=prepared['bl'])
    vmem = pl.BlockSpec(memory_space=pltpu.MemorySpace.VMEM)
    return pl.pallas_call(
        kernel,
        out_shape=jax.ShapeDtypeStruct((B, S, D), jnp.float32),
        in_specs=[vmem, vmem, vmem, vmem],
        out_specs=vmem,
    )(jnp.asarray(x, jnp.float32), jnp.asarray(context, jnp.float32),
      prepared['wslab'], prepared['bslab'])


# ---------------------------------------------------------------------------
# Pure-JAX reference mirroring the PyTorch forward (eval mode)
# ---------------------------------------------------------------------------
def emergence_core_reference(x, context, p, num_heads):
    B, S, D = x.shape
    H = num_heads
    hd = D // H

    def lin(t, w, b):
        return t @ w.T + b

    def mha(q_in, kv_in, wq, bq, wk, bk, wv, bv, wo, bo):
        Lq, Lk = q_in.shape[1], kv_in.shape[1]
        q = lin(q_in, wq, bq).reshape(B, Lq, H, hd).transpose(0, 2, 1, 3)
        k = lin(kv_in, wk, bk).reshape(B, Lk, H, hd).transpose(0, 2, 1, 3)
        v = lin(kv_in, wv, bv).reshape(B, Lk, H, hd).transpose(0, 2, 1, 3)
        s = jnp.einsum('bhqe,bhke->bhqk', q, k) / math.sqrt(hd)
        a = jax.nn.softmax(s, axis=-1)
        o = jnp.einsum('bhqk,bhke->bhqe', a, v)
        o = o.transpose(0, 2, 1, 3).reshape(B, Lq, D)
        return lin(o, wo, bo)

    # PhaseTransitionLayer
    joint = jnp.concatenate([x, context], axis=-1)
    h = _gelu_tanh(lin(joint, p['pt_w1'], p['pt_b1']))
    h = lin(h, p['pt_w2'], p['pt_b2'])
    mu = h.mean(-1, keepdims=True)
    var = ((h - mu) ** 2).mean(-1, keepdims=True)
    h = (h - mu) / jnp.sqrt(var + 1e-5) * p['pt_ln_g'] + p['pt_ln_b']
    h = _gelu_tanh(h)
    energy = lin(h, p['pt_w3'], p['pt_b3']) / p['pt_temp']
    xg = x * jax.nn.sigmoid(energy)

    # CriticalTransformer
    attn = mha(xg, xg, p['sa_wq'], p['sa_bq'], p['sa_wk'], p['sa_bk'],
               p['sa_wv'], p['sa_bv'], p['sa_wo'], p['sa_bo'])
    m = _gelu_tanh(lin(attn, p['cm_w1'], p['cm_b1']))
    m = _gelu_tanh(lin(m, p['cm_w2'], p['cm_b2']))
    critical = lin(m, p['cm_w3'], p['cm_b3']) + xg

    # CrossModalAttention
    cross = mha(critical, context, p['xm_wq'], p['xm_bq'], p['xm_wk'], p['xm_bk'],
                p['xm_wv'], p['xm_bv'], p['xm_wf'], p['xm_bf'])
    critical = cross + critical

    # EmergencePredictor
    e = jnp.maximum(lin(critical, p['ep_w1'], p['ep_b1']), 0.0)
    return lin(e, p['ep_w2'], p['ep_b2'])


def _linear_params(key, in_f, out_f):
    k1, k2 = jax.random.split(key)
    bound = 1.0 / math.sqrt(in_f)
    w = jax.random.uniform(k1, (out_f, in_f), jnp.float32, -bound, bound)
    b = jax.random.uniform(k2, (out_f,), jnp.float32, -bound, bound)
    return w, b


if __name__ == "__main__":
    B, S, D, H = 2, 8, 32, 8      # num_regions == seq_len (required by PhaseTransitionLayer cat)

    key = jax.random.PRNGKey(0)
    keys = jax.random.split(key, 20)
    x = jax.random.normal(keys[0], (B, S, D), jnp.float32)
    ctx = jax.random.normal(keys[1], (B, S, D), jnp.float32)

    params = {}
    params['pt_w1'], params['pt_b1'] = _linear_params(keys[2], 2 * D, 4 * D)
    params['pt_w2'], params['pt_b2'] = _linear_params(keys[3], 4 * D, 2 * D)
    params['pt_ln_g'] = 1.0 + 0.1 * jax.random.normal(keys[18], (2 * D,), jnp.float32)
    params['pt_ln_b'] = 0.1 * jax.random.normal(keys[19], (2 * D,), jnp.float32)
    params['pt_w3'], params['pt_b3'] = _linear_params(keys[4], 2 * D, 1)
    params['pt_temp'] = jnp.array([0.1], jnp.float32)
    params['sa_wq'], params['sa_bq'] = _linear_params(keys[5], D, D)
    params['sa_wk'], params['sa_bk'] = _linear_params(keys[6], D, D)
    params['sa_wv'], params['sa_bv'] = _linear_params(keys[7], D, D)
    params['sa_wo'], params['sa_bo'] = _linear_params(keys[8], D, D)
    params['cm_w1'], params['cm_b1'] = _linear_params(keys[9], D, 4 * D)
    params['cm_w2'], params['cm_b2'] = _linear_params(keys[10], 4 * D, 2 * D)
    params['cm_w3'], params['cm_b3'] = _linear_params(keys[11], 2 * D, D)
    params['xm_wq'], params['xm_bq'] = _linear_params(keys[12], D, D)
    params['xm_wk'], params['xm_bk'] = _linear_params(keys[13], D, D)
    params['xm_wv'], params['xm_bv'] = _linear_params(keys[14], D, D)
    params['xm_wf'], params['xm_bf'] = _linear_params(keys[15], D, D)
    params['ep_w1'], params['ep_b1'] = _linear_params(keys[16], D, 2 * D)
    params['ep_w2'], params['ep_b2'] = _linear_params(keys[17], 2 * D, D)

    # One-time prep (off the forward path), then the forward call itself.
    prepared = prepare_emergence_params(params, num_heads=H, dim=D)
    out = emergence_core_forward(x, ctx, prepared)
    out = jax.block_until_ready(out)

    ref = emergence_core_reference(x, ctx, params, H)
    assert out.shape == (B, S, D)
    max_err = jnp.max(jnp.abs(out - ref))
    assert jnp.allclose(out, ref, atol=1e-3, rtol=1e-3), f"max abs err {max_err}"

    print("KERNEL_OK")
</pallas_src>

<mosaic_0001>
module attributes {stable_mosaic.version = 11 : i64} {
  func.func @emergence_core_kernel(%arg0: memref<2x8x32xf32, #tpu.memory_space<vmem>>, %arg1: memref<2x8x32xf32, #tpu.memory_space<vmem>>, %arg2: memref<768x128xf32, #tpu.memory_space<vmem>>, %arg3: memref<19x128xf32, #tpu.memory_space<vmem>>, %arg4: memref<2x8x32xf32, #tpu.memory_space<vmem>>) attributes {dimension_semantics = [], scalar_prefetch = 0 : i64, scratch_operands = 0 : i64, tpu.core_type = #tpu.core_type<tc>} {
    %c0 = arith.constant 0 : index
    %c0_0 = arith.constant 0 : index
    %c0_1 = arith.constant 0 : index
    %0 = vector.load %arg0[%c0, %c0_0, %c0_1] : memref<2x8x32xf32, #tpu.memory_space<vmem>>, vector<2x8x32xf32>
    %1 = vector.shape_cast %0 : vector<2x8x32xf32> to vector<16x32xf32>
    %c0_2 = arith.constant 0 : index
    %c0_3 = arith.constant 0 : index
    %c0_4 = arith.constant 0 : index
    %2 = vector.load %arg1[%c0_2, %c0_3, %c0_4] : memref<2x8x32xf32, #tpu.memory_space<vmem>>, vector<2x8x32xf32>
    %3 = vector.shape_cast %2 : vector<2x8x32xf32> to vector<16x32xf32>
    %c0_5 = arith.constant 0 : index
    %c0_6 = arith.constant 0 : index
    %4 = vector.load %arg2[%c0_5, %c0_6] : memref<768x128xf32, #tpu.memory_space<vmem>>, vector<32x128xf32>
    %cst = arith.constant dense<0.000000e+00> : vector<16x128xf32>
    %5 = tpu.matmul %1, %4, %cst {dimension_numbers = #tpu.dot_dimension_numbers<[1], [0], [0], [1], [0, 0, 1, 1], [], []>} : vector<16x32xf32>, vector<32x128xf32>, vector<16x128xf32> -> vector<16x128xf32>
    %c32 = arith.constant 32 : index
    %c0_7 = arith.constant 0 : index
    %6 = vector.load %arg2[%c32, %c0_7] : memref<768x128xf32, #tpu.memory_space<vmem>>, vector<32x128xf32>
    %cst_8 = arith.constant dense<0.000000e+00> : vector<16x128xf32>
    %7 = tpu.matmul %3, %6, %cst_8 {dimension_numbers = #tpu.dot_dimension_numbers<[1], [0], [0], [1], [0, 0, 1, 1], [], []>} : vector<16x32xf32>, vector<32x128xf32>, vector<16x128xf32> -> vector<16x128xf32>
    %8 = arith.addf %5, %7 : vector<16x128xf32>
    %c0_9 = arith.constant 0 : index
    %c0_10 = arith.constant 0 : index
    %9 = vector.load %arg3[%c0_9, %c0_10] : memref<19x128xf32, #tpu.memory_space<vmem>>, vector<1x128xf32>
    %10 = vector.broadcast %9 : vector<1x128xf32> to vector<16x128xf32>
    %11 = arith.addf %8, %10 : vector<16x128xf32>
    %cst_11 = arith.constant 5.000000e-01 : f32
    %12 = vector.broadcast %cst_11 : f32 to vector<16x128xf32>
    %13 = arith.mulf %12, %11 : vector<16x128xf32>
    %cst_12 = arith.constant 4.471500e-02 : f32
    %14 = vector.broadcast %cst_12 : f32 to vector<16x128xf32>
    %15 = arith.mulf %14, %11 : vector<16x128xf32>
    %16 = arith.mulf %15, %11 : vector<16x128xf32>
    %17 = arith.mulf %16, %11 : vector<16x128xf32>
    %18 = arith.addf %11, %17 : vector<16x128xf32>
    %cst_13 = arith.constant 0.797884583 : f32
    %19 = vector.broadcast %cst_13 : f32 to vector<16x128xf32>
    %20 = arith.mulf %19, %18 : vector<16x128xf32>
    %21 = math.tanh %20 : vector<16x128xf32>
    %cst_14 = arith.constant 1.000000e+00 : f32
    %22 = vector.broadcast %cst_14 : f32 to vector<16x128xf32>
    %23 = arith.addf %22, %21 : vector<16x128xf32>
    %24 = arith.mulf %13, %23 : vector<16x128xf32>
    %c64 = arith.constant 64 : index
    %c0_15 = arith.constant 0 : index
    %25 = vector.load %arg2[%c64, %c0_15] : memref<768x128xf32, #tpu.memory_space<vmem>>, vector<128x64xf32>
    %cst_16 = arith.constant dense<0.000000e+00> : vector<16x64xf32>
    %26 = tpu.matmul %24, %25, %cst_16 {dimension_numbers = #tpu.dot_dimension_numbers<[1], [0], [0], [1], [0, 0, 1, 1], [], []>} : vector<16x128xf32>, vector<128x64xf32>, vector<16x64xf32> -> vector<16x64xf32>
    %c1 = arith.constant 1 : index
    %c0_17 = arith.constant 0 : index
    %27 = vector.load %arg3[%c1, %c0_17] : memref<19x128xf32, #tpu.memory_space<vmem>>, vector<1x64xf32>
    %28 = vector.broadcast %27 : vector<1x64xf32> to vector<16x64xf32>
    %29 = arith.addf %26, %28 : vector<16x64xf32>
    %cst_18 = arith.constant dense<0.000000e+00> : vector<16xf32>
    %30 = vector.multi_reduction <add>, %29, %cst_18 [1] : vector<16x64xf32> to vector<16xf32>
    %31 = vector.shape_cast %30 : vector<16xf32> to vector<16x1xf32>
    %cst_19 = arith.constant 6.400000e+01 : f32
    %32 = vector.broadcast %cst_19 : f32 to vector<16x1xf32>
    %33 = arith.divf %31, %32 : vector<16x1xf32>
    %34 = vector.broadcast %33 : vector<16x1xf32> to vector<16x64xf32>
    %35 = arith.subf %29, %34 : vector<16x64xf32>
    %36 = arith.mulf %35, %35 : vector<16x64xf32>
    %cst_20 = arith.constant dense<0.000000e+00> : vector<16xf32>
    %37 = vector.multi_reduction <add>, %36, %cst_20 [1] : vector<16x64xf32> to vector<16xf32>
    %38 = vector.shape_cast %37 : vector<16xf32> to vector<16x1xf32>
    %cst_21 = arith.constant 6.400000e+01 : f32
    %39 = vector.broadcast %cst_21 : f32 to vector<16x1xf32>
    %40 = arith.divf %38, %39 : vector<16x1xf32>
    %41 = vector.broadcast %33 : vector<16x1xf32> to vector<16x64xf32>
    %42 = arith.subf %29, %41 : vector<16x64xf32>
    %cst_22 = arith.constant 9.99999974E-6 : f32
    %43 = vector.broadcast %cst_22 : f32 to vector<16x1xf32>
    %44 = arith.addf %40, %43 : vector<16x1xf32>
    %45 = math.rsqrt %44 : vector<16x1xf32>
    %46 = vector.broadcast %45 : vector<16x1xf32> to vector<16x64xf32>
    %47 = arith.mulf %42, %46 : vector<16x64xf32>
    %c2 = arith.constant 2 : index
    %c0_23 = arith.constant 0 : index
    %48 = vector.load %arg3[%c2, %c0_23] : memref<19x128xf32, #tpu.memory_space<vmem>>, vector<1x64xf32>
    %49 = vector.broadcast %48 : vector<1x64xf32> to vector<16x64xf32>
    %50 = arith.mulf %47, %49 : vector<16x64xf32>
    %c3 = arith.constant 3 : index
    %c0_24 = arith.constant 0 : index
    %51 = vector.load %arg3[%c3, %c0_24] : memref<19x128xf32, #tpu.memory_space<vmem>>, vector<1x64xf32>
    %52 = vector.broadcast %51 : vector<1x64xf32> to vector<16x64xf32>
    %53 = arith.addf %50, %52 : vector<16x64xf32>
    %cst_25 = arith.constant 5.000000e-01 : f32
    %54 = vector.broadcast %cst_25 : f32 to vector<16x64xf32>
    %55 = arith.mulf %54, %53 : vector<16x64xf32>
    %cst_26 = arith.constant 4.471500e-02 : f32
    %56 = vector.broadcast %cst_26 : f32 to vector<16x64xf32>
    %57 = arith.mulf %56, %53 : vector<16x64xf32>
    %58 = arith.mulf %57, %53 : vector<16x64xf32>
    %59 = arith.mulf %58, %53 : vector<16x64xf32>
    %60 = arith.addf %53, %59 : vector<16x64xf32>
    %cst_27 = arith.constant 0.797884583 : f32
    %61 = vector.broadcast %cst_27 : f32 to vector<16x64xf32>
    %62 = arith.mulf %61, %60 : vector<16x64xf32>
    %63 = math.tanh %62 : vector<16x64xf32>
    %cst_28 = arith.constant 1.000000e+00 : f32
    %64 = vector.broadcast %cst_28 : f32 to vector<16x64xf32>
    %65 = arith.addf %64, %63 : vector<16x64xf32>
    %66 = arith.mulf %55, %65 : vector<16x64xf32>
    %c4 = arith.constant 4 : index
    %c0_29 = arith.constant 0 : index
    %67 = vector.load %arg3[%c4, %c0_29] : memref<19x128xf32, #tpu.memory_space<vmem>>, vector<1x64xf32>
    %68 = vector.broadcast %67 : vector<1x64xf32> to vector<16x64xf32>
    %69 = arith.mulf %66, %68 : vector<16x64xf32>
    %cst_30 = arith.constant dense<0.000000e+00> : vector<16xf32>
    %70 = vector.multi_reduction <add>, %69, %cst_30 [1] : vector<16x64xf32> to vector<16xf32>
    %71 = vector.shape_cast %70 : vector<16xf32> to vector<16x1xf32>
    %c5 = arith.constant 5 : index
    %c0_31 = arith.constant 0 : index
    %72 = vector.load %arg3[%c5, %c0_31] : memref<19x128xf32, #tpu.memory_space<vmem>>, vector<1x1xf32>
    %73 = vector.broadcast %72 : vector<1x1xf32> to vector<16x1xf32>
    %74 = arith.addf %71, %73 : vector<16x1xf32>
    %cst_32 = arith.constant 0.000000e+00 : f32
    %75 = vector.broadcast %cst_32 : f32 to vector<16x1xf32>
    %76 = arith.subf %75, %74 : vector<16x1xf32>
    %77 = math.exp %76 : vector<16x1xf32>
    %cst_33 = arith.constant 1.000000e+00 : f32
    %78 = vector.broadcast %cst_33 : f32 to vector<16x1xf32>
    %79 = arith.addf %78, %77 : vector<16x1xf32>
    %80 = tpu.reciprocal %79 {approx = true} : vector<16x1xf32> -> vector<16x1xf32>
    %81 = vector.broadcast %80 : vector<16x1xf32> to vector<16x32xf32>
    %82 = arith.mulf %1, %81 : vector<16x32xf32>
    %c192 = arith.constant 192 : index
    %c0_34 = arith.constant 0 : index
    %83 = vector.load %arg2[%c192, %c0_34] : memref<768x128xf32, #tpu.memory_space<vmem>>, vector<32x32xf32>
    %cst_35 = arith.constant dense<0.000000e+00> : vector<16x32xf32>
    %84 = tpu.matmul %82, %83, %cst_35 {dimension_numbers = #tpu.dot_dimension_numbers<[1], [0], [0], [1], [0, 0, 1, 1], [], []>} : vector<16x32xf32>, vector<32x32xf32>, vector<16x32xf32> -> vector<16x32xf32>
    %c6 = arith.constant 6 : index
    %c0_36 = arith.constant 0 : index
    %85 = vector.load %arg3[%c6, %c0_36] : memref<19x128xf32, #tpu.memory_space<vmem>>, vector<1x32xf32>
    %86 = vector.broadcast %85 : vector<1x32xf32> to vector<16x32xf32>
    %87 = arith.addf %84, %86 : vector<16x32xf32>
    %c224 = arith.constant 224 : index
    %c0_37 = arith.constant 0 : index
    %88 = vector.load %arg2[%c224, %c0_37] : memref<768x128xf32, #tpu.memory_space<vmem>>, vector<32x32xf32>
    %cst_38 = arith.constant dense<0.000000e+00> : vector<16x32xf32>
    %89 = tpu.matmul %82, %88, %cst_38 {dimension_numbers = #tpu.dot_dimension_numbers<[1], [0], [0], [1], [0, 0, 1, 1], [], []>} : vector<16x32xf32>, vector<32x32xf32>, vector<16x32xf32> -> vector<16x32xf32>
    %c7 = arith.constant 7 : index
    %c0_39 = arith.constant 0 : index
    %90 = vector.load %arg3[%c7, %c0_39] : memref<19x128xf32, #tpu.memory_space<vmem>>, vector<1x32xf32>
    %91 = vector.broadcast %90 : vector<1x32xf32> to vector<16x32xf32>
    %92 = arith.addf %89, %91 : vector<16x32xf32>
    %c256 = arith.constant 256 : index
    %c0_40 = arith.constant 0 : index
    %93 = vector.load %arg2[%c256, %c0_40] : memref<768x128xf32, #tpu.memory_space<vmem>>, vector<32x32xf32>
    %cst_41 = arith.constant dense<0.000000e+00> : vector<16x32xf32>
    %94 = tpu.matmul %82, %93, %cst_41 {dimension_numbers = #tpu.dot_dimension_numbers<[1], [0], [0], [1], [0, 0, 1, 1], [], []>} : vector<16x32xf32>, vector<32x32xf32>, vector<16x32xf32> -> vector<16x32xf32>
    %c8 = arith.constant 8 : index
    %c0_42 = arith.constant 0 : index
    %95 = vector.load %arg3[%c8, %c0_42] : memref<19x128xf32, #tpu.memory_space<vmem>>, vector<1x32xf32>
    %96 = vector.broadcast %95 : vector<1x32xf32> to vector<16x32xf32>
    %97 = arith.addf %94, %96 : vector<16x32xf32>
    %98 = vector.shape_cast %87 : vector<16x32xf32> to vector<2x8x32xf32>
    %99 = vector.extract_strided_slice %98 {offsets = [0, 0, 0], sizes = [2, 8, 4], strides = [1, 1, 1]} : vector<2x8x32xf32> to vector<2x8x4xf32>
    %100 = vector.extract_strided_slice %98 {offsets = [0, 0, 4], sizes = [2, 8, 4], strides = [1, 1, 1]} : vector<2x8x32xf32> to vector<2x8x4xf32>
    %101 = vector.extract_strided_slice %98 {offsets = [0, 0, 8], sizes = [2, 8, 4], strides = [1, 1, 1]} : vector<2x8x32xf32> to vector<2x8x4xf32>
    %102 = vector.extract_strided_slice %98 {offsets = [0, 0, 12], sizes = [2, 8, 4], strides = [1, 1, 1]} : vector<2x8x32xf32> to vector<2x8x4xf32>
    %103 = vector.extract_strided_slice %98 {offsets = [0, 0, 16], sizes = [2, 8, 4], strides = [1, 1, 1]} : vector<2x8x32xf32> to vector<2x8x4xf32>
    %104 = vector.extract_strided_slice %98 {offsets = [0, 0, 20], sizes = [2, 8, 4], strides = [1, 1, 1]} : vector<2x8x32xf32> to vector<2x8x4xf32>
    %105 = vector.extract_strided_slice %98 {offsets = [0, 0, 24], sizes = [2, 8, 4], strides = [1, 1, 1]} : vector<2x8x32xf32> to vector<2x8x4xf32>
    %106 = vector.extract_strided_slice %98 {offsets = [0, 0, 28], sizes = [2, 8, 4], strides = [1, 1, 1]} : vector<2x8x32xf32> to vector<2x8x4xf32>
    %107 = tpu.concatenate %99, %100, %101, %102, %103, %104, %105, %106 in 0 : vector<2x8x4xf32>, vector<2x8x4xf32>, vector<2x8x4xf32>, vector<2x8x4xf32>, vector<2x8x4xf32>, vector<2x8x4xf32>, vector<2x8x4xf32>, vector<2x8x4xf32> -> vector<16x8x4xf32>
    %108 = vector.shape_cast %92 : vector<16x32xf32> to vector<2x8x32xf32>
    %109 = vector.extract_strided_slice %108 {offsets = [0, 0, 0], sizes = [2, 8, 4], strides = [1, 1, 1]} : vector<2x8x32xf32> to vector<2x8x4xf32>
    %110 = vector.extract_strided_slice %108 {offsets = [0, 0, 4], sizes = [2, 8, 4], strides = [1, 1, 1]} : vector<2x8x32xf32> to vector<2x8x4xf32>
    %111 = vector.extract_strided_slice %108 {offsets = [0, 0, 8], sizes = [2, 8, 4], strides = [1, 1, 1]} : vector<2x8x32xf32> to vector<2x8x4xf32>
    %112 = vector.extract_strided_slice %108 {offsets = [0, 0, 12], sizes = [2, 8, 4], strides = [1, 1, 1]} : vector<2x8x32xf32> to vector<2x8x4xf32>
    %113 = vector.extract_strided_slice %108 {offsets = [0, 0, 16], sizes = [2, 8, 4], strides = [1, 1, 1]} : vector<2x8x32xf32> to vector<2x8x4xf32>
    %114 = vector.extract_strided_slice %108 {offsets = [0, 0, 20], sizes = [2, 8, 4], strides = [1, 1, 1]} : vector<2x8x32xf32> to vector<2x8x4xf32>
    %115 = vector.extract_strided_slice %108 {offsets = [0, 0, 24], sizes = [2, 8, 4], strides = [1, 1, 1]} : vector<2x8x32xf32> to vector<2x8x4xf32>
    %116 = vector.extract_strided_slice %108 {offsets = [0, 0, 28], sizes = [2, 8, 4], strides = [1, 1, 1]} : vector<2x8x32xf32> to vector<2x8x4xf32>
    %117 = tpu.concatenate %109, %110, %111, %112, %113, %114, %115, %116 in 0 : vector<2x8x4xf32>, vector<2x8x4xf32>, vector<2x8x4xf32>, vector<2x8x4xf32>, vector<2x8x4xf32>, vector<2x8x4xf32>, vector<2x8x4xf32>, vector<2x8x4xf32> -> vector<16x8x4xf32>
    %118 = vector.shape_cast %97 : vector<16x32xf32> to vector<2x8x32xf32>
    %119 = vector.extract_strided_slice %118 {offsets = [0, 0, 0], sizes = [2, 8, 4], strides = [1, 1, 1]} : vector<2x8x32xf32> to vector<2x8x4xf32>
    %120 = vector.extract_strided_slice %118 {offsets = [0, 0, 4], sizes = [2, 8, 4], strides = [1, 1, 1]} : vector<2x8x32xf32> to vector<2x8x4xf32>
    %121 = vector.extract_strided_slice %118 {offsets = [0, 0, 8], sizes = [2, 8, 4], strides = [1, 1, 1]} : vector<2x8x32xf32> to vector<2x8x4xf32>
    %122 = vector.extract_strided_slice %118 {offsets = [0, 0, 12], sizes = [2, 8, 4], strides = [1, 1, 1]} : vector<2x8x32xf32> to vector<2x8x4xf32>
    %123 = vector.extract_strided_slice %118 {offsets = [0, 0, 16], sizes = [2, 8, 4], strides = [1, 1, 1]} : vector<2x8x32xf32> to vector<2x8x4xf32>
    %124 = vector.extract_strided_slice %118 {offsets = [0, 0, 20], sizes = [2, 8, 4], strides = [1, 1, 1]} : vector<2x8x32xf32> to vector<2x8x4xf32>
    %125 = vector.extract_strided_slice %118 {offsets = [0, 0, 24], sizes = [2, 8, 4], strides = [1, 1, 1]} : vector<2x8x32xf32> to vector<2x8x4xf32>
    %126 = vector.extract_strided_slice %118 {offsets = [0, 0, 28], sizes = [2, 8, 4], strides = [1, 1, 1]} : vector<2x8x32xf32> to vector<2x8x4xf32>
    %127 = tpu.concatenate %119, %120, %121, %122, %123, %124, %125, %126 in 0 : vector<2x8x4xf32>, vector<2x8x4xf32>, vector<2x8x4xf32>, vector<2x8x4xf32>, vector<2x8x4xf32>, vector<2x8x4xf32>, vector<2x8x4xf32>, vector<2x8x4xf32> -> vector<16x8x4xf32>
    "tpu.trace_start"() <{level = 10 : i32, message = "nqd,nkd->nqk"}> : () -> ()
    %cst_43 = arith.constant dense<0.000000e+00> : vector<16x8x8xf32>
    %128 = tpu.matmul %107, %117, %cst_43 {dimension_numbers = #tpu.dot_dimension_numbers<[2], [2], [1], [1], [0, 0, 0, 1, 1, 1], [0], [0]>} : vector<16x8x4xf32>, vector<16x8x4xf32>, vector<16x8x8xf32> -> vector<16x8x8xf32>
    "tpu.trace_stop"() : () -> ()
    %cst_44 = arith.constant dense<0xFF800000> : vector<16x8xf32>
    %129 = vector.multi_reduction <maximumf>, %128, %cst_44 [2] : vector<16x8x8xf32> to vector<16x8xf32>
    %130 = vector.shape_cast %129 : vector<16x8xf32> to vector<16x8x1xf32>
    %131 = vector.broadcast %130 : vector<16x8x1xf32> to vector<16x8x8xf32>
    %132 = arith.subf %128, %131 : vector<16x8x8xf32>
    %133 = math.exp %132 : vector<16x8x8xf32>
    %cst_45 = arith.constant dense<0.000000e+00> : vector<16x8xf32>
    %134 = vector.multi_reduction <add>, %133, %cst_45 [2] : vector<16x8x8xf32> to vector<16x8xf32>
    %135 = vector.shape_cast %134 : vector<16x8xf32> to vector<16x8x1xf32>
    %136 = tpu.reciprocal %135 {approx = true} : vector<16x8x1xf32> -> vector<16x8x1xf32>
    %137 = vector.broadcast %136 : vector<16x8x1xf32> to vector<16x8x8xf32>
    %138 = arith.mulf %133, %137 : vector<16x8x8xf32>
    "tpu.trace_start"() <{level = 10 : i32, message = "nqk,nkd->nqd"}> : () -> ()
    %cst_46 = arith.constant dense<0.000000e+00> : vector<16x8x4xf32>
    %139 = tpu.matmul %138, %127, %cst_46 {dimension_numbers = #tpu.dot_dimension_numbers<[2], [1], [1], [2], [0, 0, 0, 1, 1, 2], [0], [0]>} : vector<16x8x8xf32>, vector<16x8x4xf32>, vector<16x8x4xf32> -> vector<16x8x4xf32>
    "tpu.trace_stop"() : () -> ()
    %140 = vector.shape_cast %139 : vector<16x8x4xf32> to vector<8x2x8x4xf32>
    %141 = vector.extract_strided_slice %140 {offsets = [0, 0, 0, 0], sizes = [1, 2, 8, 4], strides = [1, 1, 1, 1]} : vector<8x2x8x4xf32> to vector<1x2x8x4xf32>
    %142 = vector.shape_cast %141 : vector<1x2x8x4xf32> to vector<2x8x4xf32>
    %143 = vector.shape_cast %142 : vector<2x8x4xf32> to vector<16x4xf32>
    %144 = vector.extract_strided_slice %140 {offsets = [1, 0, 0, 0], sizes = [1, 2, 8, 4], strides = [1, 1, 1, 1]} : vector<8x2x8x4xf32> to vector<1x2x8x4xf32>
    %145 = vector.shape_cast %144 : vector<1x2x8x4xf32> to vector<2x8x4xf32>
    %146 = vector.shape_cast %145 : vector<2x8x4xf32> to vector<16x4xf32>
    %147 = vector.extract_strided_slice %140 {offsets = [2, 0, 0, 0], sizes = [1, 2, 8, 4], strides = [1, 1, 1, 1]} : vector<8x2x8x4xf32> to vector<1x2x8x4xf32>
    %148 = vector.shape_cast %147 : vector<1x2x8x4xf32> to vector<2x8x4xf32>
    %149 = vector.shape_cast %148 : vector<2x8x4xf32> to vector<16x4xf32>
    %150 = vector.extract_strided_slice %140 {offsets = [3, 0, 0, 0], sizes = [1, 2, 8, 4], strides = [1, 1, 1, 1]} : vector<8x2x8x4xf32> to vector<1x2x8x4xf32>
    %151 = vector.shape_cast %150 : vector<1x2x8x4xf32> to vector<2x8x4xf32>
    %152 = vector.shape_cast %151 : vector<2x8x4xf32> to vector<16x4xf32>
    %153 = vector.extract_strided_slice %140 {offsets = [4, 0, 0, 0], sizes = [1, 2, 8, 4], strides = [1, 1, 1, 1]} : vector<8x2x8x4xf32> to vector<1x2x8x4xf32>
    %154 = vector.shape_cast %153 : vector<1x2x8x4xf32> to vector<2x8x4xf32>
    %155 = vector.shape_cast %154 : vector<2x8x4xf32> to vector<16x4xf32>
    %156 = vector.extract_strided_slice %140 {offsets = [5, 0, 0, 0], sizes = [1, 2, 8, 4], strides = [1, 1, 1, 1]} : vector<8x2x8x4xf32> to vector<1x2x8x4xf32>
    %157 = vector.shape_cast %156 : vector<1x2x8x4xf32> to vector<2x8x4xf32>
    %158 = vector.shape_cast %157 : vector<2x8x4xf32> to vector<16x4xf32>
    %159 = vector.extract_strided_slice %140 {offsets = [6, 0, 0, 0], sizes = [1, 2, 8, 4], strides = [1, 1, 1, 1]} : vector<8x2x8x4xf32> to vector<1x2x8x4xf32>
    %160 = vector.shape_cast %159 : vector<1x2x8x4xf32> to vector<2x8x4xf32>
    %161 = vector.shape_cast %160 : vector<2x8x4xf32> to vector<16x4xf32>
    %162 = vector.extract_strided_slice %140 {offsets = [7, 0, 0, 0], sizes = [1, 2, 8, 4], strides = [1, 1, 1, 1]} : vector<8x2x8x4xf32> to vector<1x2x8x4xf32>
    %163 = vector.shape_cast %162 : vector<1x2x8x4xf32> to vector<2x8x4xf32>
    %164 = vector.shape_cast %163 : vector<2x8x4xf32> to vector<16x4xf32>
    %165 = tpu.concatenate %143, %146, %149, %152, %155, %158, %161, %164 in 1 : vector<16x4xf32>, vector<16x4xf32>, vector<16x4xf32>, vector<16x4xf32>, vector<16x4xf32>, vector<16x4xf32>, vector<16x4xf32>, vector<16x4xf32> -> vector<16x32xf32>
    %c288 = arith.constant 288 : index
    %c0_47 = arith.constant 0 : index
    %166 = vector.load %arg2[%c288, %c0_47] : memref<768x128xf32, #tpu.memory_space<vmem>>, vector<32x32xf32>
    %cst_48 = arith.constant dense<0.000000e+00> : vector<16x32xf32>
    %167 = tpu.matmul %165, %166, %cst_48 {dimension_numbers = #tpu.dot_dimension_numbers<[1], [0], [0], [1], [0, 0, 1, 1], [], []>} : vector<16x32xf32>, vector<32x32xf32>, vector<16x32xf32> -> vector<16x32xf32>
    %c9 = arith.constant 9 : index
    %c0_49 = arith.constant 0 : index
    %168 = vector.load %arg3[%c9, %c0_49] : memref<19x128xf32, #tpu.memory_space<vmem>>, vector<1x32xf32>
    %169 = vector.broadcast %168 : vector<1x32xf32> to vector<16x32xf32>
    %170 = arith.addf %167, %169 : vector<16x32xf32>
    %c320 = arith.constant 320 : index
    %c0_50 = arith.constant 0 : index
    %171 = vector.load %arg2[%c320, %c0_50] : memref<768x128xf32, #tpu.memory_space<vmem>>, vector<32x128xf32>
    %cst_51 = arith.constant dense<0.000000e+00> : vector<16x128xf32>
    %172 = tpu.matmul %170, %171, %cst_51 {dimension_numbers = #tpu.dot_dimension_numbers<[1], [0], [0], [1], [0, 0, 1, 1], [], []>} : vector<16x32xf32>, vector<32x128xf32>, vector<16x128xf32> -> vector<16x128xf32>
    %c10 = arith.constant 10 : index
    %c0_52 = arith.constant 0 : index
    %173 = vector.load %arg3[%c10, %c0_52] : memref<19x128xf32, #tpu.memory_space<vmem>>, vector<1x128xf32>
    %174 = vector.broadcast %173 : vector<1x128xf32> to vector<16x128xf32>
    %175 = arith.addf %172, %174 : vector<16x128xf32>
    %cst_53 = arith.constant 5.000000e-01 : f32
    %176 = vector.broadcast %cst_53 : f32 to vector<16x128xf32>
    %177 = arith.mulf %176, %175 : vector<16x128xf32>
    %cst_54 = arith.constant 4.471500e-02 : f32
    %178 = vector.broadcast %cst_54 : f32 to vector<16x128xf32>
    %179 = arith.mulf %178, %175 : vector<16x128xf32>
    %180 = arith.mulf %179, %175 : vector<16x128xf32>
    %181 = arith.mulf %180, %175 : vector<16x128xf32>
    %182 = arith.addf %175, %181 : vector<16x128xf32>
    %cst_55 = arith.constant 0.797884583 : f32
    %183 = vector.broadcast %cst_55 : f32 to vector<16x128xf32>
    %184 = arith.mulf %183, %182 : vector<16x128xf32>
    %185 = math.tanh %184 : vector<16x128xf32>
    %cst_56 = arith.constant 1.000000e+00 : f32
    %186 = vector.broadcast %cst_56 : f32 to vector<16x128xf32>
    %187 = arith.addf %186, %185 : vector<16x128xf32>
    %188 = arith.mulf %177, %187 : vector<16x128xf32>
    %c352 = arith.constant 352 : index
    %c0_57 = arith.constant 0 : index
    %189 = vector.load %arg2[%c352, %c0_57] : memref<768x128xf32, #tpu.memory_space<vmem>>, vector<128x64xf32>
    %cst_58 = arith.constant dense<0.000000e+00> : vector<16x64xf32>
    %190 = tpu.matmul %188, %189, %cst_58 {dimension_numbers = #tpu.dot_dimension_numbers<[1], [0], [0], [1], [0, 0, 1, 1], [], []>} : vector<16x128xf32>, vector<128x64xf32>, vector<16x64xf32> -> vector<16x64xf32>
    %c11 = arith.constant 11 : index
    %c0_59 = arith.constant 0 : index
    %191 = vector.load %arg3[%c11, %c0_59] : memref<19x128xf32, #tpu.memory_space<vmem>>, vector<1x64xf32>
    %192 = vector.broadcast %191 : vector<1x64xf32> to vector<16x64xf32>
    %193 = arith.addf %190, %192 : vector<16x64xf32>
    %cst_60 = arith.constant 5.000000e-01 : f32
    %194 = vector.broadcast %cst_60 : f32 to vector<16x64xf32>
    %195 = arith.mulf %194, %193 : vector<16x64xf32>
    %cst_61 = arith.constant 4.471500e-02 : f32
    %196 = vector.broadcast %cst_61 : f32 to vector<16x64xf32>
    %197 = arith.mulf %196, %193 : vector<16x64xf32>
    %198 = arith.mulf %197, %193 : vector<16x64xf32>
    %199 = arith.mulf %198, %193 : vector<16x64xf32>
    %200 = arith.addf %193, %199 : vector<16x64xf32>
    %cst_62 = arith.constant 0.797884583 : f32
    %201 = vector.broadcast %cst_62 : f32 to vector<16x64xf32>
    %202 = arith.mulf %201, %200 : vector<16x64xf32>
    %203 = math.tanh %202 : vector<16x64xf32>
    %cst_63 = arith.constant 1.000000e+00 : f32
    %204 = vector.broadcast %cst_63 : f32 to vector<16x64xf32>
    %205 = arith.addf %204, %203 : vector<16x64xf32>
    %206 = arith.mulf %195, %205 : vector<16x64xf32>
    %c480 = arith.constant 480 : index
    %c0_64 = arith.constant 0 : index
    %207 = vector.load %arg2[%c480, %c0_64] : memref<768x128xf32, #tpu.memory_space<vmem>>, vector<64x32xf32>
    %cst_65 = arith.constant dense<0.000000e+00> : vector<16x32xf32>
    %208 = tpu.matmul %206, %207, %cst_65 {dimension_numbers = #tpu.dot_dimension_numbers<[1], [0], [0], [1], [0, 0, 1, 1], [], []>} : vector<16x64xf32>, vector<64x32xf32>, vector<16x32xf32> -> vector<16x32xf32>
    %c12 = arith.constant 12 : index
    %c0_66 = arith.constant 0 : index
    %209 = vector.load %arg3[%c12, %c0_66] : memref<19x128xf32, #tpu.memory_space<vmem>>, vector<1x32xf32>
    %210 = vector.broadcast %209 : vector<1x32xf32> to vector<16x32xf32>
    %211 = arith.addf %208, %210 : vector<16x32xf32>
    %212 = arith.addf %211, %82 : vector<16x32xf32>
    %c544 = arith.constant 544 : index
    %c0_67 = arith.constant 0 : index
    %213 = vector.load %arg2[%c544, %c0_67] : memref<768x128xf32, #tpu.memory_space<vmem>>, vector<32x32xf32>
    %cst_68 = arith.constant dense<0.000000e+00> : vector<16x32xf32>
    %214 = tpu.matmul %212, %213, %cst_68 {dimension_numbers = #tpu.dot_dimension_numbers<[1], [0], [0], [1], [0, 0, 1, 1], [], []>} : vector<16x32xf32>, vector<32x32xf32>, vector<16x32xf32> -> vector<16x32xf32>
    %c13 = arith.constant 13 : index
    %c0_69 = arith.constant 0 : index
    %215 = vector.load %arg3[%c13, %c0_69] : memref<19x128xf32, #tpu.memory_space<vmem>>, vector<1x32xf32>
    %216 = vector.broadcast %215 : vector<1x32xf32> to vector<16x32xf32>
    %217 = arith.addf %214, %216 : vector<16x32xf32>
    %c576 = arith.constant 576 : index
    %c0_70 = arith.constant 0 : index
    %218 = vector.load %arg2[%c576, %c0_70] : memref<768x128xf32, #tpu.memory_space<vmem>>, vector<32x32xf32>
    %cst_71 = arith.constant dense<0.000000e+00> : vector<16x32xf32>
    %219 = tpu.matmul %3, %218, %cst_71 {dimension_numbers = #tpu.dot_dimension_numbers<[1], [0], [0], [1], [0, 0, 1, 1], [], []>} : vector<16x32xf32>, vector<32x32xf32>, vector<16x32xf32> -> vector<16x32xf32>
    %c14 = arith.constant 14 : index
    %c0_72 = arith.constant 0 : index
    %220 = vector.load %arg3[%c14, %c0_72] : memref<19x128xf32, #tpu.memory_space<vmem>>, vector<1x32xf32>
    %221 = vector.broadcast %220 : vector<1x32xf32> to vector<16x32xf32>
    %222 = arith.addf %219, %221 : vector<16x32xf32>
    %c608 = arith.constant 608 : index
    %c0_73 = arith.constant 0 : index
    %223 = vector.load %arg2[%c608, %c0_73] : memref<768x128xf32, #tpu.memory_space<vmem>>, vector<32x32xf32>
    %cst_74 = arith.constant dense<0.000000e+00> : vector<16x32xf32>
    %224 = tpu.matmul %3, %223, %cst_74 {dimension_numbers = #tpu.dot_dimension_numbers<[1], [0], [0], [1], [0, 0, 1, 1], [], []>} : vector<16x32xf32>, vector<32x32xf32>, vector<16x32xf32> -> vector<16x32xf32>
    %c15 = arith.constant 15 : index
    %c0_75 = arith.constant 0 : index
    %225 = vector.load %arg3[%c15, %c0_75] : memref<19x128xf32, #tpu.memory_space<vmem>>, vector<1x32xf32>
    %226 = vector.broadcast %225 : vector<1x32xf32> to vector<16x32xf32>
    %227 = arith.addf %224, %226 : vector<16x32xf32>
    %228 = vector.shape_cast %217 : vector<16x32xf32> to vector<2x8x32xf32>
    %229 = vector.extract_strided_slice %228 {offsets = [0, 0, 0], sizes = [2, 8, 4], strides = [1, 1, 1]} : vector<2x8x32xf32> to vector<2x8x4xf32>
    %230 = vector.extract_strided_slice %228 {offsets = [0, 0, 4], sizes = [2, 8, 4], strides = [1, 1, 1]} : vector<2x8x32xf32> to vector<2x8x4xf32>
    %231 = vector.extract_strided_slice %228 {offsets = [0, 0, 8], sizes = [2, 8, 4], strides = [1, 1, 1]} : vector<2x8x32xf32> to vector<2x8x4xf32>
    %232 = vector.extract_strided_slice %228 {offsets = [0, 0, 12], sizes = [2, 8, 4], strides = [1, 1, 1]} : vector<2x8x32xf32> to vector<2x8x4xf32>
    %233 = vector.extract_strided_slice %228 {offsets = [0, 0, 16], sizes = [2, 8, 4], strides = [1, 1, 1]} : vector<2x8x32xf32> to vector<2x8x4xf32>
    %234 = vector.extract_strided_slice %228 {offsets = [0, 0, 20], sizes = [2, 8, 4], strides = [1, 1, 1]} : vector<2x8x32xf32> to vector<2x8x4xf32>
    %235 = vector.extract_strided_slice %228 {offsets = [0, 0, 24], sizes = [2, 8, 4], strides = [1, 1, 1]} : vector<2x8x32xf32> to vector<2x8x4xf32>
    %236 = vector.extract_strided_slice %228 {offsets = [0, 0, 28], sizes = [2, 8, 4], strides = [1, 1, 1]} : vector<2x8x32xf32> to vector<2x8x4xf32>
    %237 = tpu.concatenate %229, %230, %231, %232, %233, %234, %235, %236 in 0 : vector<2x8x4xf32>, vector<2x8x4xf32>, vector<2x8x4xf32>, vector<2x8x4xf32>, vector<2x8x4xf32>, vector<2x8x4xf32>, vector<2x8x4xf32>, vector<2x8x4xf32> -> vector<16x8x4xf32>
    %238 = vector.shape_cast %222 : vector<16x32xf32> to vector<2x8x32xf32>
    %239 = vector.extract_strided_slice %238 {offsets = [0, 0, 0], sizes = [2, 8, 4], strides = [1, 1, 1]} : vector<2x8x32xf32> to vector<2x8x4xf32>
    %240 = vector.extract_strided_slice %238 {offsets = [0, 0, 4], sizes = [2, 8, 4], strides = [1, 1, 1]} : vector<2x8x32xf32> to vector<2x8x4xf32>
    %241 = vector.extract_strided_slice %238 {offsets = [0, 0, 8], sizes = [2, 8, 4], strides = [1, 1, 1]} : vector<2x8x32xf32> to vector<2x8x4xf32>
    %242 = vector.extract_strided_slice %238 {offsets = [0, 0, 12], sizes = [2, 8, 4], strides = [1, 1, 1]} : vector<2x8x32xf32> to vector<2x8x4xf32>
    %243 = vector.extract_strided_slice %238 {offsets = [0, 0, 16], sizes = [2, 8, 4], strides = [1, 1, 1]} : vector<2x8x32xf32> to vector<2x8x4xf32>
    %244 = vector.extract_strided_slice %238 {offsets = [0, 0, 20], sizes = [2, 8, 4], strides = [1, 1, 1]} : vector<2x8x32xf32> to vector<2x8x4xf32>
    %245 = vector.extract_strided_slice %238 {offsets = [0, 0, 24], sizes = [2, 8, 4], strides = [1, 1, 1]} : vector<2x8x32xf32> to vector<2x8x4xf32>
    %246 = vector.extract_strided_slice %238 {offsets = [0, 0, 28], sizes = [2, 8, 4], strides = [1, 1, 1]} : vector<2x8x32xf32> to vector<2x8x4xf32>
    %247 = tpu.concatenate %239, %240, %241, %242, %243, %244, %245, %246 in 0 : vector<2x8x4xf32>, vector<2x8x4xf32>, vector<2x8x4xf32>, vector<2x8x4xf32>, vector<2x8x4xf32>, vector<2x8x4xf32>, vector<2x8x4xf32>, vector<2x8x4xf32> -> vector<16x8x4xf32>
    %248 = vector.shape_cast %227 : vector<16x32xf32> to vector<2x8x32xf32>
    %249 = vector.extract_strided_slice %248 {offsets = [0, 0, 0], sizes = [2, 8, 4], strides = [1, 1, 1]} : vector<2x8x32xf32> to vector<2x8x4xf32>
    %250 = vector.extract_strided_slice %248 {offsets = [0, 0, 4], sizes = [2, 8, 4], strides = [1, 1, 1]} : vector<2x8x32xf32> to vector<2x8x4xf32>
    %251 = vector.extract_strided_slice %248 {offsets = [0, 0, 8], sizes = [2, 8, 4], strides = [1, 1, 1]} : vector<2x8x32xf32> to vector<2x8x4xf32>
    %252 = vector.extract_strided_slice %248 {offsets = [0, 0, 12], sizes = [2, 8, 4], strides = [1, 1, 1]} : vector<2x8x32xf32> to vector<2x8x4xf32>
    %253 = vector.extract_strided_slice %248 {offsets = [0, 0, 16], sizes = [2, 8, 4], strides = [1, 1, 1]} : vector<2x8x32xf32> to vector<2x8x4xf32>
    %254 = vector.extract_strided_slice %248 {offsets = [0, 0, 20], sizes = [2, 8, 4], strides = [1, 1, 1]} : vector<2x8x32xf32> to vector<2x8x4xf32>
    %255 = vector.extract_strided_slice %248 {offsets = [0, 0, 24], sizes = [2, 8, 4], strides = [1, 1, 1]} : vector<2x8x32xf32> to vector<2x8x4xf32>
    %256 = vector.extract_strided_slice %248 {offsets = [0, 0, 28], sizes = [2, 8, 4], strides = [1, 1, 1]} : vector<2x8x32xf32> to vector<2x8x4xf32>
    %257 = tpu.concatenate %249, %250, %251, %252, %253, %254, %255, %256 in 0 : vector<2x8x4xf32>, vector<2x8x4xf32>, vector<2x8x4xf32>, vector<2x8x4xf32>, vector<2x8x4xf32>, vector<2x8x4xf32>, vector<2x8x4xf32>, vector<2x8x4xf32> -> vector<16x8x4xf32>
    "tpu.trace_start"() <{level = 10 : i32, message = "nqd,nkd->nqk"}> : () -> ()
    %cst_76 = arith.constant dense<0.000000e+00> : vector<16x8x8xf32>
    %258 = tpu.matmul %237, %247, %cst_76 {dimension_numbers = #tpu.dot_dimension_numbers<[2], [2], [1], [1], [0, 0, 0, 1, 1, 1], [0], [0]>} : vector<16x8x4xf32>, vector<16x8x4xf32>, vector<16x8x8xf32> -> vector<16x8x8xf32>
    "tpu.trace_stop"() : () -> ()
    %cst_77 = arith.constant dense<0xFF800000> : vector<16x8xf32>
    %259 = vector.multi_reduction <maximumf>, %258, %cst_77 [2] : vector<16x8x8xf32> to vector<16x8xf32>
    %260 = vector.shape_cast %259 : vector<16x8xf32> to vector<16x8x1xf32>
    %261 = vector.broadcast %260 : vector<16x8x1xf32> to vector<16x8x8xf32>
    %262 = arith.subf %258, %261 : vector<16x8x8xf32>
    %263 = math.exp %262 : vector<16x8x8xf32>
    %cst_78 = arith.constant dense<0.000000e+00> : vector<16x8xf32>
    %264 = vector.multi_reduction <add>, %263, %cst_78 [2] : vector<16x8x8xf32> to vector<16x8xf32>
    %265 = vector.shape_cast %264 : vector<16x8xf32> to vector<16x8x1xf32>
    %266 = tpu.reciprocal %265 {approx = true} : vector<16x8x1xf32> -> vector<16x8x1xf32>
    %267 = vector.broadcast %266 : vector<16x8x1xf32> to vector<16x8x8xf32>
    %268 = arith.mulf %263, %267 : vector<16x8x8xf32>
    "tpu.trace_start"() <{level = 10 : i32, message = "nqk,nkd->nqd"}> : () -> ()
    %cst_79 = arith.constant dense<0.000000e+00> : vector<16x8x4xf32>
    %269 = tpu.matmul %268, %257, %cst_79 {dimension_numbers = #tpu.dot_dimension_numbers<[2], [1], [1], [2], [0, 0, 0, 1, 1, 2], [0], [0]>} : vector<16x8x8xf32>, vector<16x8x4xf32>, vector<16x8x4xf32> -> vector<16x8x4xf32>
    "tpu.trace_stop"() : () -> ()
    %270 = vector.shape_cast %269 : vector<16x8x4xf32> to vector<8x2x8x4xf32>
    %271 = vector.extract_strided_slice %270 {offsets = [0, 0, 0, 0], sizes = [1, 2, 8, 4], strides = [1, 1, 1, 1]} : vector<8x2x8x4xf32> to vector<1x2x8x4xf32>
    %272 = vector.shape_cast %271 : vector<1x2x8x4xf32> to vector<2x8x4xf32>
    %273 = vector.shape_cast %272 : vector<2x8x4xf32> to vector<16x4xf32>
    %274 = vector.extract_strided_slice %270 {offsets = [1, 0, 0, 0], sizes = [1, 2, 8, 4], strides = [1, 1, 1, 1]} : vector<8x2x8x4xf32> to vector<1x2x8x4xf32>
    %275 = vector.shape_cast %274 : vector<1x2x8x4xf32> to vector<2x8x4xf32>
    %276 = vector.shape_cast %275 : vector<2x8x4xf32> to vector<16x4xf32>
    %277 = vector.extract_strided_slice %270 {offsets = [2, 0, 0, 0], sizes = [1, 2, 8, 4], strides = [1, 1, 1, 1]} : vector<8x2x8x4xf32> to vector<1x2x8x4xf32>
    %278 = vector.shape_cast %277 : vector<1x2x8x4xf32> to vector<2x8x4xf32>
    %279 = vector.shape_cast %278 : vector<2x8x4xf32> to vector<16x4xf32>
    %280 = vector.extract_strided_slice %270 {offsets = [3, 0, 0, 0], sizes = [1, 2, 8, 4], strides = [1, 1, 1, 1]} : vector<8x2x8x4xf32> to vector<1x2x8x4xf32>
    %281 = vector.shape_cast %280 : vector<1x2x8x4xf32> to vector<2x8x4xf32>
    %282 = vector.shape_cast %281 : vector<2x8x4xf32> to vector<16x4xf32>
    %283 = vector.extract_strided_slice %270 {offsets = [4, 0, 0, 0], sizes = [1, 2, 8, 4], strides = [1, 1, 1, 1]} : vector<8x2x8x4xf32> to vector<1x2x8x4xf32>
    %284 = vector.shape_cast %283 : vector<1x2x8x4xf32> to vector<2x8x4xf32>
    %285 = vector.shape_cast %284 : vector<2x8x4xf32> to vector<16x4xf32>
    %286 = vector.extract_strided_slice %270 {offsets = [5, 0, 0, 0], sizes = [1, 2, 8, 4], strides = [1, 1, 1, 1]} : vector<8x2x8x4xf32> to vector<1x2x8x4xf32>
    %287 = vector.shape_cast %286 : vector<1x2x8x4xf32> to vector<2x8x4xf32>
    %288 = vector.shape_cast %287 : vector<2x8x4xf32> to vector<16x4xf32>
    %289 = vector.extract_strided_slice %270 {offsets = [6, 0, 0, 0], sizes = [1, 2, 8, 4], strides = [1, 1, 1, 1]} : vector<8x2x8x4xf32> to vector<1x2x8x4xf32>
    %290 = vector.shape_cast %289 : vector<1x2x8x4xf32> to vector<2x8x4xf32>
    %291 = vector.shape_cast %290 : vector<2x8x4xf32> to vector<16x4xf32>
    %292 = vector.extract_strided_slice %270 {offsets = [7, 0, 0, 0], sizes = [1, 2, 8, 4], strides = [1, 1, 1, 1]} : vector<8x2x8x4xf32> to vector<1x2x8x4xf32>
    %293 = vector.shape_cast %292 : vector<1x2x8x4xf32> to vector<2x8x4xf32>
    %294 = vector.shape_cast %293 : vector<2x8x4xf32> to vector<16x4xf32>
    %295 = tpu.concatenate %273, %276, %279, %282, %285, %288, %291, %294 in 1 : vector<16x4xf32>, vector<16x4xf32>, vector<16x4xf32>, vector<16x4xf32>, vector<16x4xf32>, vector<16x4xf32>, vector<16x4xf32>, vector<16x4xf32> -> vector<16x32xf32>
    %c640 = arith.constant 640 : index
    %c0_80 = arith.constant 0 : index
    %296 = vector.load %arg2[%c640, %c0_80] : memref<768x128xf32, #tpu.memory_space<vmem>>, vector<32x32xf32>
    %cst_81 = arith.constant dense<0.000000e+00> : vector<16x32xf32>
    %297 = tpu.matmul %295, %296, %cst_81 {dimension_numbers = #tpu.dot_dimension_numbers<[1], [0], [0], [1], [0, 0, 1, 1], [], []>} : vector<16x32xf32>, vector<32x32xf32>, vector<16x32xf32> -> vector<16x32xf32>
    %c16 = arith.constant 16 : index
    %c0_82 = arith.constant 0 : index
    %298 = vector.load %arg3[%c16, %c0_82] : memref<19x128xf32, #tpu.memory_space<vmem>>, vector<1x32xf32>
    %299 = vector.broadcast %298 : vector<1x32xf32> to vector<16x32xf32>
    %300 = arith.addf %297, %299 : vector<16x32xf32>
    %301 = arith.addf %300, %212 : vector<16x32xf32>
    %c672 = arith.constant 672 : index
    %c0_83 = arith.constant 0 : index
    %302 = vector.load %arg2[%c672, %c0_83] : memref<768x128xf32, #tpu.memory_space<vmem>>, vector<32x64xf32>
    %cst_84 = arith.constant dense<0.000000e+00> : vector<16x64xf32>
    %303 = tpu.matmul %301, %302, %cst_84 {dimension_numbers = #tpu.dot_dimension_numbers<[1], [0], [0], [1], [0, 0, 1, 1], [], []>} : vector<16x32xf32>, vector<32x64xf32>, vector<16x64xf32> -> vector<16x64xf32>
    %c17 = arith.constant 17 : index
    %c0_85 = arith.constant 0 : index
    %304 = vector.load %arg3[%c17, %c0_85] : memref<19x128xf32, #tpu.memory_space<vmem>>, vector<1x64xf32>
    %305 = vector.broadcast %304 : vector<1x64xf32> to vector<16x64xf32>
    %306 = arith.addf %303, %305 : vector<16x64xf32>
    %cst_86 = arith.constant 0.000000e+00 : f32
    %307 = vector.broadcast %cst_86 : f32 to vector<16x64xf32>
    %308 = arith.maximumf %306, %307 : vector<16x64xf32>
    %c704 = arith.constant 704 : index
    %c0_87 = arith.constant 0 : index
    %309 = vector.load %arg2[%c704, %c0_87] : memref<768x128xf32, #tpu.memory_space<vmem>>, vector<64x32xf32>
    %cst_88 = arith.constant dense<0.000000e+00> : vector<16x32xf32>
    %310 = tpu.matmul %308, %309, %cst_88 {dimension_numbers = #tpu.dot_dimension_numbers<[1], [0], [0], [1], [0, 0, 1, 1], [], []>} : vector<16x64xf32>, vector<64x32xf32>, vector<16x32xf32> -> vector<16x32xf32>
    %c18 = arith.constant 18 : index
    %c0_89 = arith.constant 0 : index
    %311 = vector.load %arg3[%c18, %c0_89] : memref<19x128xf32, #tpu.memory_space<vmem>>, vector<1x32xf32>
    %312 = vector.broadcast %311 : vector<1x32xf32> to vector<16x32xf32>
    %313 = arith.addf %310, %312 : vector<16x32xf32>
    %314 = vector.shape_cast %313 : vector<16x32xf32> to vector<2x8x32xf32>
    %c0_90 = arith.constant 0 : index
    %c0_91 = arith.constant 0 : index
    %c0_92 = arith.constant 0 : index
    %315 = vector.load %arg4[%c0_90, %c0_91, %c0_92] : memref<2x8x32xf32, #tpu.memory_space<vmem>>, vector<2x8x32xf32>
    tpu.vector_store %arg4[%c0_90, %c0_91, %c0_92], %314 {strides = array<i32>} : memref<2x8x32xf32, #tpu.memory_space<vmem>>, vector<2x8x32xf32>,
    return
  }
}

</mosaic_0001>

<bundles_post_ra>
// kernel: tpu_custom_call.1
= control target key start
LH: loop header
LB: loop body
LE: loop exit
PB: predicated region body
PF: predicated region fallthrough
CT: control target
= control target key end

     0   :  { %9 = vsyncpa [#allocation3], 0  ;;  %s9639_s0 = inlined_call_operand.hbm [shape: f32[2,8,32], index: 0, kind: input, shape index: {}]   ;;  %s9640_s1 = inlined_call_operand.hbm [shape: f32[2,8,32], index: 1, kind: input, shape index: {}]   ;;  %s9641_s2 = inlined_call_operand.hbm [shape: f32[768,128], index: 2, kind: input, shape index: {}]   ;;  %s9642_s3 = inlined_call_operand.hbm [shape: f32[19,128], index: 3, kind: input, shape index: {}]   ;;  %s9643_s4 = inlined_call_operand.hbm [shape: f32[2,8,32], index: 4, kind: output, shape index: {}]  }
   0x1   :  { %10 = vsyncpa [#allocation6], 0 }
   0x2   :  { %11 = vsyncpa [#allocation9], 0 }
   0x3   :  { %12 = vsyncpa [#allocation4], 0  ;;  %s8559_s15 = smov [#allocation5]   ;;  %s8560_s17 = smov [#allocation2]  }
   0x4   :  { %s30_s16 = sshll.u32 %s8559_s15, 4  ;;  %s18_s18 = sshll.u32 %s8560_s17, 4  ;;  %s31_s16 = int_to_ptr.vmem [resolvable:$true] %s30_s16  ;;  %s8607_s18 = int_to_ptr.vmem [resolvable:$true] %s18_s18 }
   0x5   :  { %s8441_s21 = scalar_lea.hbm %s9640_s1, 256 }
   0x6   :  { %p8442_p0 = scmp.ne.s32.totalorder %s9640_s1, %s8441_s21  ;;  %p8445_p1 = scmp.lt.u32.totalorder %s8441_s21, %s9640_s1 }
   0x8   :  { %p8447_p2 = pnand %p8445_p1, %p8442_p0 }
   0xa   :  { %8450 = shalt.err (!%p8447_p2)
}
   0xb   :  { %s8451_s26 = scalar_lea.vmem %s31_s16, 256  ;;  %p8456_p4 = scmp.lt.s32.totalorder %s31_s16, %s31_s16 }
   0xc   :  { %p8452_p3 = scmp.ne.s32.totalorder %s31_s16, %s8451_s26  ;;  %p8457_p5 = scmp.lt.s32.totalorder %s8451_s26, %s8451_s26 }
   0xe   :  { %p8458_p6 = por %p8457_p5, %p8456_p4 }
  0x10   :  { %p8459_p7 = pnand %p8458_p6, %p8452_p3 }
  0x12   :  { %8462 = shalt.err (!%p8459_p7)
}
  0x13   :  { %s8561_s27 = smov 128   ;;  %s8562_s28 = smov 8  }
  0x14   :  { %36 = dma.hbm_to_vmem [thread:$0]  %s9640_s1, 256, %s31_s16, [#allocation6], %s8561_s27, %s8561_s27, %s8562_s28  }
  0x15   :  { %s8463_s7 = scalar_lea.hbm %s9639_s0, 256 }
  0x16   :  { %p8464_p8 = scmp.ne.s32.totalorder %s9639_s0, %s8463_s7  ;;  %p8467_p9 = scmp.lt.u32.totalorder %s8463_s7, %s9639_s0 }
  0x18   :  { %p8469_p10 = pnand %p8467_p9, %p8464_p8 }
  0x1a   :  { %8472 = shalt.err (!%p8469_p10)
}
  0x1b   :  { %s8473_s12 = scalar_lea.vmem %s8607_s18, 256  ;;  %p8478_p12 = scmp.lt.s32.totalorder %s8607_s18, %s8607_s18 }
  0x1c   :  { %p8474_p11 = scmp.ne.s32.totalorder %s8607_s18, %s8473_s12  ;;  %p8479_p13 = scmp.lt.s32.totalorder %s8473_s12, %s8473_s12 }
  0x1e   :  { %p8480_p0 = por %p8479_p13, %p8478_p12 }
  0x20   :  { %p8481_p1 = pnand %p8480_p0, %p8474_p11 }
  0x22   :  { %8484 = shalt.err (!%p8481_p1)
}
  0x23   :  { %24 = dma.hbm_to_vmem [thread:$0]  %s9639_s0, 256, %s8607_s18, [#allocation3], %s8561_s27, %s8561_s27, %s8562_s28  }
  0x24   :  { %s8563_s14 = smov [#allocation7]   ;;  %s8564_s16 = smov [#allocation8]  }
  0x25   :  { %s42_s15 = sshll.u32 %s8563_s14, 4  ;;  %s54_s17 = sshll.u32 %s8564_s16, 4  ;;  %s43_s15 = int_to_ptr.vmem [resolvable:$true] %s42_s15  ;;  %s8644_s17 = int_to_ptr.vmem [resolvable:$true] %s54_s17 }
  0x26   :  { %s8485_s21 = scalar_lea.hbm %s9641_s2, 12288 }
  0x27   :  { %p8486_p2 = scmp.ne.s32.totalorder %s9641_s2, %s8485_s21  ;;  %p8489_p3 = scmp.lt.u32.totalorder %s8485_s21, %s9641_s2 }
  0x29   :  { %p8491_p4 = pnand %p8489_p3, %p8486_p2 }
  0x2b   :  { %8494 = shalt.err (!%p8491_p4)
}
  0x2c   :  { %s8495_s0 = scalar_lea.vmem %s43_s15, 12288  ;;  %p8500_p6 = scmp.lt.s32.totalorder %s43_s15, %s43_s15 }
  0x2d   :  { %p8496_p5 = scmp.ne.s32.totalorder %s43_s15, %s8495_s0  ;;  %p8501_p7 = scmp.lt.s32.totalorder %s8495_s0, %s8495_s0 }
  0x2f   :  { %p8502_p8 = por %p8501_p7, %p8500_p6 }
  0x31   :  { %p8503_p9 = pnand %p8502_p8, %p8496_p5 }
  0x33   :  { %8506 = shalt.err (!%p8503_p9)
}
  0x34   :  { %48 = dma.hbm_to_vmem [thread:$0]  %s9641_s2, 12288, %s43_s15, [#allocation6], %s8561_s27, %s8561_s27, %s8562_s28  }
  0x35   :  { %s8507_s5 = scalar_lea.hbm %s9642_s3, 384 }
  0x36   :  { %p8508_p10 = scmp.ne.s32.totalorder %s9642_s3, %s8507_s5  ;;  %p8511_p11 = scmp.lt.u32.totalorder %s8507_s5, %s9642_s3 }
  0x38   :  { %p8513_p12 = pnand %p8511_p11, %p8508_p10 }
  0x3a   :  { %8516 = shalt.err (!%p8513_p12)
}
  0x3b   :  { %s8517_s10 = scalar_lea.vmem %s8644_s17, 384  ;;  %p8522_p0 = scmp.lt.s32.totalorder %s8644_s17, %s8644_s17 }
  0x3c   :  { %p8518_p13 = scmp.ne.s32.totalorder %s8644_s17, %s8517_s10  ;;  %p8523_p1 = scmp.lt.s32.totalorder %s8517_s10, %s8517_s10 }
  0x3e   :  { %p8524_p2 = por %p8523_p1, %p8522_p0 }
  0x40   :  { %p8525_p3 = pnand %p8524_p2, %p8518_p13 }
  0x42   :  { %8528 = shalt.err (!%p8525_p3)
}
  0x43   :  { %60 = dma.hbm_to_vmem [thread:$0]  %s9642_s3, 384, %s8644_s17, [#allocation9], %s8561_s27, %s8561_s27, %s8562_s28  }
  0x44   :  { %8551 = dma.done.wait [#allocation3], 256  }
  0x45   :  { %8552 = vsyncadd [#allocation3], 4294967040 }
  0x46   :  { %8553 = dma.done.wait [#allocation6], 12544  }
  0x47   :  { %8554 = vsyncadd [#allocation6], 4294954752 }
  0x48   :  { %8555 = dma.done.wait [#allocation9], 384  }
  0x49   :  { %8556 = vsyncadd [#allocation9], 4294966912  ;;  %v81_v0 = vld [vmem:[#allocation7 + $0x20] sm:$0xff]  ;;  %v82_v1 = vld [vmem:[#allocation7 + $0x28] sm:$0xff]  ;;  %vm85_vm0 = vcmask 261120   ;;  %vm369_vm1 = vcmask 523264  }
  0x4a   :  { %v77_v2 = vld [vmem:[#allocation7] sm:$0xff]  ;;  %v8064_v3 = vpack.c.bf16 %v82_v1, %v81_v0  ;;  %v78_v4 = vld [vmem:[#allocation7 + $0x8] sm:$0xff]  ;;  %v83_v5 = vld [vmem:[#allocation7 + $0x30] sm:$0xff]  ;;  %vm8567_vm2 = vmmov 0   ;;  %s8568_s3 = smov 120   ;;  %s8569_s12 = smov 124  }
  0x4b   :  { %v84_v6 = vld [vmem:[#allocation7 + $0x38] sm:$0xff]  ;;  %v8072_v7 = vpack.c.bf16 %v78_v4, %v77_v2  ;;  %v79_v9 = vld [vmem:[#allocation7 + $0x10] sm:$0xff]  ;;  %v8682_v13 = vld [vmem:[#allocation2] sm:$0xff]  ;;  %s8570_s1 = smov 116   ;;  %vm833_vm3 = vcmask 31744   ;;  %s8571_s13 = smov 112  }
  0x4c   :  { %v8068_v8 = vpack.c.bf16 %v84_v6, %v83_v5  ;;  %v80_v10 = vld [vmem:[#allocation7 + $0x18] sm:$0xff]  ;;  %v75_v11 = vld [vmem:[#allocation5] sm:$0xff]  ;;  %8065 = vmatprep.subr.bf16.mxu1 %v8064_v3  ;;  %7523 = vmatprep.mubr.msk.f32.mxu0 %vm85_vm0, %v8682_v13  ;;  %v8686_v15 = vld [vmem:[#allocation2 + $0x8] sm:$0xff]  ;;  %s8572_s14 = smov 108   ;;  %s8573_s15 = smov 104   ;;  %vm2018_vm4 = vcmask 64512  }
  0x4d   :  { %v8076_v12 = vpack.c.bf16 %v80_v10, %v79_v9  ;;  %7512 = vmatprep.mubr.msk.f32.mxu1 %vm85_vm0, %v75_v11  ;;  %8073 = vmatprep.subr.bf16.mxu0 %v8072_v7  ;;  %v76_v14 = vld [vmem:[#allocation5 + $0x8] sm:$0xff]  ;;  %v273_v16 = vld [vmem:[#allocation7 + $0x40] sm:$0xff]  ;;  %v274_v17 = vld [vmem:[#allocation7 + $0x48] sm:$0xff]  ;;  %s8574_s16 = smov 100   ;;  %s8575_s17 = smov 4   ;;  %vm3423_vm5 = vcmask 97280  }
  0x4e   :  { %8067 = vmatpush3.bf16.msra.mxu1 %v8064_v3  ;;  %8075 = vmatpush3.bf16.msra.mxu0 %v8072_v7  ;;  %v8080_v18 = vpack.c.bf16 %v274_v17, %v273_v16  ;;  %v275_v19 = vld [vmem:[#allocation7 + $0x50] sm:$0xff]  ;;  %v276_v20 = vld [vmem:[#allocation7 + $0x58] sm:$0xff]  ;;  %v277_v22 = vld [vmem:[#allocation7 + $0x60] sm:$0xff]  ;;  %s8576_s19 = smov 12   ;;  %s8577_s20 = smov 16   ;;  %vm3426_vm6 = vcmask 130048  }
  0x4f   :  { %8069 = vmatprep.subr.bf16.mxu1 %v8068_v8  ;;  %8077 = vmatprep.subr.bf16.mxu0 %v8076_v12  ;;  %v8084_v21 = vpack.c.bf16 %v276_v20, %v275_v19  ;;  %v278_v23 = vld [vmem:[#allocation7 + $0x68] sm:$0xff]  ;;  %v279_v25 = vld [vmem:[#allocation7 + $0x70] sm:$0xff]  ;;  %v280_v26 = vld [vmem:[#allocation7 + $0x78] sm:$0xff]  ;;  %s8578_s21 = smov 20   ;;  %s8579_s22 = smov 24   ;;  %vm3429_vm7 = vcmask 162816  }
  0x50   :  { %v8088_v24 = vpack.c.bf16 %v278_v23, %v277_v22  ;;  %v281_v27 = vld [vmem:[#allocation7 + $0x80] sm:$0xff]  ;;  %v8092_v28 = vpack.c.bf16 %v280_v26, %v279_v25  ;;  %v282_v29 = vld [vmem:[#allocation7 + $0x88] sm:$0xff]  ;;  %v283_v31 = vld [vmem:[#allocation7 + $0x90] sm:$0xff]  ;;  %s8580_s23 = smov 28   ;;  %vm3432_vm8 = vcmask 195584   ;;  %vm3435_vm9 = vcmask 228352  }
  0x51   :  { %v8096_v30 = vpack.c.bf16 %v282_v29, %v281_v27  ;;  %v284_v32 = vld [vmem:[#allocation7 + $0x98] sm:$0xff]  ;;  %v285_v34 = vld [vmem:[#allocation7 + $0xa0] sm:$0xff]  ;;  %v286_v35 = vld [vmem:[#allocation7 + $0xa8] sm:$0xff]  ;;  %s8581_s24 = smov [#allocation10]  }
  0x52   :  { %8071 = vmatpush3.bf16.msra.mxu1 %v8068_v8  ;;  %8079 = vmatpush3.bf16.msra.mxu0 %v8076_v12  ;;  %v8100_v33 = vpack.c.bf16 %v284_v32, %v283_v31  ;;  %v8104_v36 = vpack.c.bf16 %v286_v35, %v285_v34  ;;  %v287_v37 = vld [vmem:[#allocation7 + $0xb0] sm:$0xff]  ;;  %v288_v38 = vld [vmem:[#allocation7 + $0xb8] sm:$0xff]  ;;  %v7109_v42 = vld [vmem:[#allocation8] ss:$0 sm:$0xff]  ;;  %s7091_s25 = sshll.u32 %s8581_s24, 4  ;;  %s7092_s25 = int_to_ptr.vmem [resolvable:$true] %s7091_s25 }
  0x53   :  { %8081 = vmatprep.subr.bf16.mxu1 %v8080_v18  ;;  %v8108_v39 = vpack.c.bf16 %v288_v38, %v287_v37  ;;  %v7110_v3 = vld [vmem:[#allocation8 + $0x1] ss:$0 sm:$0xff]  ;;  %v7111_v29 = vld [vmem:[#allocation8 + $0x2] ss:$0 sm:$0xff]  ;;  %v7112_v31 = vld [vmem:[#allocation8 + $0x3] ss:$0 sm:$0xff]  ;;  %p8534_p5 = scmp.lt.s32.totalorder %s7092_s25, %s7092_s25 }
  0x54   :  { %s8529_s0 = scalar_lea.vmem %s7092_s25, 256 }
  0x55   :  { %7513 = vmatmul.mubr.msk.f32.vlgmr.msra.gmra.mrb[0].mxu1 %vm85_vm0, %v76_v14  ;;  %7524 = vmatmul.mubr.msk.f32.vlgmr.msra.gmra.mrb[0].mxu0 %vm85_vm0, %v8686_v15  ;;  %p8530_p4 = scmp.ne.s32.totalorder %s7092_s25, %s8529_s0  ;;  %p8535_p6 = scmp.lt.s32.totalorder %s8529_s0, %s8529_s0 }
  0x56   :  { %8083 = vmatpush3.bf16.msra.mxu1 %v8080_v18 }
  0x57   :  { %8085 = vmatprep.subr.bf16.mxu1 %v8084_v21  ;;  %p8536_p7 = por %p8535_p6, %p8534_p5 }
  0x59   :  { %p8537_p8 = pnand %p8536_p7, %p8530_p4 }
  0x5a   :  { %8087 = vmatpush3.bf16.msra.mxu1 %v8084_v21 }
  0x5b   :  { %8089 = vmatprep.subr.bf16.mxu1 %v8088_v24 }
  0x5e   :  { %8091 = vmatpush3.bf16.msra.mxu1 %v8088_v24 }
  0x5f   :  { %8093 = vmatprep.subr.bf16.mxu1 %v8092_v28 }
  0x62   :  { %8095 = vmatpush3.bf16.msra.mxu1 %v8092_v28 }
  0x63   :  { %8097 = vmatprep.subr.bf16.mxu1 %v8096_v30 }
  0x66   :  { %8099 = vmatpush3.bf16.msra.mxu1 %v8096_v30 }
  0x67   :  { %8101 = vmatprep.subr.bf16.mxu1 %v8100_v33 }
  0x6a   :  { %8103 = vmatpush3.bf16.msra.mxu1 %v8100_v33 }
  0x6b   :  { %8105 = vmatprep.subr.bf16.mxu1 %v8104_v36 }
  0x6e   :  { %8107 = vmatpush3.bf16.msra.mxu1 %v8104_v36 }
  0x6f   :  { %8109 = vmatprep.subr.bf16.mxu1 %v8108_v39 }
  0x72   :  { %8111 = vmatpush3.bf16.msra.mxu1 %v8108_v39 }
 0x128   :  { %v7514_v40 = vpop.f32.mrb[0].mxu1  ;;  %v7525_v41 = vpop.f32.mrb[0].mxu0 }
 0x129   :  { %v158_v43 = vpop.f32.mrb[1].mxu1  ;;  %v245_v44 = vadd.f32 %v7525_v41, %v7514_v40  ;;  %v239_v45 = vpop.f32.mrb[1].mxu0 }
 0x12a   :  { %v240_v46 = vadd.f32 %v239_v45, %v158_v43 }
 0x12b   :  { %v254_v47 = vadd.f32 %v7109_v42, %v245_v44 }
 0x12c   :  { %v253_v48 = vadd.f32 %v7109_v42, %v240_v46 }
 0x12d   :  { %v258_v49 = vmul.f32 0.044715, %v254_v47  ;;  %v256_v0 = vmul.f32 0.5, %v254_v47 }
 0x12e   :  { %v257_v50 = vmul.f32 0.044715, %v253_v48  ;;  %v255_v62 = vmul.f32 0.5, %v253_v48 }
 0x12f   :  { %v260_v51 = vmul.f32 %v258_v49, %v254_v47 }
 0x130   :  { %v259_v52 = vmul.f32 %v257_v50, %v253_v48 }
 0x131   :  { %v262_v53 = vmul.f32 %v260_v51, %v254_v47  ;;  %v7113_v51 = vld [vmem:[#allocation8 + $0x4] ss:$0 sm:$0xff] }
 0x132   :  { %v261_v54 = vmul.f32 %v259_v52, %v253_v48 }
 0x133   :  { %v264_v55 = vadd.f32 %v262_v53, %v254_v47 }
 0x134   :  { %v263_v56 = vadd.f32 %v261_v54, %v253_v48 }
 0x135   :  { %v266_v57 = vmul.f32 0.7978846, %v264_v55 }
 0x136   :  { %v265_v58 = vmul.f32 0.7978846, %v263_v56 }
 0x137   :  { %8283 = vtanh.f32 %v266_v57 }
 0x138   :  { %8285 = vtanh.f32 %v265_v58 }
 0x141   :  { %v8284_v59 = vpop.eup %8283 }
 0x142   :  { %v8286_v60 = vpop.eup %8285  ;;  %v270_v61 = vadd.f32 1.0, %v8284_v59 }
 0x143   :  { %v269_v63 = vadd.f32 1.0, %v8286_v60 }
 0x144   :  { %v272_v2 = vmul.f32 %v270_v61, %v256_v0  ;;  %v8565_v61 = vmov 0  }
 0x145   :  { %v271_v1 = vmul.f32 %v269_v63, %v255_v62  ;;  %8281 = vset.pattern.permute.xlu0 %v8565_v61  ;;  %8282 = vset.pattern.permute.xlu1 %v8565_v61  ;;  %v471_v62 = vld [vmem:[#allocation7 + $0xc0] sm:$0xff]  ;;  %v472_v63 = vld [vmem:[#allocation7 + $0xc8] sm:$0xff] }
 0x146   :  { %v8112_v0 = vpack.c.bf16 %v472_v63, %v471_v62 }
 0x147   :  { %7558 = vmatprep.mubr.f32.mxu1 %v271_v1  ;;  %v7114_v1 = vld [vmem:[#allocation8 + $0x5] ss:$0 sm:$0xff] }
 0x148   :  { %7559 = vmatmul.mubr.f32.vlgmr.msra.gmra.mrb[2].mxu1 %v272_v2  ;;  %8113 = vmatprep.subr.bf16.mxu0 %v8112_v0 }
 0x149   :  { %8115 = vmatpush3.bf16.msra.mxu0 %v8112_v0 }
 0x21b   :  { %v7560_v4 = vpop.f32.mrb[2].mxu1 }
 0x21c   :  { %v360_v5 = vpop.f32.mrb[3].mxu1  ;;  %v366_v7 = vadd.f32 %v7560_v4, %v7110_v3 }
 0x21d   :  { %v361_v6 = vadd.f32 %v7110_v3, %v360_v5 }
 0x21e   :  { %v373_v9 = vsel %vm369_vm1, %v366_v7, 0.0 }
 0x21f   :  { %v370_v8 = vsel %vm369_vm1, %v361_v6, 0.0 }
 0x220   :  { %371 = vadd.xlane.f32.xlu0 %v370_v8 }
 0x224   :  { %374 = vadd.xlane.f32.xlu0 %v373_v9 }
 0x2ad   :  { %v372_v10 = vpop.xlane.xlu0 %371 }
 0x2ae   :  { %v377_v11 = vmul.f32 0.015625, %v372_v10 }
 0x2b0   :  { %v379_v12 = vsub.f32 %v361_v6, %v377_v11 }
 0x2b1   :  { %v375_v14 = vpop.xlane.xlu0 %374 }
 0x2b2   :  { %v378_v16 = vmul.f32 0.015625, %v375_v14  ;;  %v381_v17 = vmul.f32 %v379_v12, %v379_v12 }
 0x2b4   :  { %v380_v18 = vsub.f32 %v366_v7, %v378_v16  ;;  %v383_v19 = vsel %vm369_vm1, %v381_v17, 0.0  ;;  %v473_v16 = vld [vmem:[#allocation7 + $0xd0] sm:$0xff]  ;;  %v474_v17 = vld [vmem:[#allocation7 + $0xd8] sm:$0xff] }
 0x2b5   :  { %384 = vadd.xlane.f32.xlu1 %v383_v19  ;;  %v8116_v19 = vpack.c.bf16 %v474_v17, %v473_v16 }
 0x2b6   :  { %v382_v20 = vmul.f32 %v380_v18, %v380_v18 }
 0x2b7   :  { %8117 = vmatprep.subr.bf16.mxu0 %v8116_v19 }
 0x2b8   :  { %v386_v21 = vsel %vm369_vm1, %v382_v20, 0.0  ;;  %8119 = vmatpush3.bf16.msra.mxu0 %v8116_v19  ;;  %v561_v20 = vld [vmem:[#allocation7 + $0xe0] sm:$0xff] }
 0x2b9   :  { %387 = vadd.xlane.f32.xlu1 %v386_v21  ;;  %v562_v21 = vld [vmem:[#allocation7 + $0xe8] sm:$0xff] }
 0x342   :  { %v385_v22 = vpop.xlane.xlu1 %384 }
 0x343   :  { %v389_v23 = vmul.f32 0.015625, %v385_v22 }
 0x345   :  { %v391_v24 = vadd.f32 1e-05, %v389_v23  ;;  %v8120_v23 = vpack.c.bf16 %v562_v21, %v561_v20 }
 0x346   :  { %v388_v25 = vpop.xlane.xlu1 %387 }
 0x347   :  { %8287 = vrsqrt.f32 %v391_v24  ;;  %v390_v26 = vmul.f32 0.015625, %v388_v25  ;;  %8121 = vmatprep.subr.bf16.mxu0 %v8120_v23 }
 0x349   :  { %v392_v27 = vadd.f32 1e-05, %v390_v26  ;;  %v563_v26 = vld [vmem:[#allocation7 + $0xf0] sm:$0xff] }
 0x34b   :  { %8289 = vrsqrt.f32 %v392_v27  ;;  %v564_v27 = vld [vmem:[#allocation7 + $0xf8] sm:$0xff] }
 0x351   :  { %v8288_v28 = vpop.eup %8287 }
 0x352   :  { %v395_v30 = vmul.f32 %v8288_v28, %v379_v12 }
 0x354   :  { %v402_v32 = vmul.f32 %v7111_v29, %v395_v30  ;;  %v8124_v30 = vpack.c.bf16 %v564_v27, %v563_v26 }
 0x355   :  { %v8290_v33 = vpop.eup %8289 }
 0x356   :  { %v409_v34 = vadd.f32 %v7112_v31, %v402_v32  ;;  %v396_v35 = vmul.f32 %v8290_v33, %v380_v18  ;;  %v646_v32 = vld [vmem:[#allocation7 + $0x108] sm:$0xff]  ;;  %v647_v33 = vld [vmem:[#allocation7 + $0x110] sm:$0xff] }
 0x358   :  { %v403_v36 = vmul.f32 %v7111_v29, %v396_v35  ;;  %v413_v37 = vmul.f32 0.044715, %v409_v34  ;;  %v411_v49 = vmul.f32 0.5, %v409_v34 }
 0x35a   :  { %v410_v38 = vadd.f32 %v7112_v31, %v403_v36  ;;  %v415_v39 = vmul.f32 %v413_v37, %v409_v34  ;;  %v645_v31 = vld [vmem:[#allocation7 + $0x100] sm:$0xff] }
 0x35b   :  { %v7115_v36 = vld [vmem:[#allocation8 + $0x6] ss:$0 sm:$0xff] }
 0x35c   :  { %v417_v40 = vmul.f32 %v415_v39, %v409_v34  ;;  %v414_v41 = vmul.f32 0.044715, %v410_v38  ;;  %v412_v55 = vmul.f32 0.5, %v410_v38 }
 0x35e   :  { %v419_v42 = vadd.f32 %v417_v40, %v409_v34  ;;  %v416_v43 = vmul.f32 %v414_v41, %v410_v38  ;;  %v648_v34 = vld [vmem:[#allocation7 + $0x118] sm:$0xff]  ;;  %v7118_v41 = vld [vmem:[#allocation8 + $0x7] ss:$0 sm:$0xff] }
 0x35f   :  { %v8132_v35 = vpack.c.bf16 %v648_v34, %v647_v33 }
 0x360   :  { %v421_v44 = vmul.f32 0.7978846, %v419_v42  ;;  %v418_v45 = vmul.f32 %v416_v43, %v410_v38 }
 0x362   :  { %8291 = vtanh.f32 %v421_v44  ;;  %v420_v46 = vadd.f32 %v418_v45, %v410_v38 }
 0x364   :  { %v422_v47 = vmul.f32 0.7978846, %v420_v46 }
 0x366   :  { %8293 = vtanh.f32 %v422_v47 }
 0x36c   :  { %v8292_v48 = vpop.eup %8291 }
 0x36d   :  { %v425_v50 = vadd.f32 1.0, %v8292_v48  ;;  %v7121_v48 = vld [vmem:[#allocation8 + $0x8] ss:$0 sm:$0xff] }
 0x36f   :  { %v427_v52 = vmul.f32 %v425_v50, %v411_v49 }
 0x370   :  { %v8294_v53 = vpop.eup %8293 }
 0x371   :  { %v434_v54 = vmul.f32 %v7113_v51, %v427_v52  ;;  %v426_v56 = vadd.f32 1.0, %v8294_v53 }
 0x373   :  { %v436_v57 = vsel %vm369_vm1, %v434_v54, 0.0  ;;  %v428_v58 = vmul.f32 %v426_v56, %v412_v55 }
 0x374   :  { %437 = vadd.xlane.f32.xlu0 %v436_v57 }
 0x375   :  { %v435_v59 = vmul.f32 %v7113_v51, %v428_v58 }
 0x377   :  { %v439_v60 = vsel %vm369_vm1, %v435_v59, 0.0 }
 0x378   :  { %440 = vadd.xlane.f32.xlu1 %v439_v60 }
 0x401   :  { %v438_v2 = vpop.xlane.xlu0 %437 }
 0x402   :  { %v447_v3 = vadd.f32 %v7114_v1, %v438_v2 }
 0x404   :  { %v449_v4 = vsub.f32 0.0, %v447_v3 }
 0x405   :  { %v441_v5 = vpop.xlane.xlu1 %440 }
 0x406   :  { %v451_v6 = vmul.f32 1.442695, %v449_v4  ;;  %v448_v7 = vadd.f32 %v7114_v1, %v441_v5 }
 0x408   :  { %8295 = vpow2.f32 %v451_v6  ;;  %v450_v8 = vsub.f32 0.0, %v448_v7 }
 0x40a   :  { %v453_v9 = vmul.f32 1.442695, %v450_v8 }
 0x40c   :  { %8297 = vpow2.f32 %v453_v9 }
 0x412   :  { %v8296_v10 = vpop.eup %8295 }
 0x413   :  { %v455_v11 = vadd.f32 1.0, %v8296_v10 }
 0x415   :  { %8299 = vrcp.f32 %v455_v11 }
 0x416   :  { %v8298_v12 = vpop.eup %8297 }
 0x417   :  { %v456_v14 = vadd.f32 1.0, %v8298_v12 }
 0x419   :  { %8301 = vrcp.f32 %v456_v14 }
 0x41f   :  { %v8300_v18 = vpop.eup %8299 }
 0x420   :  { %461 = vperm.xlu0 %8281, %v8300_v18  }
 0x423   :  { %v8302_v22 = vpop.eup %8301 }
 0x424   :  { %466 = vperm.xlu1 %8282, %v8302_v22  }
 0x49f   :  { %v462_v24 = vpop.permute.xlu0 %461 }
 0x4a0   :  { %v8698_v25 = vmul.f32 %v462_v24, %v8682_v13  ;;  %v8128_v13 = vpack.c.bf16 %v646_v32, %v645_v31 }
 0x4a2   :  { %7569 = vmatprep.mubr.msk.f32.mxu0 %vm85_vm0, %v8698_v25 }
 0x4a3   :  { %v467_v28 = vpop.permute.xlu1 %466 }
 0x4a4   :  { %v8703_v29 = vmul.f32 %v467_v28, %v8686_v15  ;;  %v8566_v15 = vmov 0.0  }
 0x4a5   :  { %7594 = vmatprep.subr.mxu1 %v8566_v15  ;;  %7596 = vmatprep.mubr.msk.f32.mxu1 %vm8567_vm2, %v8566_v15 }
 0x4a6   :  { %7570 = vmatmul.mubr.msk.f32.vlgmr.msra.gmra.mrb[2].mxu0 %vm85_vm0, %v8703_v29 }
 0x4a7   :  { %8123 = vmatpush3.bf16.msra.mxu0 %v8120_v23  ;;  %7580 = vmatprep.mubr.msk.f32.mxu0 %vm85_vm0, %v8698_v25 }
 0x4a8   :  { %8125 = vmatprep.subr.bf16.mxu0 %v8124_v30 }
 0x4ab   :  { %8127 = vmatpush3.bf16.msra.mxu0 %v8124_v30 }
 0x4ac   :  { %8129 = vmatprep.subr.bf16.mxu0 %v8128_v13 }
 0x4ae   :  { %7581 = vmatmul.mubr.msk.f32.vlgmr.msra.gmra.mrb[4].mxu0 %vm85_vm0, %v8703_v29 }
 0x4af   :  { %8131 = vmatpush3.bf16.msra.mxu0 %v8128_v13  ;;  %7591 = vmatprep.mubr.msk.f32.mxu0 %vm85_vm0, %v8698_v25 }
 0x4b0   :  { %8133 = vmatprep.subr.bf16.mxu0 %v8132_v35 }
 0x4b3   :  { %8135 = vmatpush3.bf16.msra.mxu0 %v8132_v35 }
 0x4b4   :  { %7604 = vmatprep.subr.mxu0 %v8566_v15 }
 0x4b6   :  { %7592 = vmatmul.mubr.msk.f32.vlgmr.msra.gmra.mrb[6].mxu0 %vm85_vm0, %v8703_v29 }
 0x4b7   :  { %7606 = vmatprep.mubr.msk.f32.mxu0 %vm8567_vm2, %v8566_v15 }
 0x579   :  { %v7571_v37 = vpop.f32.mrb[2].mxu0 }
 0x57a   :  { %v558_v38 = vadd.f32 %v7571_v37, %v7115_v36  ;;  %v552_v39 = vpop.f32.mrb[3].mxu0 }
 0x57b   :  { %v553_v40 = vadd.f32 %v7115_v36, %v552_v39 }
 0x57c   :  { %737 = vrot.lane.b32.xlu0 %v558_v38, %s8568_s3  ;;  %733 = vrot.lane.b32.xlu1 %v558_v38, %s8569_s12 }
 0x580   :  { %741 = vrot.lane.b32.xlu0 %v558_v38, %s8570_s1  ;;  %731 = vrot.lane.b32.xlu1 %v553_v40, %s8569_s12 }
 0x581   :  { %v7582_v42 = vpop.f32.mrb[4].mxu0 }
 0x582   :  { %v636_v43 = vpop.f32.mrb[5].mxu0  ;;  %v642_v45 = vadd.f32 %v7582_v42, %v7118_v41 }
 0x583   :  { %v637_v44 = vadd.f32 %v7118_v41, %v636_v43 }
 0x584   :  { %745 = vrot.lane.b32.xlu0 %v558_v38, %s8571_s13  ;;  %735 = vrot.lane.b32.xlu1 %v553_v40, %s8568_s3 }
 0x585   :  { %7595 = vmatpush3.xpose.msk.msra.mxu1 %vm833_vm3, %v637_v44 }
 0x586   :  { %7599 = vmatprep.subr.mxu1 %v8566_v15 }
 0x588   :  { %7597 = vmatmul.mubr.msk.f32.vlgmr.msra.gmra.mrb[4].mxu1 %vm833_vm3, %v553_v40  ;;  %749 = vrot.lane.b32.xlu0 %v558_v38, %s8572_s14 }
 0x589   :  { %v7593_v46 = vpop.f32.mrb[6].mxu0  ;;  %739 = vrot.lane.b32.xlu1 %v553_v40, %s8570_s1  ;;  %7600 = vmatpush3.xpose.msk.msra.mxu1 %vm833_vm3, %v642_v45 }
 0x58a   :  { %v720_v47 = vpop.f32.mrb[7].mxu0  ;;  %7601 = vmatprep.mubr.msk.f32.mxu1 %vm8567_vm2, %v8566_v15  ;;  %7609 = vmatprep.subr.mxu1 %v8566_v15  ;;  %v8753_v49 = vadd.f32 %v7593_v46, %v7121_v48 }
 0x58b   :  { %v8764_v50 = vadd.f32 %v7121_v48, %v720_v47 }
 0x58c   :  { %7602 = vmatmul.mubr.msk.f32.vlgmr.msra.gmra.mrb[6].mxu1 %vm833_vm3, %v558_v38  ;;  %753 = vrot.lane.b32.xlu0 %v558_v38, %s8573_s15 }
 0x58d   :  { %743 = vrot.lane.b32.xlu1 %v553_v40, %s8571_s13  ;;  %7611 = vmatprep.mubr.msk.f32.mxu1 %vm8567_vm2, %v8566_v15 }
 0x590   :  { %771 = vrot.lane.b32.xlu0 %v642_v45, %s8570_s1 }
 0x591   :  { %747 = vrot.lane.b32.xlu1 %v553_v40, %s8572_s14 }
 0x594   :  { %775 = vrot.lane.b32.xlu0 %v642_v45, %s8571_s13 }
 0x595   :  { %751 = vrot.lane.b32.xlu1 %v553_v40, %s8573_s15 }
 0x598   :  { %779 = vrot.lane.b32.xlu0 %v642_v45, %s8572_s14 }
 0x599   :  { %763 = vrot.lane.b32.xlu1 %v642_v45, %s8569_s12 }
 0x59c   :  { %783 = vrot.lane.b32.xlu0 %v642_v45, %s8573_s15 }
 0x59d   :  { %767 = vrot.lane.b32.xlu1 %v642_v45, %s8568_s3 }
 0x5a0   :  { %787 = vrot.lane.b32.xlu0 %v642_v45, %s8574_s16 }
 0x5a1   :  { %761 = vrot.lane.b32.xlu1 %v637_v44, %s8569_s12 }
 0x5a4   :  { %757 = vrot.lane.b32.xlu0 %v558_v38, %s8574_s16 }
 0x5a5   :  { %765 = vrot.lane.b32.xlu1 %v637_v44, %s8568_s3 }
 0x5a8   :  { %799 = vrot.lane.b32.xlu0 %v8753_v49, %s8568_s3 }
 0x5a9   :  { %769 = vrot.lane.b32.xlu1 %v637_v44, %s8570_s1 }
 0x5ac   :  { %805 = vrot.lane.b32.xlu0 %v8753_v49, %s8570_s1 }
 0x5ad   :  { %773 = vrot.lane.b32.xlu1 %v637_v44, %s8571_s13 }
 0x5b0   :  { %811 = vrot.lane.b32.xlu0 %v8753_v49, %s8571_s13 }
 0x5b1   :  { %777 = vrot.lane.b32.xlu1 %v637_v44, %s8572_s14 }
 0x5b4   :  { %791 = vrot.lane.b32.xlu0 %v8764_v50, %s8569_s12 }
 0x5b5   :  { %781 = vrot.lane.b32.xlu1 %v637_v44, %s8573_s15 }
 0x5b9   :  { %785 = vrot.lane.b32.xlu1 %v637_v44, %s8574_s16 }
 0x5bd   :  { %755 = vrot.lane.b32.xlu1 %v553_v40, %s8574_s16 }
 0x5c1   :  { %793 = vrot.lane.b32.xlu1 %v8753_v49, %s8569_s12 }
 0x5c5   :  { %797 = vrot.lane.b32.xlu1 %v8764_v50, %s8568_s3 }
 0x5c9   :  { %803 = vrot.lane.b32.xlu1 %v8764_v50, %s8570_s1 }
 0x5cd   :  { %809 = vrot.lane.b32.xlu1 %v8764_v50, %s8571_s13 }
 0x5d1   :  { %815 = vrot.lane.b32.xlu1 %v8764_v50, %s8572_s14 }
 0x5ee   :  { %v738_v51 = vpop.permute.xlu0 %737  ;;  %v734_v52 = vpop.permute.xlu1 %733 }
 0x5f2   :  { %v742_v53 = vpop.permute.xlu0 %741  ;;  %v732_v54 = vpop.permute.xlu1 %731 }
 0x5f6   :  { %v746_v55 = vpop.permute.xlu0 %745  ;;  %v736_v56 = vpop.permute.xlu1 %735 }
 0x5fa   :  { %v750_v58 = vpop.permute.xlu0 %749 }
 0x5fb   :  { %v740_v57 = vpop.permute.xlu1 %739 }
 0x5fe   :  { %v754_v60 = vpop.permute.xlu0 %753 }
 0x5ff   :  { %v744_v59 = vpop.permute.xlu1 %743 }
 0x602   :  { %v772_v63 = vpop.permute.xlu0 %771 }
 0x603   :  { %v748_v61 = vpop.permute.xlu1 %747 }
 0x606   :  { %v776_v1 = vpop.permute.xlu0 %775 }
 0x607   :  { %v8781_v62 = vpop.permute.xlu1 %751 }
 0x60a   :  { %v780_v4 = vpop.permute.xlu0 %779 }
 0x60b   :  { %v764_v0 = vpop.permute.xlu1 %763 }
 0x60c   :  { %7610 = vmatpush3.xpose.msk.msra.mxu1 %vm833_vm3, %v764_v0 }
 0x60d   :  { %7619 = vmatprep.subr.mxu1 %v8566_v15 }
 0x60e   :  { %v784_v6 = vpop.permute.xlu0 %783 }
 0x60f   :  { %v768_v2 = vpop.permute.xlu1 %767  ;;  %7612 = vmatmul.mubr.msk.f32.vlgmr.msra.gmra.mrb[8].mxu1 %vm833_vm3, %v734_v52 }
 0x610   :  { %7620 = vmatpush3.xpose.msk.msra.mxu1 %vm833_vm3, %v768_v2  ;;  %7621 = vmatprep.mubr.msk.f32.mxu1 %vm8567_vm2, %v8566_v15 }
 0x611   :  { %7629 = vmatprep.subr.mxu1 %v8566_v15 }
 0x612   :  { %v788_v9 = vpop.permute.xlu0 %787 }
 0x613   :  { %v762_v3 = vpop.permute.xlu1 %761  ;;  %7622 = vmatmul.mubr.msk.f32.vlgmr.msra.gmra.mrb[10].mxu1 %vm833_vm3, %v738_v51 }
 0x614   :  { %7605 = vmatpush3.xpose.msk.msra.mxu0 %vm833_vm3, %v762_v3  ;;  %7630 = vmatpush3.xpose.msk.msra.mxu1 %vm833_vm3, %v772_v63 }
 0x615   :  { %7631 = vmatprep.mubr.msk.f32.mxu1 %vm8567_vm2, %v8566_v15  ;;  %7614 = vmatprep.subr.mxu0 %v8566_v15 }
 0x616   :  { %7639 = vmatprep.subr.mxu1 %v8566_v15  ;;  %v758_v11 = vpop.permute.xlu0 %757 }
 0x617   :  { %7607 = vmatmul.mubr.msk.f32.vlgmr.msra.gmra.mrb[8].mxu0 %vm833_vm3, %v732_v54  ;;  %v766_v5 = vpop.permute.xlu1 %765  ;;  %7632 = vmatmul.mubr.msk.f32.vlgmr.msra.gmra.mrb[12].mxu1 %vm833_vm3, %v742_v53 }
 0x618   :  { %7615 = vmatpush3.xpose.msk.msra.mxu0 %vm833_vm3, %v766_v5  ;;  %7640 = vmatpush3.xpose.msk.msra.mxu1 %vm833_vm3, %v776_v1 }
 0x619   :  { %7616 = vmatprep.mubr.msk.f32.mxu0 %vm8567_vm2, %v8566_v15  ;;  %7641 = vmatprep.mubr.msk.f32.mxu1 %vm8567_vm2, %v8566_v15 }
 0x61a   :  { %7624 = vmatprep.subr.mxu0 %v8566_v15  ;;  %7649 = vmatprep.subr.mxu1 %v8566_v15  ;;  %v8918_v1 = vpop.permute.xlu0 %799 }
 0x61b   :  { %7617 = vmatmul.mubr.msk.f32.vlgmr.msra.gmra.mrb[10].mxu0 %vm833_vm3, %v736_v56  ;;  %v770_v7 = vpop.permute.xlu1 %769  ;;  %7642 = vmatmul.mubr.msk.f32.vlgmr.msra.gmra.mrb[14].mxu1 %vm833_vm3, %v746_v55 }
 0x61c   :  { %7625 = vmatpush3.xpose.msk.msra.mxu0 %vm833_vm3, %v770_v7  ;;  %7650 = vmatpush3.xpose.msk.msra.mxu1 %vm833_vm3, %v780_v4 }
 0x61d   :  { %7626 = vmatprep.mubr.msk.f32.mxu0 %vm8567_vm2, %v8566_v15  ;;  %7651 = vmatprep.mubr.msk.f32.mxu1 %vm8567_vm2, %v8566_v15 }
 0x61e   :  { %7634 = vmatprep.subr.mxu0 %v8566_v15  ;;  %7659 = vmatprep.subr.mxu1 %v8566_v15  ;;  %v8924_v5 = vpop.permute.xlu0 %805 }
 0x61f   :  { %7627 = vmatmul.mubr.msk.f32.vlgmr.msra.gmra.mrb[12].mxu0 %vm833_vm3, %v740_v57  ;;  %v774_v8 = vpop.permute.xlu1 %773  ;;  %7652 = vmatmul.mubr.msk.f32.vlgmr.msra.gmra.mrb[16].mxu1 %vm833_vm3, %v750_v58 }
 0x620   :  { %7635 = vmatpush3.xpose.msk.msra.mxu0 %vm833_vm3, %v774_v8  ;;  %7660 = vmatpush3.xpose.msk.msra.mxu1 %vm833_vm3, %v784_v6 }
 0x621   :  { %7636 = vmatprep.mubr.msk.f32.mxu0 %vm8567_vm2, %v8566_v15  ;;  %7661 = vmatprep.mubr.msk.f32.mxu1 %vm8567_vm2, %v8566_v15 }
 0x622   :  { %7644 = vmatprep.subr.mxu0 %v8566_v15  ;;  %7669 = vmatprep.subr.mxu1 %v8566_v15  ;;  %v8930_v7 = vpop.permute.xlu0 %811 }
 0x623   :  { %7637 = vmatmul.mubr.msk.f32.vlgmr.msra.gmra.mrb[14].mxu0 %vm833_vm3, %v744_v59  ;;  %v778_v10 = vpop.permute.xlu1 %777  ;;  %7662 = vmatmul.mubr.msk.f32.vlgmr.msra.gmra.mrb[18].mxu1 %vm833_vm3, %v754_v60 }
 0x624   :  { %7645 = vmatpush3.xpose.msk.msra.mxu0 %vm833_vm3, %v778_v10  ;;  %7670 = vmatpush3.xpose.msk.msra.mxu1 %vm833_vm3, %v788_v9 }
 0x625   :  { %7646 = vmatprep.mubr.msk.f32.mxu0 %vm8567_vm2, %v8566_v15  ;;  %7671 = vmatprep.mubr.msk.f32.mxu1 %vm8567_vm2, %v8566_v15 }
 0x626   :  { %7654 = vmatprep.subr.mxu0 %v8566_v15  ;;  %7679 = vmatprep.subr.mxu1 %v8566_v15  ;;  %v8934_v9 = vpop.permute.xlu0 %791 }
 0x627   :  { %7647 = vmatmul.mubr.msk.f32.vlgmr.msra.gmra.mrb[16].mxu0 %vm833_vm3, %v748_v61  ;;  %v782_v12 = vpop.permute.xlu1 %781  ;;  %7672 = vmatmul.mubr.msk.f32.vlgmr.msra.gmra.mrb[20].mxu1 %vm833_vm3, %v758_v11 }
 0x628   :  { %7655 = vmatpush3.xpose.msk.msra.mxu0 %vm833_vm3, %v782_v12  ;;  %7680 = vmatpush3.msra.mxu1 %v8753_v49 }
 0x629   :  { %7656 = vmatprep.mubr.msk.f32.mxu0 %vm8567_vm2, %v8566_v15  ;;  %7664 = vmatprep.subr.mxu0 %v8566_v15 }
 0x62a   :  { %7681 = vmatprep.mubr.msk.f32.mxu1 %vm8567_vm2, %v8566_v15  ;;  %7689 = vmatprep.subr.mxu1 %v8566_v15 }
 0x62b   :  { %7657 = vmatmul.mubr.msk.f32.vlgmr.msra.gmra.mrb[18].mxu0 %vm833_vm3, %v8781_v62  ;;  %v786_v14 = vpop.permute.xlu1 %785 }
 0x62c   :  { %7665 = vmatpush3.xpose.msk.msra.mxu0 %vm833_vm3, %v786_v14  ;;  %7666 = vmatprep.mubr.msk.f32.mxu0 %vm8567_vm2, %v8566_v15 }
 0x62d   :  { %7674 = vmatprep.subr.mxu0 %v8566_v15 }
 0x62f   :  { %v756_v16 = vpop.permute.xlu1 %755 }
 0x630   :  { %7667 = vmatmul.mubr.msk.f32.vlgmr.msra.gmra.mrb[20].mxu0 %vm833_vm3, %v756_v16 }
 0x631   :  { %7675 = vmatpush3.msra.mxu0 %v8764_v50  ;;  %7676 = vmatprep.mubr.msk.f32.mxu0 %vm8567_vm2, %v8566_v15 }
 0x632   :  { %7684 = vmatprep.subr.mxu0 %v8566_v15 }
 0x633   :  { %v8926_v6 = vpop.permute.xlu1 %793 }
 0x637   :  { %v8932_v8 = vpop.permute.xlu1 %797 }
 0x63b   :  { %v8936_v10 = vpop.permute.xlu1 %803 }
 0x63f   :  { %v8938_v12 = vpop.permute.xlu1 %809 }
 0x65b   :  { %v8858_v17 = vpop.f32.mrb[4].mxu1 }
 0x65c   :  { %v7598_v18 = vpop.f32.mrb[5].mxu1  ;;  %v2019_v19 = vsel %vm2018_vm4, %v8858_v17, -inf }
 0x65d   :  { %2020 = vmax.xlane.f32.xlu1 %v2019_v19  ;;  %v8945_v18 = vpop.permute.xlu1 %815 }
 0x65f   :  { %v8862_v20 = vpop.f32.mrb[6].mxu1 }
 0x660   :  { %v7603_v21 = vpop.f32.mrb[7].mxu1  ;;  %v2022_v22 = vsel %vm2018_vm4, %v8862_v20, -inf }
 0x661   :  { %2023 = vmax.xlane.f32.xlu0 %v2022_v22 }
 0x6e2   :  { %v8866_v23 = vpop.f32.mrb[8].mxu1 }
 0x6e3   :  { %v7613_v24 = vpop.f32.mrb[9].mxu1  ;;  %v2028_v26 = vsel %vm2018_vm4, %v8866_v23, -inf }
 0x6e4   :  { %2029 = vmax.xlane.f32.xlu1 %v2028_v26 }
 0x6e6   :  { %v8870_v27 = vpop.f32.mrb[10].mxu1 }
 0x6e7   :  { %v7623_v28 = vpop.f32.mrb[11].mxu1  ;;  %v2034_v30 = vsel %vm2018_vm4, %v8870_v27, -inf }
 0x6e8   :  { %2035 = vmax.xlane.f32.xlu1 %v2034_v30 }
 0x6ea   :  { %v8874_v31 = vpop.f32.mrb[8].mxu0  ;;  %v8876_v32 = vpop.f32.mrb[12].mxu1 }
 0x6eb   :  { %v7608_v13 = vpop.f32.mrb[9].mxu0  ;;  %v2025_v33 = vsel %vm2018_vm4, %v8874_v31, -inf  ;;  %v7633_v34 = vpop.f32.mrb[13].mxu1  ;;  %v2040_v35 = vsel %vm2018_vm4, %v8876_v32, -inf }
 0x6ec   :  { %2026 = vmax.xlane.f32.xlu0 %v2025_v33  ;;  %2041 = vmax.xlane.f32.xlu1 %v2040_v35  ;;  %v2021_v19 = vpop.xlane.xlu1 %2020 }
 0x6ed   :  { %v2067_v21 = vsub.f32 %v8858_v17, %v2021_v19 }
 0x6ee   :  { %v8882_v36 = vpop.f32.mrb[10].mxu0  ;;  %v8884_v37 = vpop.f32.mrb[14].mxu1 }
 0x6ef   :  { %v7618_v38 = vpop.f32.mrb[11].mxu0  ;;  %v2031_v39 = vsel %vm2018_vm4, %v8882_v36, -inf  ;;  %v7643_v40 = vpop.f32.mrb[15].mxu1  ;;  %v2046_v41 = vsel %vm2018_vm4, %v8884_v37, -inf  ;;  %v2083_v22 = vmul.f32 1.442695, %v2067_v21 }
 0x6f0   :  { %2032 = vmax.xlane.f32.xlu0 %v2031_v39  ;;  %2047 = vmax.xlane.f32.xlu1 %v2046_v41  ;;  %v2024_v11 = vpop.xlane.xlu0 %2023 }
 0x6f1   :  { %v2068_v14 = vsub.f32 %v8862_v20, %v2024_v11 }
 0x6f2   :  { %v8890_v42 = vpop.f32.mrb[12].mxu0  ;;  %v8892_v43 = vpop.f32.mrb[16].mxu1 }
 0x6f3   :  { %v7628_v44 = vpop.f32.mrb[13].mxu0  ;;  %v7653_v45 = vpop.f32.mrb[17].mxu1  ;;  %v2037_v46 = vsel %vm2018_vm4, %v8890_v42, -inf  ;;  %v2052_v47 = vsel %vm2018_vm4, %v8892_v43, -inf  ;;  %v2085_v16 = vmul.f32 1.442695, %v2068_v14 }
 0x6f4   :  { %2038 = vmax.xlane.f32.xlu0 %v2037_v46  ;;  %2053 = vmax.xlane.f32.xlu1 %v2052_v47 }
 0x6f5   :  { %8303 = vpow2.f32 %v2085_v16 }
 0x6f6   :  { %v8898_v48 = vpop.f32.mrb[14].mxu0  ;;  %v8900_v51 = vpop.f32.mrb[18].mxu1  ;;  %8305 = vpow2.f32 %v2083_v22 }
 0x6f7   :  { %v7638_v52 = vpop.f32.mrb[15].mxu0  ;;  %v7663_v53 = vpop.f32.mrb[19].mxu1  ;;  %v2043_v54 = vsel %vm2018_vm4, %v8898_v48, -inf  ;;  %v2058_v55 = vsel %vm2018_vm4, %v8900_v51, -inf }
 0x6f8   :  { %2044 = vmax.xlane.f32.xlu0 %v2043_v54  ;;  %2059 = vmax.xlane.f32.xlu1 %v2058_v55 }
 0x6fa   :  { %v8906_v56 = vpop.f32.mrb[16].mxu0  ;;  %v8908_v57 = vpop.f32.mrb[20].mxu1 }
 0x6fb   :  { %v7648_v58 = vpop.f32.mrb[17].mxu0  ;;  %v7673_v59 = vpop.f32.mrb[21].mxu1  ;;  %v2049_v60 = vsel %vm2018_vm4, %v8906_v56, -inf  ;;  %v2064_v61 = vsel %vm2018_vm4, %v8908_v57, -inf }
 0x6fc   :  { %2050 = vmax.xlane.f32.xlu0 %v2049_v60  ;;  %2065 = vmax.xlane.f32.xlu1 %v2064_v61 }
 0x6fe   :  { %v8914_v62 = vpop.f32.mrb[18].mxu0 }
 0x6ff   :  { %v7658_v63 = vpop.f32.mrb[19].mxu0  ;;  %v2055_v0 = vsel %vm2018_vm4, %v8914_v62, -inf  ;;  %v8948_v24 = vpop.eup %8303 }
 0x700   :  { %2056 = vmax.xlane.f32.xlu0 %v2055_v0  ;;  %v2118_v26 = vsel %vm2018_vm4, %v8948_v24, 0.0  ;;  %v8952_v28 = vpop.eup %8305 }
 0x701   :  { %v2115_v20 = vsel %vm2018_vm4, %v8952_v28, 0.0 }
 0x703   :  { %v8920_v2 = vpop.f32.mrb[20].mxu0 }
 0x704   :  { %v7668_v3 = vpop.f32.mrb[21].mxu0  ;;  %v2061_v4 = vsel %vm2018_vm4, %v8920_v2, -inf }
 0x705   :  { %2062 = vmax.xlane.f32.xlu0 %v2061_v4 }
 0x70d   :  { %821 = vrot.lane.b32.xlu1 %v8764_v50, %s8573_s15 }
 0x71b   :  { %817 = vrot.lane.b32.xlu0 %v8753_v49, %s8572_s14 }
 0x71f   :  { %823 = vrot.lane.b32.xlu0 %v8753_v49, %s8573_s15 }
 0x731   :  { %2119 = vadd.xlane.f32.xlu1 %v2118_v26 }
 0x73e   :  { %2116 = vadd.xlane.f32.xlu0 %v2115_v20 }
 0x771   :  { %v2030_v30 = vpop.xlane.xlu1 %2029 }
 0x772   :  { %v2070_v13 = vsub.f32 %v8866_v23, %v2030_v30 }
 0x774   :  { %v2089_v33 = vmul.f32 1.442695, %v2070_v13 }
 0x775   :  { %v2036_v34 = vpop.xlane.xlu1 %2035 }
 0x776   :  { %8307 = vpow2.f32 %v2089_v33  ;;  %v2072_v17 = vsub.f32 %v8870_v27, %v2036_v34 }
 0x778   :  { %v2093_v35 = vmul.f32 1.442695, %v2072_v17 }
 0x779   :  { %v2027_v38 = vpop.xlane.xlu0 %2026  ;;  %v2042_v40 = vpop.xlane.xlu1 %2041 }
 0x77a   :  { %8309 = vpow2.f32 %v2093_v35  ;;  %v2069_v39 = vsub.f32 %v8874_v31, %v2027_v38  ;;  %v2074_v41 = vsub.f32 %v8876_v32, %v2042_v40 }
 0x77c   :  { %v2087_v44 = vmul.f32 1.442695, %v2069_v39  ;;  %v2097_v45 = vmul.f32 1.442695, %v2074_v41 }
 0x77d   :  { %v2033_v46 = vpop.xlane.xlu0 %2032  ;;  %v2048_v23 = vpop.xlane.xlu1 %2047 }
 0x77e   :  { %8311 = vpow2.f32 %v2087_v44  ;;  %v2071_v47 = vsub.f32 %v8882_v36, %v2033_v46  ;;  %v2076_v52 = vsub.f32 %v8884_v37, %v2048_v23 }
 0x77f   :  { %8313 = vpow2.f32 %v2097_v45 }
 0x780   :  { %v8962_v53 = vpop.eup %8307  ;;  %v2091_v27 = vmul.f32 1.442695, %v2071_v47  ;;  %v2101_v54 = vmul.f32 1.442695, %v2076_v52 }
 0x781   :  { %v2039_v55 = vpop.xlane.xlu0 %2038  ;;  %v2124_v31 = vsel %vm2018_vm4, %v8962_v53, 0.0  ;;  %v2054_v58 = vpop.xlane.xlu1 %2053 }
 0x782   :  { %8315 = vpow2.f32 %v2091_v27  ;;  %v2073_v32 = vsub.f32 %v8890_v42, %v2039_v55  ;;  %2125 = vadd.xlane.f32.xlu1 %v2124_v31  ;;  %v2078_v36 = vsub.f32 %v8892_v43, %v2054_v58 }
 0x783   :  { %8317 = vpow2.f32 %v2101_v54 }
 0x784   :  { %v8968_v59 = vpop.eup %8309  ;;  %v2095_v60 = vmul.f32 1.442695, %v2073_v32  ;;  %v2105_v37 = vmul.f32 1.442695, %v2078_v36 }
 0x785   :  { %v2045_v61 = vpop.xlane.xlu0 %2044  ;;  %v2130_v63 = vsel %vm2018_vm4, %v8968_v59, 0.0  ;;  %v2060_v3 = vpop.xlane.xlu1 %2059 }
 0x786   :  { %8319 = vpow2.f32 %v2095_v60  ;;  %v2075_v0 = vsub.f32 %v8898_v48, %v2045_v61  ;;  %2131 = vadd.xlane.f32.xlu1 %v2130_v63  ;;  %v2080_v42 = vsub.f32 %v8900_v51, %v2060_v3 }
 0x787   :  { %8321 = vpow2.f32 %v2105_v37 }
 0x788   :  { %v8974_v4 = vpop.eup %8311  ;;  %v2099_v11 = vmul.f32 1.442695, %v2075_v0  ;;  %v2109_v14 = vmul.f32 1.442695, %v2080_v42 }
 0x789   :  { %v8976_v43 = vpop.eup %8313  ;;  %v2051_v16 = vpop.xlane.xlu0 %2050  ;;  %v2121_v19 = vsel %vm2018_vm4, %v8974_v4, 0.0 }
 0x78a   :  { %8323 = vpow2.f32 %v2099_v11  ;;  %v2077_v21 = vsub.f32 %v8906_v56, %v2051_v16  ;;  %v2066_v22 = vpop.xlane.xlu1 %2065  ;;  %2122 = vadd.xlane.f32.xlu0 %v2121_v19  ;;  %v2136_v48 = vsel %vm2018_vm4, %v8976_v43, 0.0 }
 0x78b   :  { %8325 = vpow2.f32 %v2109_v14  ;;  %v2082_v51 = vsub.f32 %v8908_v57, %v2066_v22  ;;  %2137 = vadd.xlane.f32.xlu1 %v2136_v48 }
 0x78c   :  { %v8984_v26 = vpop.eup %8315  ;;  %v2103_v20 = vmul.f32 1.442695, %v2077_v21 }
 0x78d   :  { %v8986_v30 = vpop.eup %8317  ;;  %v2113_v13 = vmul.f32 1.442695, %v2082_v51  ;;  %v2057_v33 = vpop.xlane.xlu0 %2056  ;;  %v2127_v34 = vsel %vm2018_vm4, %v8984_v26, 0.0 }
 0x78e   :  { %8327 = vpow2.f32 %v2103_v20  ;;  %v2079_v56 = vsub.f32 %v8914_v62, %v2057_v33  ;;  %2128 = vadd.xlane.f32.xlu0 %v2127_v34  ;;  %v2142_v17 = vsel %vm2018_vm4, %v8986_v30, 0.0  ;;  %v9030_v36 = vpop.permute.xlu1 %821 }
 0x78f   :  { %8329 = vpow2.f32 %v2113_v13  ;;  %2143 = vadd.xlane.f32.xlu1 %v2142_v17 }
 0x790   :  { %v8993_v57 = vpop.eup %8319  ;;  %v2107_v35 = vmul.f32 1.442695, %v2079_v56 }
 0x791   :  { %v8995_v38 = vpop.eup %8321  ;;  %v2133_v39 = vsel %vm2018_vm4, %v8993_v57, 0.0 }
 0x792   :  { %8331 = vpow2.f32 %v2107_v35  ;;  %2134 = vadd.xlane.f32.xlu0 %v2133_v39  ;;  %v2063_v40 = vpop.xlane.xlu0 %2062  ;;  %v2148_v62 = vsel %vm2018_vm4, %v8995_v38, 0.0 }
 0x793   :  { %v2081_v41 = vsub.f32 %v8920_v2, %v2063_v40  ;;  %2149 = vadd.xlane.f32.xlu1 %v2148_v62 }
 0x794   :  { %v9002_v44 = vpop.eup %8323 }
 0x795   :  { %v9004_v45 = vpop.eup %8325  ;;  %v2111_v46 = vmul.f32 1.442695, %v2081_v41  ;;  %v2139_v47 = vsel %vm2018_vm4, %v9002_v44, 0.0 }
 0x796   :  { %2140 = vadd.xlane.f32.xlu0 %v2139_v47  ;;  %v2154_v23 = vsel %vm2018_vm4, %v9004_v45, 0.0  ;;  %v9032_v37 = vpop.permute.xlu0 %817 }
 0x797   :  { %8333 = vpow2.f32 %v2111_v46  ;;  %2155 = vadd.xlane.f32.xlu1 %v2154_v23 }
 0x798   :  { %v9010_v52 = vpop.eup %8327 }
 0x799   :  { %v9012_v27 = vpop.eup %8329  ;;  %v2145_v2 = vsel %vm2018_vm4, %v9010_v52, 0.0 }
 0x79a   :  { %2146 = vadd.xlane.f32.xlu0 %v2145_v2  ;;  %v2160_v54 = vsel %vm2018_vm4, %v9012_v27, 0.0  ;;  %v9034_v61 = vpop.permute.xlu0 %823 }
 0x79b   :  { %2161 = vadd.xlane.f32.xlu1 %v2160_v54 }
 0x79c   :  { %v9018_v55 = vpop.eup %8331 }
 0x79d   :  { %v2151_v31 = vsel %vm2018_vm4, %v9018_v55, 0.0 }
 0x79e   :  { %2152 = vadd.xlane.f32.xlu0 %v2151_v31 }
 0x7a1   :  { %v9022_v32 = vpop.eup %8333 }
 0x7a2   :  { %v2157_v58 = vsel %vm2018_vm4, %v9022_v32, 0.0 }
 0x7a3   :  { %2158 = vadd.xlane.f32.xlu0 %v2157_v58 }
 0x7ac   :  { %827 = vrot.lane.b32.xlu1 %v8764_v50, %s8574_s16 }
 0x7b9   :  { %829 = vrot.lane.b32.xlu0 %v8753_v49, %s8574_s16 }
 0x7be   :  { %v2120_v60 = vpop.xlane.xlu1 %2119 }
 0x7bf   :  { %8335 = vrcp.f32 %v2120_v60 }
 0x7c9   :  { %v8336_v63 = vpop.eup %8335 }
 0x7ca   :  { %v2180_v3 = vmul.f32 %v8336_v63, %v8948_v24 }
 0x7cb   :  { %v2117_v0 = vpop.xlane.xlu0 %2116 }
 0x7cc   :  { %8337 = vrcp.f32 %v2117_v0  ;;  %7682 = vmatmul.mubr.msk.f32.vlgmr.msra.gmra.mrb[22].mxu1 %vm2018_vm4, %v2180_v3 }
 0x7cd   :  { %7690 = vmatpush3.msra.mxu1 %v8926_v6  ;;  %7691 = vmatprep.mubr.msk.f32.mxu1 %vm8567_vm2, %v8566_v15 }
 0x7ce   :  { %7699 = vmatprep.subr.mxu1 %v8566_v15 }
 0x7d6   :  { %v8338_v49 = vpop.eup %8337 }
 0x7d7   :  { %v2179_v50 = vmul.f32 %v8338_v49, %v8952_v28  ;;  %v3438_v49 = vld [vmem:[#allocation7 + $0x120] sm:$0xff] }
 0x7d9   :  { %7677 = vmatmul.mubr.msk.f32.vlgmr.msra.gmra.mrb[22].mxu0 %vm2018_vm4, %v2179_v50  ;;  %v3439_v50 = vld [vmem:[#allocation7 + $0x128] sm:$0xff] }
 0x7da   :  { %7685 = vmatpush3.msra.mxu0 %v8934_v9  ;;  %7686 = vmatprep.mubr.msk.f32.mxu0 %vm8567_vm2, %v8566_v15 }
 0x7db   :  { %7694 = vmatprep.subr.mxu0 %v8566_v15 }
 0x80f   :  { %v2126_v24 = vpop.xlane.xlu1 %2125 }
 0x810   :  { %8339 = vrcp.f32 %v2126_v24 }
 0x813   :  { %v2132_v6 = vpop.xlane.xlu1 %2131 }
 0x814   :  { %8341 = vrcp.f32 %v2132_v6  ;;  %v8136_v6 = vpack.c.bf16 %v3439_v50, %v3438_v49 }
 0x817   :  { %v2123_v42 = vpop.xlane.xlu0 %2122 }
 0x818   :  { %8343 = vrcp.f32 %v2123_v42  ;;  %v2138_v11 = vpop.xlane.xlu1 %2137 }
 0x819   :  { %8345 = vrcp.f32 %v2138_v11  ;;  %v3440_v11 = vld [vmem:[#allocation7 + $0x130] sm:$0xff] }
 0x81a   :  { %v8340_v14 = vpop.eup %8339 }
 0x81b   :  { %v2129_v16 = vpop.xlane.xlu0 %2128  ;;  %v2182_v28 = vmul.f32 %v8340_v14, %v8962_v53  ;;  %v3441_v14 = vld [vmem:[#allocation7 + $0x138] sm:$0xff] }
 0x81c   :  { %8347 = vrcp.f32 %v2129_v16  ;;  %v2144_v19 = vpop.xlane.xlu1 %2143 }
 0x81d   :  { %8349 = vrcp.f32 %v2144_v19  ;;  %7692 = vmatmul.mubr.msk.f32.vlgmr.msra.gmra.mrb[24].mxu1 %vm2018_vm4, %v2182_v28  ;;  %v8140_v19 = vpack.c.bf16 %v3441_v14, %v3440_v11  ;;  %v3639_v11 = vld [vmem:[#allocation7 + $0x178] sm:$0xff] }
 0x81e   :  { %v8342_v9 = vpop.eup %8341  ;;  %7700 = vmatpush3.msra.mxu1 %v8918_v1  ;;  %7701 = vmatprep.mubr.msk.f32.mxu1 %vm8567_vm2, %v8566_v15 }
 0x81f   :  { %v2135_v21 = vpop.xlane.xlu0 %2134  ;;  %7709 = vmatprep.subr.mxu1 %v8566_v15  ;;  %v2184_v22 = vmul.f32 %v8342_v9, %v8968_v59 }
 0x820   :  { %8351 = vrcp.f32 %v2135_v21  ;;  %v2150_v48 = vpop.xlane.xlu1 %2149 }
 0x821   :  { %8353 = vrcp.f32 %v2150_v48  ;;  %7702 = vmatmul.mubr.msk.f32.vlgmr.msra.gmra.mrb[26].mxu1 %vm2018_vm4, %v2184_v22 }
 0x822   :  { %v8344_v53 = vpop.eup %8343  ;;  %7710 = vmatpush3.msra.mxu1 %v8924_v5  ;;  %7711 = vmatprep.mubr.msk.f32.mxu1 %vm8567_vm2, %v8566_v15 }
 0x823   :  { %v8346_v1 = vpop.eup %8345  ;;  %v2141_v51 = vpop.xlane.xlu0 %2140  ;;  %7719 = vmatprep.subr.mxu1 %v8566_v15  ;;  %v2181_v20 = vmul.f32 %v8344_v53, %v8974_v4 }
 0x824   :  { %8355 = vrcp.f32 %v2141_v51  ;;  %v2156_v13 = vpop.xlane.xlu1 %2155  ;;  %v2186_v59 = vmul.f32 %v8346_v1, %v8976_v43  ;;  %v3528_v1 = vld [vmem:[#allocation7 + $0x140] sm:$0xff]  ;;  %v3529_v51 = vld [vmem:[#allocation7 + $0x148] sm:$0xff] }
 0x825   :  { %8357 = vrcp.f32 %v2156_v13  ;;  %7687 = vmatmul.mubr.msk.f32.vlgmr.msra.gmra.mrb[24].mxu0 %vm2018_vm4, %v2181_v20  ;;  %v8144_v13 = vpack.c.bf16 %v3529_v51, %v3528_v1  ;;  %v3646_v51 = vld [vmem:[#allocation7 + $0x1b0] sm:$0xff] }
 0x826   :  { %v8348_v33 = vpop.eup %8347  ;;  %7695 = vmatpush3.msra.mxu0 %v8932_v8  ;;  %7712 = vmatmul.mubr.msk.f32.vlgmr.msra.gmra.mrb[28].mxu1 %vm2018_vm4, %v2186_v59 }
 0x827   :  { %v8350_v5 = vpop.eup %8349  ;;  %7720 = vmatpush3.msra.mxu1 %v8930_v7  ;;  %v2147_v34 = vpop.xlane.xlu0 %2146  ;;  %7696 = vmatprep.mubr.msk.f32.mxu0 %vm8567_vm2, %v8566_v15  ;;  %v2183_v4 = vmul.f32 %v8348_v33, %v8984_v26 }
 0x828   :  { %8359 = vrcp.f32 %v2147_v34  ;;  %v2162_v56 = vpop.xlane.xlu1 %2161  ;;  %7704 = vmatprep.subr.mxu0 %v8566_v15  ;;  %7721 = vmatprep.mubr.msk.f32.mxu1 %vm8567_vm2, %v8566_v15  ;;  %v2188_v8 = vmul.f32 %v8350_v5, %v8986_v30 }
 0x829   :  { %8361 = vrcp.f32 %v2162_v56  ;;  %7729 = vmatprep.subr.mxu1 %v8566_v15  ;;  %7697 = vmatmul.mubr.msk.f32.vlgmr.msra.gmra.mrb[26].mxu0 %vm2018_vm4, %v2183_v4 }
 0x82a   :  { %v8352_v7 = vpop.eup %8351  ;;  %7705 = vmatpush3.msra.mxu0 %v8936_v10  ;;  %7722 = vmatmul.mubr.msk.f32.vlgmr.msra.gmra.mrb[30].mxu1 %vm2018_vm4, %v2188_v8 }
 0x82b   :  { %v8354_v43 = vpop.eup %8353  ;;  %7730 = vmatpush3.msra.mxu1 %v9032_v37  ;;  %v2153_v26 = vpop.xlane.xlu0 %2152  ;;  %7706 = vmatprep.mubr.msk.f32.mxu0 %vm8567_vm2, %v8566_v15  ;;  %v2185_v17 = vmul.f32 %v8352_v7, %v8993_v57 }
 0x82c   :  { %8363 = vrcp.f32 %v2153_v26  ;;  %7714 = vmatprep.subr.mxu0 %v8566_v15  ;;  %7731 = vmatprep.mubr.msk.f32.mxu1 %vm8567_vm2, %v8566_v15  ;;  %v2190_v30 = vmul.f32 %v8354_v43, %v8995_v38  ;;  %v828_v46 = vpop.permute.xlu1 %827 }
 0x82d   :  { %7739 = vmatprep.subr.mxu1 %v8566_v15  ;;  %7707 = vmatmul.mubr.msk.f32.vlgmr.msra.gmra.mrb[28].mxu0 %vm2018_vm4, %v2185_v17 }
 0x82e   :  { %v8356_v10 = vpop.eup %8355  ;;  %7715 = vmatpush3.msra.mxu0 %v8938_v12  ;;  %7732 = vmatmul.mubr.msk.f32.vlgmr.msra.gmra.mrb[32].mxu1 %vm2018_vm4, %v2190_v30 }
 0x82f   :  { %v8358_v35 = vpop.eup %8357  ;;  %7740 = vmatpush3.msra.mxu1 %v9034_v61  ;;  %7716 = vmatprep.mubr.msk.f32.mxu0 %vm8567_vm2, %v8566_v15  ;;  %v2187_v57 = vmul.f32 %v8356_v10, %v9002_v44 }
 0x830   :  { %7724 = vmatprep.subr.mxu0 %v8566_v15  ;;  %v2159_v38 = vpop.xlane.xlu0 %2158  ;;  %7741 = vmatprep.mubr.msk.f32.mxu1 %vm8567_vm2, %v8566_v15  ;;  %v2192_v39 = vmul.f32 %v8358_v35, %v9004_v45 }
 0x831   :  { %8365 = vrcp.f32 %v2159_v38  ;;  %7717 = vmatmul.mubr.msk.f32.vlgmr.msra.gmra.mrb[30].mxu0 %vm2018_vm4, %v2187_v57  ;;  %7749 = vmatprep.subr.mxu1 %v8566_v15 }
 0x832   :  { %v8360_v12 = vpop.eup %8359  ;;  %7725 = vmatpush3.msra.mxu0 %v8945_v18  ;;  %7742 = vmatmul.mubr.msk.f32.vlgmr.msra.gmra.mrb[34].mxu1 %vm2018_vm4, %v2192_v39 }
 0x833   :  { %v8362_v40 = vpop.eup %8361  ;;  %7726 = vmatprep.mubr.msk.f32.mxu0 %vm8567_vm2, %v8566_v15  ;;  %7734 = vmatprep.subr.mxu0 %v8566_v15  ;;  %v2189_v62 = vmul.f32 %v8360_v12, %v9010_v52 }
 0x834   :  { %v830_v41 = vpop.permute.xlu0 %829  ;;  %7751 = vmatprep.mubr.msk.f32.mxu1 %vm8567_vm2, %v8566_v15  ;;  %v2194_v44 = vmul.f32 %v8362_v40, %v9012_v27 }
 0x835   :  { %7727 = vmatmul.mubr.msk.f32.vlgmr.msra.gmra.mrb[32].mxu0 %vm2018_vm4, %v2189_v62  ;;  %7750 = vmatpush3.msra.mxu1 %v830_v41 }
 0x836   :  { %v8364_v18 = vpop.eup %8363  ;;  %7735 = vmatpush3.msra.mxu0 %v9030_v36  ;;  %7752 = vmatmul.mubr.msk.f32.vlgmr.msra.gmra.mrb[36].mxu1 %vm2018_vm4, %v2194_v44 }
 0x837   :  { %7736 = vmatprep.mubr.msk.f32.mxu0 %vm8567_vm2, %v8566_v15  ;;  %7744 = vmatprep.subr.mxu0 %v8566_v15  ;;  %v2191_v45 = vmul.f32 %v8364_v18, %v9018_v55 }
 0x838   :  { %8145 = vmatprep.subr.bf16.mxu1 %v8144_v13 }
 0x839   :  { %7737 = vmatmul.mubr.msk.f32.vlgmr.msra.gmra.mrb[34].mxu0 %vm2018_vm4, %v2191_v45  ;;  %8147 = vmatpush3.bf16.msra.mxu1 %v8144_v13 }
 0x83a   :  { %7745 = vmatpush3.msra.mxu0 %v828_v46  ;;  %7746 = vmatprep.mubr.msk.f32.mxu0 %vm8567_vm2, %v8566_v15 }
 0x83b   :  { %v8366_v47 = vpop.eup %8365  ;;  %8137 = vmatprep.subr.bf16.mxu0 %v8136_v6 }
 0x83c   :  { %v2193_v23 = vmul.f32 %v8366_v47, %v9022_v32 }
 0x83e   :  { %7747 = vmatmul.mubr.msk.f32.vlgmr.msra.gmra.mrb[36].mxu0 %vm2018_vm4, %v2193_v23 }
 0x83f   :  { %8139 = vmatpush3.bf16.msra.mxu0 %v8136_v6 }
 0x840   :  { %8141 = vmatprep.subr.bf16.mxu0 %v8140_v19 }
 0x843   :  { %8143 = vmatpush3.bf16.msra.mxu0 %v8140_v19 }
 0x89f   :  { %v9120_v52 = vpop.f32.mrb[22].mxu1 }
 0x8a0   :  { %v7683_v27 = vpop.f32.mrb[23].mxu1 }
 0x8ac   :  { %v9122_v2 = vpop.f32.mrb[22].mxu0 }
 0x8ad   :  { %v7678_v54 = vpop.f32.mrb[23].mxu0 }
 0x8f0   :  { %v2483_v31 = vpop.f32.mrb[24].mxu1 }
 0x8f1   :  { %3367 = vrot.lane.b32.xlu0 %v2483_v31, %s8575_s17  ;;  %v7693_v55 = vpop.f32.mrb[25].mxu1 }
 0x8f4   :  { %v2629_v58 = vpop.f32.mrb[26].mxu1 }
 0x8f5   :  { %3375 = vrot.lane.b32.xlu0 %v2629_v58, %s8562_s28  ;;  %v7703_v36 = vpop.f32.mrb[27].mxu1 }
 0x8f8   :  { %v2410_v60 = vpop.f32.mrb[24].mxu0 }
 0x8f9   :  { %v2775_v37 = vpop.f32.mrb[28].mxu1  ;;  %v7688_v32 = vpop.f32.mrb[25].mxu0  ;;  %3365 = vrot.lane.b32.xlu1 %v2410_v60, %s8575_s17  ;;  %v3530_v60 = vld [vmem:[#allocation7 + $0x150] sm:$0xff] }
 0x8fa   :  { %3383 = vrot.lane.b32.xlu0 %v2775_v37, %s8576_s19  ;;  %v7713_v61 = vpop.f32.mrb[29].mxu1  ;;  %v3531_v37 = vld [vmem:[#allocation7 + $0x158] sm:$0xff] }
 0x8fb   :  { %v8148_v32 = vpack.c.bf16 %v3531_v37, %v3530_v60  ;;  %v3636_v61 = vld [vmem:[#allocation7 + $0x160] sm:$0xff] }
 0x8fc   :  { %v2556_v63 = vpop.f32.mrb[26].mxu0  ;;  %v3754_v37 = vld [vmem:[#allocation7 + $0x200] sm:$0xff] }
 0x8fd   :  { %v2921_v0 = vpop.f32.mrb[30].mxu1  ;;  %v7698_v3 = vpop.f32.mrb[27].mxu0  ;;  %3373 = vrot.lane.b32.xlu1 %v2556_v63, %s8562_s28  ;;  %8149 = vmatprep.subr.bf16.mxu1 %v8148_v32  ;;  %v3637_v63 = vld [vmem:[#allocation7 + $0x168] sm:$0xff] }
 0x8fe   :  { %3391 = vrot.lane.b32.xlu0 %v2921_v0, %s8577_s20  ;;  %v7723_v24 = vpop.f32.mrb[31].mxu1  ;;  %8151 = vmatpush3.bf16.msra.mxu1 %v8148_v32  ;;  %v8152_v0 = vpack.c.bf16 %v3637_v63, %v3636_v61  ;;  %v7172_v3 = vld [vmem:[#allocation8 + $0x9] ss:$0 sm:$0xff]  ;;  %v3756_v63 = vld [vmem:[#allocation7 + $0x210] sm:$0xff] }
 0x8ff   :  { %v3755_v32 = vld [vmem:[#allocation7 + $0x208] sm:$0xff] }
 0x900   :  { %v2702_v42 = vpop.f32.mrb[28].mxu0  ;;  %8153 = vmatprep.subr.bf16.mxu0 %v8152_v0  ;;  %v8192_v61 = vpack.c.bf16 %v3755_v32, %v3754_v37 }
 0x901   :  { %v3067_v16 = vpop.f32.mrb[32].mxu1  ;;  %v7708_v28 = vpop.f32.mrb[29].mxu0  ;;  %3381 = vrot.lane.b32.xlu1 %v2702_v42, %s8576_s19  ;;  %v3638_v42 = vld [vmem:[#allocation7 + $0x170] sm:$0xff] }
 0x902   :  { %3399 = vrot.lane.b32.xlu0 %v3067_v16, %s8578_s21  ;;  %v7733_v9 = vpop.f32.mrb[33].mxu1  ;;  %v8156_v14 = vpack.c.bf16 %v3639_v11, %v3638_v42  ;;  %v3640_v16 = vld [vmem:[#allocation7 + $0x180] sm:$0xff]  ;;  %v3641_v28 = vld [vmem:[#allocation7 + $0x188] sm:$0xff] }
 0x903   :  { %v8160_v19 = vpack.c.bf16 %v3641_v28, %v3640_v16  ;;  %v3642_v9 = vld [vmem:[#allocation7 + $0x190] sm:$0xff] }
 0x904   :  { %v2848_v21 = vpop.f32.mrb[30].mxu0 }
 0x905   :  { %v3213_v22 = vpop.f32.mrb[34].mxu1  ;;  %v7718_v48 = vpop.f32.mrb[31].mxu0  ;;  %3389 = vrot.lane.b32.xlu1 %v2848_v21, %s8577_s20  ;;  %v3643_v21 = vld [vmem:[#allocation7 + $0x198] sm:$0xff] }
 0x906   :  { %3407 = vrot.lane.b32.xlu0 %v3213_v22, %s8579_s22  ;;  %v7743_v53 = vpop.f32.mrb[35].mxu1  ;;  %v3644_v22 = vld [vmem:[#allocation7 + $0x1a0] sm:$0xff]  ;;  %v8164_v48 = vpack.c.bf16 %v3643_v21, %v3642_v9 }
 0x907   :  { %v3645_v53 = vld [vmem:[#allocation7 + $0x1a8] sm:$0xff] }
 0x908   :  { %v2994_v20 = vpop.f32.mrb[32].mxu0  ;;  %v8168_v1 = vpack.c.bf16 %v3645_v53, %v3644_v22 }
 0x909   :  { %v7728_v59 = vpop.f32.mrb[33].mxu0  ;;  %3397 = vrot.lane.b32.xlu1 %v2994_v20, %s8578_s21  ;;  %v3359_v33 = vpop.f32.mrb[36].mxu1  ;;  %v3647_v20 = vld [vmem:[#allocation7 + $0x1b8] sm:$0xff] }
 0x90a   :  { %3415 = vrot.lane.b32.xlu0 %v3359_v33, %s8580_s23  ;;  %v7753_v5 = vpop.f32.mrb[37].mxu1  ;;  %v8172_v13 = vpack.c.bf16 %v3647_v20, %v3646_v51  ;;  %v3648_v59 = vld [vmem:[#allocation7 + $0x1c0] sm:$0xff]  ;;  %v3649_v33 = vld [vmem:[#allocation7 + $0x1c8] sm:$0xff] }
 0x90b   :  { %v8176_v5 = vpack.c.bf16 %v3649_v33, %v3648_v59 }
 0x90c   :  { %v3140_v34 = vpop.f32.mrb[34].mxu0 }
 0x90d   :  { %3405 = vrot.lane.b32.xlu1 %v3140_v34, %s8579_s22  ;;  %v7738_v4 = vpop.f32.mrb[35].mxu0  ;;  %v3650_v34 = vld [vmem:[#allocation7 + $0x1d0] sm:$0xff] }
 0x90e   :  { %v3651_v4 = vld [vmem:[#allocation7 + $0x1d8] sm:$0xff] }
 0x911   :  { %v3286_v56 = vpop.f32.mrb[36].mxu0 }
 0x912   :  { %3413 = vrot.lane.b32.xlu1 %v3286_v56, %s8580_s23  ;;  %v7748_v8 = vpop.f32.mrb[37].mxu0  ;;  %v8180_v56 = vpack.c.bf16 %v3651_v4, %v3650_v34 }
 0x913   :  { %v7175_v8 = vld [vmem:[#allocation8 + $0xa] ss:$0 sm:$0xff] }
 0x963   :  { %v3368_v7 = vpop.permute.xlu0 %3367 }
 0x964   :  { %v3420_v41 = vsel %vm833_vm3, %v9120_v52, %v3368_v7 }
 0x967   :  { %v3376_v43 = vpop.permute.xlu0 %3375 }
 0x968   :  { %v3422_v18 = vsel %vm2018_vm4, %v3420_v41, %v3376_v43 }
 0x96b   :  { %v3366_v26 = vpop.permute.xlu1 %3365 }
 0x96c   :  { %v3384_v17 = vpop.permute.xlu0 %3383  ;;  %v3419_v40 = vsel %vm833_vm3, %v9122_v2, %v3366_v26 }
 0x96d   :  { %v3425_v46 = vsel %vm3423_vm5, %v3422_v18, %v3384_v17 }
 0x96f   :  { %v3374_v30 = vpop.permute.xlu1 %3373 }
 0x970   :  { %v3392_v10 = vpop.permute.xlu0 %3391  ;;  %v3421_v44 = vsel %vm2018_vm4, %v3419_v40, %v3374_v30 }
 0x971   :  { %v3428_v23 = vsel %vm3426_vm6, %v3425_v46, %v3392_v10 }
 0x973   :  { %v3382_v35 = vpop.permute.xlu1 %3381 }
 0x974   :  { %v3400_v57 = vpop.permute.xlu0 %3399  ;;  %v3424_v45 = vsel %vm3423_vm5, %v3421_v44, %v3382_v35 }
 0x975   :  { %v3431_v52 = vsel %vm3429_vm7, %v3428_v23, %v3400_v57 }
 0x977   :  { %v3390_v38 = vpop.permute.xlu1 %3389 }
 0x978   :  { %v3408_v12 = vpop.permute.xlu0 %3407  ;;  %v3427_v47 = vsel %vm3426_vm6, %v3424_v45, %v3390_v38 }
 0x979   :  { %v3434_v55 = vsel %vm3432_vm8, %v3431_v52, %v3408_v12  ;;  %v9158_v52 = vld [vmem:[#allocation5] sm:$0xff] }
 0x97b   :  { %v3398_v39 = vpop.permute.xlu1 %3397 }
 0x97c   :  { %v3430_v27 = vsel %vm3429_vm7, %v3427_v47, %v3398_v39  ;;  %v3416_v2 = vpop.permute.xlu0 %3415 }
 0x97d   :  { %v3437_v36 = vsel %vm3435_vm9, %v3434_v55, %v3416_v2  ;;  %v3752_v55 = vld [vmem:[#allocation7 + $0x1f0] sm:$0xff] }
 0x97f   :  { %v3406_v62 = vpop.permute.xlu1 %3405 }
 0x980   :  { %v3433_v54 = vsel %vm3432_vm8, %v3430_v27, %v3406_v62 }
 0x984   :  { %v3414_v31 = vpop.permute.xlu1 %3413 }
 0x985   :  { %v3436_v58 = vsel %vm3435_vm9, %v3433_v54, %v3414_v31  ;;  %v3750_v54 = vld [vmem:[#allocation7 + $0x1e0] sm:$0xff]  ;;  %v3751_v31 = vld [vmem:[#allocation7 + $0x1e8] sm:$0xff] }
 0x986   :  { %7762 = vmatprep.mubr.msk.f32.mxu0 %vm85_vm0, %v3436_v58  ;;  %v8184_v58 = vpack.c.bf16 %v3751_v31, %v3750_v54 }
 0x987   :  { %7763 = vmatmul.mubr.msk.f32.vlgmr.msra.gmra.mrb[38].mxu0 %vm85_vm0, %v3437_v36  ;;  %v3753_v36 = vld [vmem:[#allocation7 + $0x1f8] sm:$0xff] }
 0x988   :  { %8155 = vmatpush3.bf16.msra.mxu0 %v8152_v0  ;;  %v8188_v60 = vpack.c.bf16 %v3753_v36, %v3752_v55  ;;  %8185 = vmatprep.subr.bf16.mxu1 %v8184_v58  ;;  %v3757_v0 = vld [vmem:[#allocation7 + $0x218] sm:$0xff] }
 0x989   :  { %8157 = vmatprep.subr.bf16.mxu0 %v8156_v14 }
 0x98c   :  { %8159 = vmatpush3.bf16.msra.mxu0 %v8156_v14 }
 0x98d   :  { %8161 = vmatprep.subr.bf16.mxu0 %v8160_v19 }
 0x990   :  { %8163 = vmatpush3.bf16.msra.mxu0 %v8160_v19 }
 0x991   :  { %8165 = vmatprep.subr.bf16.mxu0 %v8164_v48 }
 0x994   :  { %8167 = vmatpush3.bf16.msra.mxu0 %v8164_v48 }
 0x995   :  { %8169 = vmatprep.subr.bf16.mxu0 %v8168_v1 }
 0x998   :  { %8171 = vmatpush3.bf16.msra.mxu0 %v8168_v1 }
 0x999   :  { %8173 = vmatprep.subr.bf16.mxu0 %v8172_v13 }
 0x99c   :  { %8175 = vmatpush3.bf16.msra.mxu0 %v8172_v13 }
 0x99d   :  { %8177 = vmatprep.subr.bf16.mxu0 %v8176_v5 }
 0x9a0   :  { %8179 = vmatpush3.bf16.msra.mxu0 %v8176_v5 }
 0x9a1   :  { %8181 = vmatprep.subr.bf16.mxu0 %v8180_v56 }
 0x9a4   :  { %8183 = vmatpush3.bf16.msra.mxu0 %v8180_v56 }
 0xa5a   :  { %v7764_v49 = vpop.f32.mrb[38].mxu0 }
 0xa5b   :  { %v3519_v50 = vpop.f32.mrb[39].mxu0  ;;  %v3525_v6 = vadd.f32 %v7764_v49, %v7172_v3  ;;  %v3846_v49 = vld [vmem:[#allocation7 + $0x220] sm:$0xff] }
 0xa5c   :  { %v3520_v24 = vadd.f32 %v7172_v3, %v3519_v50  ;;  %v8196_v3 = vpack.c.bf16 %v3757_v0, %v3756_v63  ;;  %v3847_v50 = vld [vmem:[#allocation7 + $0x228] sm:$0xff] }
 0xa5d   :  { %v7188_v0 = vld [vmem:[#allocation8 + $0xf] ss:$0 sm:$0xff] }
 0xa5e   :  { %7773 = vmatprep.mubr.msk.f32.mxu1 %vm85_vm0, %v3520_v24  ;;  %v8200_v24 = vpack.c.bf16 %v3847_v50, %v3846_v49 }
 0xa5f   :  { %7774 = vmatmul.mubr.msk.f32.vlgmr.msra.gmra.mrb[38].mxu1 %vm85_vm0, %v3525_v6  ;;  %v7178_v6 = vld [vmem:[#allocation8 + $0xb] ss:$0 sm:$0xff] }
 0xa60   :  { %8187 = vmatpush3.bf16.msra.mxu1 %v8184_v58 }
 0xa61   :  { %8189 = vmatprep.subr.bf16.mxu1 %v8188_v60 }
 0xa64   :  { %8191 = vmatpush3.bf16.msra.mxu1 %v8188_v60 }
 0xa65   :  { %8193 = vmatprep.subr.bf16.mxu1 %v8192_v61 }
 0xa68   :  { %8195 = vmatpush3.bf16.msra.mxu1 %v8192_v61 }
 0xa69   :  { %8197 = vmatprep.subr.bf16.mxu1 %v8196_v3 }
 0xa6c   :  { %8199 = vmatpush3.bf16.msra.mxu1 %v8196_v3 }
 0xa6d   :  { %8201 = vmatprep.subr.bf16.mxu1 %v8200_v24 }
 0xb32   :  { %v7775_v7 = vpop.f32.mrb[38].mxu1 }
 0xb33   :  { %v3615_v43 = vadd.f32 %v7775_v7, %v7175_v8  ;;  %v3609_v26 = vpop.f32.mrb[39].mxu1  ;;  %v3848_v7 = vld [vmem:[#allocation7 + $0x230] sm:$0xff] }
 0xb34   :  { %v3610_v17 = vadd.f32 %v7175_v8, %v3609_v26 }
 0xb35   :  { %v3621_v30 = vmul.f32 0.044715, %v3615_v43  ;;  %v3619_v23 = vmul.f32 0.5, %v3615_v43 }
 0xb36   :  { %v3620_v10 = vmul.f32 0.044715, %v3610_v17  ;;  %v3618_v46 = vmul.f32 0.5, %v3610_v17 }
 0xb37   :  { %v3623_v35 = vmul.f32 %v3621_v30, %v3615_v43  ;;  %v3937_v30 = vld [vmem:[#allocation7 + $0x248] sm:$0xff] }
 0xb38   :  { %v3622_v57 = vmul.f32 %v3620_v10, %v3610_v17 }
 0xb39   :  { %v3625_v38 = vmul.f32 %v3623_v35, %v3615_v43  ;;  %v4020_v35 = vld [vmem:[#allocation7 + $0x260] sm:$0xff] }
 0xb3a   :  { %v3624_v39 = vmul.f32 %v3622_v57, %v3610_v17  ;;  %v4021_v57 = vld [vmem:[#allocation7 + $0x268] sm:$0xff] }
 0xb3b   :  { %v3627_v12 = vadd.f32 %v3625_v38, %v3615_v43  ;;  %v3849_v43 = vld [vmem:[#allocation7 + $0x238] sm:$0xff]  ;;  %v4022_v38 = vld [vmem:[#allocation7 + $0x270] sm:$0xff] }
 0xb3c   :  { %v3626_v40 = vadd.f32 %v3624_v39, %v3610_v17  ;;  %v8204_v26 = vpack.c.bf16 %v3849_v43, %v3848_v7  ;;  %v3936_v17 = vld [vmem:[#allocation7 + $0x240] sm:$0xff]  ;;  %v8216_v39 = vpack.c.bf16 %v4021_v57, %v4020_v35 }
 0xb3d   :  { %v3629_v62 = vmul.f32 0.7978846, %v3627_v12  ;;  %v8208_v10 = vpack.c.bf16 %v3937_v30, %v3936_v17  ;;  %v4023_v12 = vld [vmem:[#allocation7 + $0x278] sm:$0xff] }
 0xb3e   :  { %v3628_v41 = vmul.f32 0.7978846, %v3626_v40  ;;  %v8220_v40 = vpack.c.bf16 %v4023_v12, %v4022_v38  ;;  %8217 = vmatprep.subr.bf16.mxu0 %v8216_v39 }
 0xb3f   :  { %8367 = vtanh.f32 %v3629_v62  ;;  %v8440_v62 = vld [vmem:[#allocation5 + $0x8] sm:$0xff] }
 0xb40   :  { %8369 = vtanh.f32 %v3628_v41  ;;  %v7179_v41 = vld [vmem:[#allocation8 + $0xc] ss:$0 sm:$0xff] }
 0xb49   :  { %v8368_v44 = vpop.eup %8367 }
 0xb4a   :  { %v8370_v18 = vpop.eup %8369  ;;  %v3633_v45 = vadd.f32 1.0, %v8368_v44 }
 0xb4b   :  { %v3632_v47 = vadd.f32 1.0, %v8370_v18 }
 0xb4c   :  { %v3635_v2 = vmul.f32 %v3633_v45, %v3619_v23  ;;  %v3939_v23 = vld [vmem:[#allocation7 + $0x258] sm:$0xff] }
 0xb4d   :  { %v3634_v27 = vmul.f32 %v3632_v47, %v3618_v46  ;;  %v3938_v47 = vld [vmem:[#allocation7 + $0x250] sm:$0xff] }
 0xb4e   :  { %v8212_v54 = vpack.c.bf16 %v3939_v23, %v3938_v47 }
 0xb4f   :  { %7808 = vmatprep.mubr.f32.mxu0 %v3634_v27 }
 0xb50   :  { %7809 = vmatmul.mubr.f32.vlgmr.msra.gmra.mrb[40].mxu0 %v3635_v2 }
 0xb51   :  { %7860 = vmatprep.mubr.msk.f32.mxu0 %vm85_vm0, %v9158_v52  ;;  %8219 = vmatpush3.bf16.msra.mxu0 %v8216_v39 }
 0xb52   :  { %8221 = vmatprep.subr.bf16.mxu0 %v8220_v40 }
 0xb55   :  { %8223 = vmatpush3.bf16.msra.mxu0 %v8220_v40 }
 0xb56   :  { %7873 = vmatprep.subr.mxu0 %v8566_v15 }
 0xb58   :  { %7861 = vmatmul.mubr.msk.f32.vlgmr.msra.gmra.mrb[42].mxu0 %vm85_vm0, %v8440_v62 }
 0xb59   :  { %7875 = vmatprep.mubr.msk.f32.mxu0 %vm8567_vm2, %v8566_v15 }
 0xc23   :  { %v7810_v42 = vpop.f32.mrb[40].mxu0 }
 0xc24   :  { %v3729_v11 = vadd.f32 %v7810_v42, %v7178_v6  ;;  %v3723_v14 = vpop.f32.mrb[41].mxu0 }
 0xc25   :  { %v3724_v16 = vadd.f32 %v7178_v6, %v3723_v14 }
 0xc26   :  { %v3735_v28 = vmul.f32 0.044715, %v3729_v11  ;;  %v3733_v4 = vmul.f32 0.5, %v3729_v11 }
 0xc27   :  { %v3734_v19 = vmul.f32 0.044715, %v3724_v16  ;;  %v3732_v5 = vmul.f32 0.5, %v3724_v16 }
 0xc28   :  { %v3737_v9 = vmul.f32 %v3735_v28, %v3729_v11 }
 0xc29   :  { %v3736_v21 = vmul.f32 %v3734_v19, %v3724_v16 }
 0xc2a   :  { %v3739_v22 = vmul.f32 %v3737_v9, %v3729_v11 }
 0xc2b   :  { %v3738_v48 = vmul.f32 %v3736_v21, %v3724_v16  ;;  %v7862_v61 = vpop.f32.mrb[42].mxu0 }
 0xc2c   :  { %v3741_v53 = vadd.f32 %v3739_v22, %v3729_v11  ;;  %v4095_v63 = vpop.f32.mrb[43].mxu0  ;;  %v9222_v3 = vadd.f32 %v7862_v61, %v7188_v0 }
 0xc2d   :  { %v3740_v1 = vadd.f32 %v3738_v48, %v3724_v16  ;;  %v9224_v49 = vadd.f32 %v7188_v0, %v4095_v63 }
 0xc2e   :  { %v3743_v51 = vmul.f32 0.7978846, %v3741_v53 }
 0xc2f   :  { %v3742_v20 = vmul.f32 0.7978846, %v3740_v1 }
 0xc30   :  { %8371 = vtanh.f32 %v3743_v51 }
 0xc31   :  { %8373 = vtanh.f32 %v3742_v20 }
 0xc3a   :  { %v8372_v13 = vpop.eup %8371 }
 0xc3b   :  { %v8374_v59 = vpop.eup %8373  ;;  %v3747_v33 = vadd.f32 1.0, %v8372_v13 }
 0xc3c   :  { %v3746_v34 = vadd.f32 1.0, %v8374_v59 }
 0xc3d   :  { %v3749_v8 = vmul.f32 %v3747_v33, %v3733_v4 }
 0xc3e   :  { %v3748_v56 = vmul.f32 %v3746_v34, %v3732_v5 }
 0xc40   :  { %7827 = vmatprep.mubr.msk.f32.mxu1 %vm369_vm1, %v3748_v56 }
 0xc41   :  { %7828 = vmatmul.mubr.msk.f32.vlgmr.msra.gmra.mrb[40].mxu1 %vm369_vm1, %v3749_v8 }
 0xc42   :  { %8203 = vmatpush3.bf16.msra.mxu1 %v8200_v24 }
 0xc43   :  { %8205 = vmatprep.subr.bf16.mxu1 %v8204_v26 }
 0xc46   :  { %8207 = vmatpush3.bf16.msra.mxu1 %v8204_v26 }
 0xc47   :  { %8209 = vmatprep.subr.bf16.mxu1 %v8208_v10 }
 0xd14   :  { %v7829_v44 = vpop.f32.mrb[40].mxu1 }
 0xd15   :  { %v3841_v18 = vadd.f32 %v7829_v44, %v7179_v41  ;;  %v3835_v45 = vpop.f32.mrb[41].mxu1 }
 0xd16   :  { %v3836_v46 = vadd.f32 %v7179_v41, %v3835_v45 }
 0xd17   :  { %v9172_v2 = vadd.f32 %v3841_v18, %v8703_v29 }
 0xd18   :  { %v9169_v27 = vadd.f32 %v3836_v46, %v8698_v25  ;;  %v7182_v25 = vld [vmem:[#allocation8 + $0xd] ss:$0 sm:$0xff] }
 0xd1a   :  { %7838 = vmatprep.mubr.msk.f32.mxu1 %vm85_vm0, %v9169_v27 }
 0xd1b   :  { %7839 = vmatmul.mubr.msk.f32.vlgmr.msra.gmra.mrb[42].mxu1 %vm85_vm0, %v9172_v2 }
 0xd1c   :  { %8211 = vmatpush3.bf16.msra.mxu1 %v8208_v10  ;;  %7849 = vmatprep.mubr.msk.f32.mxu1 %vm85_vm0, %v9158_v52  ;;  %v7185_v52 = vld [vmem:[#allocation8 + $0xe] ss:$0 sm:$0xff] }
 0xd1d   :  { %8213 = vmatprep.subr.bf16.mxu1 %v8212_v54 }
 0xd20   :  { %8215 = vmatpush3.bf16.msra.mxu1 %v8212_v54 }
 0xd21   :  { %7863 = vmatprep.subr.mxu1 %v8566_v15 }
 0xd23   :  { %7850 = vmatmul.mubr.msk.f32.vlgmr.msra.gmra.mrb[44].mxu1 %vm85_vm0, %v8440_v62 }
 0xd24   :  { %7865 = vmatprep.mubr.msk.f32.mxu1 %vm8567_vm2, %v8566_v15 }
 0xdee   :  { %v7840_v29 = vpop.f32.mrb[42].mxu1 }
 0xdef   :  { %v3933_v31 = vadd.f32 %v7840_v29, %v7182_v25  ;;  %v3927_v55 = vpop.f32.mrb[43].mxu1 }
 0xdf0   :  { %v3928_v58 = vadd.f32 %v7182_v25, %v3927_v55 }
 0xdf1   :  { %4108 = vrot.lane.b32.xlu0 %v3933_v31, %s8569_s12 }
 0xdf2   :  { %4106 = vrot.lane.b32.xlu1 %v3928_v58, %s8569_s12 }
 0xdf5   :  { %4112 = vrot.lane.b32.xlu0 %v3933_v31, %s8568_s3 }
 0xdf6   :  { %v7851_v36 = vpop.f32.mrb[44].mxu1  ;;  %4110 = vrot.lane.b32.xlu1 %v3928_v58, %s8568_s3 }
 0xdf7   :  { %v4011_v60 = vpop.f32.mrb[45].mxu1  ;;  %v4017_v32 = vadd.f32 %v7851_v36, %v7185_v52 }
 0xdf8   :  { %v4012_v37 = vadd.f32 %v7185_v52, %v4011_v60 }
 0xdf9   :  { %4116 = vrot.lane.b32.xlu0 %v3933_v31, %s8570_s1 }
 0xdfa   :  { %7864 = vmatpush3.xpose.msk.msra.mxu1 %vm833_vm3, %v4012_v37  ;;  %4114 = vrot.lane.b32.xlu1 %v3928_v58, %s8570_s1 }
 0xdfb   :  { %7868 = vmatprep.subr.mxu1 %v8566_v15 }
 0xdfd   :  { %7866 = vmatmul.mubr.msk.f32.vlgmr.msra.gmra.mrb[46].mxu1 %vm833_vm3, %v3928_v58  ;;  %4120 = vrot.lane.b32.xlu0 %v3933_v31, %s8571_s13 }
 0xdfe   :  { %7869 = vmatpush3.xpose.msk.msra.mxu1 %vm833_vm3, %v4017_v32  ;;  %4118 = vrot.lane.b32.xlu1 %v3928_v58, %s8571_s13 }
 0xdff   :  { %7870 = vmatprep.mubr.msk.f32.mxu1 %vm8567_vm2, %v8566_v15  ;;  %7878 = vmatprep.subr.mxu1 %v8566_v15 }
 0xe01   :  { %7871 = vmatmul.mubr.msk.f32.vlgmr.msra.gmra.mrb[48].mxu1 %vm833_vm3, %v3933_v31  ;;  %4124 = vrot.lane.b32.xlu0 %v3933_v31, %s8572_s14 }
 0xe02   :  { %4122 = vrot.lane.b32.xlu1 %v3928_v58, %s8572_s14  ;;  %7880 = vmatprep.mubr.msk.f32.mxu1 %vm8567_vm2, %v8566_v15 }
 0xe05   :  { %4128 = vrot.lane.b32.xlu0 %v3933_v31, %s8573_s15 }
 0xe06   :  { %4126 = vrot.lane.b32.xlu1 %v3928_v58, %s8573_s15 }
 0xe09   :  { %4138 = vrot.lane.b32.xlu0 %v4017_v32, %s8569_s12 }
 0xe0a   :  { %4136 = vrot.lane.b32.xlu1 %v4012_v37, %s8569_s12 }
 0xe0d   :  { %4142 = vrot.lane.b32.xlu0 %v4017_v32, %s8568_s3 }
 0xe0e   :  { %4140 = vrot.lane.b32.xlu1 %v4012_v37, %s8568_s3 }
 0xe11   :  { %4146 = vrot.lane.b32.xlu0 %v4017_v32, %s8570_s1 }
 0xe12   :  { %4144 = vrot.lane.b32.xlu1 %v4012_v37, %s8570_s1 }
 0xe15   :  { %4150 = vrot.lane.b32.xlu0 %v4017_v32, %s8571_s13 }
 0xe16   :  { %4148 = vrot.lane.b32.xlu1 %v4012_v37, %s8571_s13 }
 0xe19   :  { %4154 = vrot.lane.b32.xlu0 %v4017_v32, %s8572_s14 }
 0xe1a   :  { %4152 = vrot.lane.b32.xlu1 %v4012_v37, %s8572_s14 }
 0xe1d   :  { %4158 = vrot.lane.b32.xlu0 %v4017_v32, %s8573_s15 }
 0xe1e   :  { %4156 = vrot.lane.b32.xlu1 %v4012_v37, %s8573_s15 }
 0xe21   :  { %4162 = vrot.lane.b32.xlu0 %v4017_v32, %s8574_s16 }
 0xe22   :  { %4160 = vrot.lane.b32.xlu1 %v4012_v37, %s8574_s16 }
 0xe25   :  { %4132 = vrot.lane.b32.xlu0 %v3933_v31, %s8574_s16 }
 0xe26   :  { %4130 = vrot.lane.b32.xlu1 %v3928_v58, %s8574_s16 }
 0xe29   :  { %4166 = vrot.lane.b32.xlu0 %v9224_v49, %s8569_s12 }
 0xe2a   :  { %4168 = vrot.lane.b32.xlu1 %v9222_v3, %s8569_s12 }
 0xe2d   :  { %4174 = vrot.lane.b32.xlu0 %v9222_v3, %s8568_s3 }
 0xe2e   :  { %4172 = vrot.lane.b32.xlu1 %v9224_v49, %s8568_s3 }
 0xe31   :  { %4180 = vrot.lane.b32.xlu0 %v9222_v3, %s8570_s1 }
 0xe32   :  { %4178 = vrot.lane.b32.xlu1 %v9224_v49, %s8570_s1 }
 0xe35   :  { %4186 = vrot.lane.b32.xlu0 %v9222_v3, %s8571_s13 }
 0xe36   :  { %4184 = vrot.lane.b32.xlu1 %v9224_v49, %s8571_s13 }
 0xe3a   :  { %4190 = vrot.lane.b32.xlu1 %v9224_v49, %s8572_s14 }
 0xe63   :  { %v4109_v50 = vpop.permute.xlu0 %4108 }
 0xe64   :  { %v4107_v24 = vpop.permute.xlu1 %4106 }
 0xe67   :  { %v4113_v6 = vpop.permute.xlu0 %4112 }
 0xe68   :  { %v4111_v42 = vpop.permute.xlu1 %4110 }
 0xe6b   :  { %v4117_v11 = vpop.permute.xlu0 %4116 }
 0xe6c   :  { %v4115_v14 = vpop.permute.xlu1 %4114 }
 0xe6f   :  { %v4121_v16 = vpop.permute.xlu0 %4120 }
 0xe70   :  { %v4119_v28 = vpop.permute.xlu1 %4118 }
 0xe73   :  { %v4125_v19 = vpop.permute.xlu0 %4124 }
 0xe74   :  { %v4123_v9 = vpop.permute.xlu1 %4122 }
 0xe77   :  { %v4129_v21 = vpop.permute.xlu0 %4128 }
 0xe78   :  { %v4127_v22 = vpop.permute.xlu1 %4126 }
 0xe7b   :  { %v4139_v48 = vpop.permute.xlu0 %4138 }
 0xe7c   :  { %v4137_v53 = vpop.permute.xlu1 %4136  ;;  %7879 = vmatpush3.xpose.msk.msra.mxu1 %vm833_vm3, %v4139_v48 }
 0xe7d   :  { %7874 = vmatpush3.xpose.msk.msra.mxu0 %vm833_vm3, %v4137_v53  ;;  %7888 = vmatprep.subr.mxu1 %v8566_v15 }
 0xe7e   :  { %7883 = vmatprep.subr.mxu0 %v8566_v15 }
 0xe7f   :  { %v4143_v1 = vpop.permute.xlu0 %4142  ;;  %7881 = vmatmul.mubr.msk.f32.vlgmr.msra.gmra.mrb[50].mxu1 %vm833_vm3, %v4109_v50 }
 0xe80   :  { %7876 = vmatmul.mubr.msk.f32.vlgmr.msra.gmra.mrb[44].mxu0 %vm833_vm3, %v4107_v24  ;;  %v4141_v51 = vpop.permute.xlu1 %4140  ;;  %7889 = vmatpush3.xpose.msk.msra.mxu1 %vm833_vm3, %v4143_v1 }
 0xe81   :  { %7884 = vmatpush3.xpose.msk.msra.mxu0 %vm833_vm3, %v4141_v51  ;;  %7890 = vmatprep.mubr.msk.f32.mxu1 %vm8567_vm2, %v8566_v15 }
 0xe82   :  { %7885 = vmatprep.mubr.msk.f32.mxu0 %vm8567_vm2, %v8566_v15  ;;  %7898 = vmatprep.subr.mxu1 %v8566_v15 }
 0xe83   :  { %v4147_v20 = vpop.permute.xlu0 %4146  ;;  %7891 = vmatmul.mubr.msk.f32.vlgmr.msra.gmra.mrb[52].mxu1 %vm833_vm3, %v4113_v6  ;;  %7893 = vmatprep.subr.mxu0 %v8566_v15 }
 0xe84   :  { %7886 = vmatmul.mubr.msk.f32.vlgmr.msra.gmra.mrb[46].mxu0 %vm833_vm3, %v4111_v42  ;;  %v4145_v13 = vpop.permute.xlu1 %4144  ;;  %7899 = vmatpush3.xpose.msk.msra.mxu1 %vm833_vm3, %v4147_v20 }
 0xe85   :  { %7894 = vmatpush3.xpose.msk.msra.mxu0 %vm833_vm3, %v4145_v13  ;;  %7900 = vmatprep.mubr.msk.f32.mxu1 %vm8567_vm2, %v8566_v15 }
 0xe86   :  { %7895 = vmatprep.mubr.msk.f32.mxu0 %vm8567_vm2, %v8566_v15  ;;  %7908 = vmatprep.subr.mxu1 %v8566_v15 }
 0xe87   :  { %v4151_v59 = vpop.permute.xlu0 %4150  ;;  %7901 = vmatmul.mubr.msk.f32.vlgmr.msra.gmra.mrb[54].mxu1 %vm833_vm3, %v4117_v11  ;;  %7903 = vmatprep.subr.mxu0 %v8566_v15 }
 0xe88   :  { %7896 = vmatmul.mubr.msk.f32.vlgmr.msra.gmra.mrb[48].mxu0 %vm833_vm3, %v4115_v14  ;;  %v4149_v33 = vpop.permute.xlu1 %4148  ;;  %7909 = vmatpush3.xpose.msk.msra.mxu1 %vm833_vm3, %v4151_v59 }
 0xe89   :  { %7904 = vmatpush3.xpose.msk.msra.mxu0 %vm833_vm3, %v4149_v33  ;;  %7910 = vmatprep.mubr.msk.f32.mxu1 %vm8567_vm2, %v8566_v15 }
 0xe8a   :  { %7905 = vmatprep.mubr.msk.f32.mxu0 %vm8567_vm2, %v8566_v15  ;;  %7918 = vmatprep.subr.mxu1 %v8566_v15 }
 0xe8b   :  { %v4155_v5 = vpop.permute.xlu0 %4154  ;;  %7911 = vmatmul.mubr.msk.f32.vlgmr.msra.gmra.mrb[56].mxu1 %vm833_vm3, %v4121_v16  ;;  %7913 = vmatprep.subr.mxu0 %v8566_v15 }
 0xe8c   :  { %7906 = vmatmul.mubr.msk.f32.vlgmr.msra.gmra.mrb[50].mxu0 %vm833_vm3, %v4119_v28  ;;  %v4153_v34 = vpop.permute.xlu1 %4152  ;;  %7919 = vmatpush3.xpose.msk.msra.mxu1 %vm833_vm3, %v4155_v5 }
 0xe8d   :  { %7914 = vmatpush3.xpose.msk.msra.mxu0 %vm833_vm3, %v4153_v34  ;;  %7920 = vmatprep.mubr.msk.f32.mxu1 %vm8567_vm2, %v8566_v15 }
 0xe8e   :  { %7915 = vmatprep.mubr.msk.f32.mxu0 %vm8567_vm2, %v8566_v15  ;;  %7928 = vmatprep.subr.mxu1 %v8566_v15 }
 0xe8f   :  { %v4159_v4 = vpop.permute.xlu0 %4158  ;;  %7921 = vmatmul.mubr.msk.f32.vlgmr.msra.gmra.mrb[58].mxu1 %vm833_vm3, %v4125_v19  ;;  %7923 = vmatprep.subr.mxu0 %v8566_v15 }
 0xe90   :  { %7916 = vmatmul.mubr.msk.f32.vlgmr.msra.gmra.mrb[52].mxu0 %vm833_vm3, %v4123_v9  ;;  %v4157_v56 = vpop.permute.xlu1 %4156  ;;  %7929 = vmatpush3.xpose.msk.msra.mxu1 %vm833_vm3, %v4159_v4 }
 0xe91   :  { %7924 = vmatpush3.xpose.msk.msra.mxu0 %vm833_vm3, %v4157_v56  ;;  %7930 = vmatprep.mubr.msk.f32.mxu1 %vm8567_vm2, %v8566_v15 }
 0xe92   :  { %7925 = vmatprep.mubr.msk.f32.mxu0 %vm8567_vm2, %v8566_v15  ;;  %7938 = vmatprep.subr.mxu1 %v8566_v15 }
 0xe93   :  { %v4163_v8 = vpop.permute.xlu0 %4162  ;;  %7931 = vmatmul.mubr.msk.f32.vlgmr.msra.gmra.mrb[60].mxu1 %vm833_vm3, %v4129_v21  ;;  %7933 = vmatprep.subr.mxu0 %v8566_v15 }
 0xe94   :  { %7926 = vmatmul.mubr.msk.f32.vlgmr.msra.gmra.mrb[54].mxu0 %vm833_vm3, %v4127_v22  ;;  %v4161_v7 = vpop.permute.xlu1 %4160  ;;  %7939 = vmatpush3.xpose.msk.msra.mxu1 %vm833_vm3, %v4163_v8 }
 0xe95   :  { %7934 = vmatpush3.xpose.msk.msra.mxu0 %vm833_vm3, %v4161_v7  ;;  %7940 = vmatprep.mubr.msk.f32.mxu1 %vm8567_vm2, %v8566_v15 }
 0xe96   :  { %7935 = vmatprep.mubr.msk.f32.mxu0 %vm8567_vm2, %v8566_v15  ;;  %7943 = vmatprep.subr.mxu0 %v8566_v15 }
 0xe97   :  { %v4133_v43 = vpop.permute.xlu0 %4132  ;;  %7948 = vmatprep.subr.mxu1 %v8566_v15 }
 0xe98   :  { %v4131_v26 = vpop.permute.xlu1 %4130  ;;  %7941 = vmatmul.mubr.msk.f32.vlgmr.msra.gmra.mrb[62].mxu1 %vm833_vm3, %v4133_v43 }
 0xe99   :  { %7936 = vmatmul.mubr.msk.f32.vlgmr.msra.gmra.mrb[56].mxu0 %vm833_vm3, %v4131_v26  ;;  %7949 = vmatpush3.msra.mxu1 %v9222_v3 }
 0xe9a   :  { %7944 = vmatpush3.msra.mxu0 %v9224_v49  ;;  %7950 = vmatprep.mubr.msk.f32.mxu1 %vm8567_vm2, %v8566_v15 }
 0xe9b   :  { %7958 = vmatprep.subr.mxu1 %v8566_v15  ;;  %7945 = vmatprep.mubr.msk.f32.mxu0 %vm8567_vm2, %v8566_v15  ;;  %v9384_v59 = vpop.permute.xlu0 %4166 }
 0xe9c   :  { %7953 = vmatprep.subr.mxu0 %v8566_v15  ;;  %v9382_v13 = vpop.permute.xlu1 %4168 }
 0xe9f   :  { %v9388_v5 = vpop.permute.xlu0 %4174 }
 0xea0   :  { %v9386_v33 = vpop.permute.xlu1 %4172 }
 0xea3   :  { %v9392_v4 = vpop.permute.xlu0 %4180 }
 0xea4   :  { %v9390_v34 = vpop.permute.xlu1 %4178 }
 0xea7   :  { %v9398_v8 = vpop.permute.xlu0 %4186 }
 0xea8   :  { %v9396_v56 = vpop.permute.xlu1 %4184 }
 0xeac   :  { %v9402_v7 = vpop.permute.xlu1 %4190 }
 0xed0   :  { %v9318_v17 = vpop.f32.mrb[46].mxu1 }
 0xed1   :  { %v7867_v30 = vpop.f32.mrb[47].mxu1  ;;  %v5392_v10 = vsel %vm2018_vm4, %v9318_v17, -inf }
 0xed2   :  { %5393 = vmax.xlane.f32.xlu1 %v5392_v10 }
 0xed4   :  { %v9322_v35 = vpop.f32.mrb[48].mxu1 }
 0xed5   :  { %v7872_v57 = vpop.f32.mrb[49].mxu1  ;;  %v5395_v38 = vsel %vm2018_vm4, %v9322_v35, -inf }
 0xed6   :  { %5396 = vmax.xlane.f32.xlu0 %v5395_v38 }
 0xf52   :  { %v9326_v39 = vpop.f32.mrb[50].mxu1 }
 0xf53   :  { %v9328_v12 = vpop.f32.mrb[44].mxu0  ;;  %v7882_v40 = vpop.f32.mrb[51].mxu1  ;;  %v5401_v62 = vsel %vm2018_vm4, %v9326_v39, -inf }
 0xf54   :  { %v7877_v41 = vpop.f32.mrb[45].mxu0  ;;  %5402 = vmax.xlane.f32.xlu1 %v5401_v62  ;;  %v5398_v44 = vsel %vm2018_vm4, %v9328_v12, -inf }
 0xf55   :  { %5399 = vmax.xlane.f32.xlu0 %v5398_v44 }
 0xf56   :  { %v9334_v18 = vpop.f32.mrb[52].mxu1 }
 0xf57   :  { %v9336_v45 = vpop.f32.mrb[46].mxu0  ;;  %v7892_v46 = vpop.f32.mrb[53].mxu1  ;;  %v5407_v47 = vsel %vm2018_vm4, %v9334_v18, -inf }
 0xf58   :  { %v7887_v23 = vpop.f32.mrb[47].mxu0  ;;  %5408 = vmax.xlane.f32.xlu1 %v5407_v47  ;;  %v5404_v54 = vsel %vm2018_vm4, %v9336_v45, -inf }
 0xf59   :  { %5405 = vmax.xlane.f32.xlu0 %v5404_v54 }
 0xf5a   :  { %v9342_v25 = vpop.f32.mrb[54].mxu1 }
 0xf5b   :  { %v9344_v29 = vpop.f32.mrb[48].mxu0  ;;  %v7902_v31 = vpop.f32.mrb[55].mxu1  ;;  %v5413_v55 = vsel %vm2018_vm4, %v9342_v25, -inf }
 0xf5c   :  { %v7897_v58 = vpop.f32.mrb[49].mxu0  ;;  %5414 = vmax.xlane.f32.xlu1 %v5413_v55  ;;  %v5410_v52 = vsel %vm2018_vm4, %v9344_v29, -inf }
 0xf5d   :  { %5411 = vmax.xlane.f32.xlu0 %v5410_v52 }
 0xf5e   :  { %v9350_v36 = vpop.f32.mrb[56].mxu1 }
 0xf5f   :  { %v9352_v60 = vpop.f32.mrb[50].mxu0  ;;  %v5419_v37 = vsel %vm2018_vm4, %v9350_v36, -inf  ;;  %v7912_v32 = vpop.f32.mrb[57].mxu1 }
 0xf60   :  { %v7907_v61 = vpop.f32.mrb[51].mxu0  ;;  %5420 = vmax.xlane.f32.xlu1 %v5419_v37  ;;  %v5416_v63 = vsel %vm2018_vm4, %v9352_v60, -inf  ;;  %v5394_v30 = vpop.xlane.xlu1 %5393 }
 0xf61   :  { %5417 = vmax.xlane.f32.xlu0 %v5416_v63  ;;  %v5440_v57 = vsub.f32 %v9318_v17, %v5394_v30 }
 0xf62   :  { %v9358_v0 = vpop.f32.mrb[58].mxu1 }
 0xf63   :  { %v9360_v50 = vpop.f32.mrb[52].mxu0  ;;  %v5425_v24 = vsel %vm2018_vm4, %v9358_v0, -inf  ;;  %v7922_v6 = vpop.f32.mrb[59].mxu1  ;;  %v5456_v38 = vmul.f32 1.442695, %v5440_v57 }
 0xf64   :  { %v7917_v42 = vpop.f32.mrb[53].mxu0  ;;  %5426 = vmax.xlane.f32.xlu1 %v5425_v24  ;;  %v5422_v11 = vsel %vm2018_vm4, %v9360_v50, -inf  ;;  %v5397_v43 = vpop.xlane.xlu0 %5396 }
 0xf65   :  { %5423 = vmax.xlane.f32.xlu0 %v5422_v11  ;;  %v5441_v26 = vsub.f32 %v9322_v35, %v5397_v43 }
 0xf66   :  { %v9366_v14 = vpop.f32.mrb[60].mxu1 }
 0xf67   :  { %v9368_v16 = vpop.f32.mrb[54].mxu0  ;;  %v7932_v28 = vpop.f32.mrb[61].mxu1  ;;  %v5431_v19 = vsel %vm2018_vm4, %v9366_v14, -inf  ;;  %v5458_v10 = vmul.f32 1.442695, %v5441_v26 }
 0xf68   :  { %v7927_v9 = vpop.f32.mrb[55].mxu0  ;;  %5432 = vmax.xlane.f32.xlu1 %v5431_v19  ;;  %v5428_v21 = vsel %vm2018_vm4, %v9368_v16, -inf }
 0xf69   :  { %5429 = vmax.xlane.f32.xlu0 %v5428_v21  ;;  %8375 = vpow2.f32 %v5458_v10 }
 0xf6a   :  { %8377 = vpow2.f32 %v5456_v38 }
 0xf6b   :  { %v9374_v22 = vpop.f32.mrb[62].mxu1 }
 0xf6c   :  { %v9376_v48 = vpop.f32.mrb[56].mxu0  ;;  %v7942_v53 = vpop.f32.mrb[63].mxu1  ;;  %v5437_v1 = vsel %vm2018_vm4, %v9374_v22, -inf }
 0xf6d   :  { %v7937_v51 = vpop.f32.mrb[57].mxu0  ;;  %5438 = vmax.xlane.f32.xlu1 %v5437_v1  ;;  %v5434_v20 = vsel %vm2018_vm4, %v9376_v48, -inf }
 0xf6e   :  { %5435 = vmax.xlane.f32.xlu0 %v5434_v20 }
 0xf73   :  { %v9408_v40 = vpop.eup %8375 }
 0xf74   :  { %v5491_v62 = vsel %vm2018_vm4, %v9408_v40, 0.0  ;;  %v9412_v41 = vpop.eup %8377 }
 0xf75   :  { %v5488_v44 = vsel %vm2018_vm4, %v9412_v41, 0.0 }
 0xf7e   :  { %4196 = vrot.lane.b32.xlu1 %v9224_v49, %s8573_s15 }
 0xf84   :  { %4192 = vrot.lane.b32.xlu0 %v9222_v3, %s8572_s14 }
 0xf88   :  { %4198 = vrot.lane.b32.xlu0 %v9222_v3, %s8573_s15 }
 0xfa2   :  { %5492 = vadd.xlane.f32.xlu1 %v5491_v62 }
 0xfa7   :  { %5489 = vadd.xlane.f32.xlu0 %v5488_v44 }
 0xfe1   :  { %v5403_v35 = vpop.xlane.xlu1 %5402 }
 0xfe2   :  { %v5443_v46 = vsub.f32 %v9326_v39, %v5403_v35  ;;  %v5400_v47 = vpop.xlane.xlu0 %5399 }
 0xfe3   :  { %v5442_v17 = vsub.f32 %v9328_v12, %v5400_v47 }
 0xfe4   :  { %v5462_v23 = vmul.f32 1.442695, %v5443_v46 }
 0xfe5   :  { %v5460_v54 = vmul.f32 1.442695, %v5442_v17  ;;  %v5409_v31 = vpop.xlane.xlu1 %5408 }
 0xfe6   :  { %8379 = vpow2.f32 %v5462_v23  ;;  %v5445_v55 = vsub.f32 %v9334_v18, %v5409_v31  ;;  %v5406_v58 = vpop.xlane.xlu0 %5405 }
 0xfe7   :  { %8381 = vpow2.f32 %v5460_v54  ;;  %v5444_v52 = vsub.f32 %v9336_v45, %v5406_v58 }
 0xfe8   :  { %v5466_v37 = vmul.f32 1.442695, %v5445_v55 }
 0xfe9   :  { %v5464_v32 = vmul.f32 1.442695, %v5444_v52  ;;  %v5415_v61 = vpop.xlane.xlu1 %5414 }
 0xfea   :  { %8383 = vpow2.f32 %v5466_v37  ;;  %v5447_v63 = vsub.f32 %v9342_v25, %v5415_v61  ;;  %v5412_v39 = vpop.xlane.xlu0 %5411 }
 0xfeb   :  { %8385 = vpow2.f32 %v5464_v32  ;;  %v5446_v12 = vsub.f32 %v9344_v29, %v5412_v39 }
 0xfec   :  { %v5470_v24 = vmul.f32 1.442695, %v5447_v63 }
 0xfed   :  { %v5468_v6 = vmul.f32 1.442695, %v5446_v12  ;;  %v5421_v42 = vpop.xlane.xlu1 %5420 }
 0xfee   :  { %8387 = vpow2.f32 %v5470_v24  ;;  %v5449_v18 = vsub.f32 %v9350_v36, %v5421_v42  ;;  %v5418_v11 = vpop.xlane.xlu0 %5417 }
 0xfef   :  { %8389 = vpow2.f32 %v5468_v6  ;;  %v5448_v45 = vsub.f32 %v9352_v60, %v5418_v11 }
 0xff0   :  { %v9424_v28 = vpop.eup %8379  ;;  %v5474_v19 = vmul.f32 1.442695, %v5449_v18 }
 0xff1   :  { %v9426_v9 = vpop.eup %8381  ;;  %v5472_v25 = vmul.f32 1.442695, %v5448_v45  ;;  %v5427_v21 = vpop.xlane.xlu1 %5426  ;;  %v5497_v29 = vsel %vm2018_vm4, %v9424_v28, 0.0 }
 0xff2   :  { %8391 = vpow2.f32 %v5474_v19  ;;  %v5451_v53 = vsub.f32 %v9358_v0, %v5427_v21  ;;  %v5424_v1 = vpop.xlane.xlu0 %5423  ;;  %5498 = vadd.xlane.f32.xlu1 %v5497_v29  ;;  %v5494_v36 = vsel %vm2018_vm4, %v9426_v9, 0.0 }
 0xff3   :  { %8393 = vpow2.f32 %v5472_v25  ;;  %v5450_v60 = vsub.f32 %v9360_v50, %v5424_v1  ;;  %5495 = vadd.xlane.f32.xlu0 %v5494_v36 }
 0xff4   :  { %v9434_v51 = vpop.eup %8383  ;;  %v5478_v20 = vmul.f32 1.442695, %v5451_v53 }
 0xff5   :  { %v9436_v43 = vpop.eup %8385  ;;  %v5476_v26 = vmul.f32 1.442695, %v5450_v60  ;;  %v5433_v30 = vpop.xlane.xlu1 %5432  ;;  %v5503_v10 = vsel %vm2018_vm4, %v9434_v51, 0.0 }
 0xff6   :  { %8395 = vpow2.f32 %v5478_v20  ;;  %v5453_v0 = vsub.f32 %v9366_v14, %v5433_v30  ;;  %v5430_v57 = vpop.xlane.xlu0 %5429  ;;  %5504 = vadd.xlane.f32.xlu1 %v5503_v10  ;;  %v5500_v38 = vsel %vm2018_vm4, %v9436_v43, 0.0 }
 0xff7   :  { %8397 = vpow2.f32 %v5476_v26  ;;  %v5452_v50 = vsub.f32 %v9368_v16, %v5430_v57  ;;  %5501 = vadd.xlane.f32.xlu0 %v5500_v38 }
 0xff8   :  { %v9444_v62 = vpop.eup %8387  ;;  %v5482_v44 = vmul.f32 1.442695, %v5453_v0 }
 0xff9   :  { %v9446_v35 = vpop.eup %8389  ;;  %v5480_v46 = vmul.f32 1.442695, %v5452_v50  ;;  %v5509_v47 = vsel %vm2018_vm4, %v9444_v62, 0.0 }
 0xffa   :  { %8399 = vpow2.f32 %v5482_v44  ;;  %5510 = vadd.xlane.f32.xlu1 %v5509_v47  ;;  %v5439_v14 = vpop.xlane.xlu1 %5438  ;;  %v5506_v17 = vsel %vm2018_vm4, %v9446_v35, 0.0 }
 0xffb   :  { %8401 = vpow2.f32 %v5480_v46  ;;  %v5455_v23 = vsub.f32 %v9374_v22, %v5439_v14  ;;  %5507 = vadd.xlane.f32.xlu0 %v5506_v17  ;;  %v5436_v16 = vpop.xlane.xlu0 %5435 }
 0xffc   :  { %v9453_v54 = vpop.eup %8391  ;;  %v5454_v31 = vsub.f32 %v9376_v48, %v5436_v16 }
 0xffd   :  { %v9456_v55 = vpop.eup %8393  ;;  %v5486_v58 = vmul.f32 1.442695, %v5455_v23  ;;  %v5515_v52 = vsel %vm2018_vm4, %v9453_v54, 0.0 }
 0xffe   :  { %v5484_v37 = vmul.f32 1.442695, %v5454_v31  ;;  %5516 = vadd.xlane.f32.xlu1 %v5515_v52  ;;  %v5512_v32 = vsel %vm2018_vm4, %v9456_v55, 0.0  ;;  %v9492_v25 = vpop.permute.xlu1 %4196 }
 0xfff   :  { %8403 = vpow2.f32 %v5486_v58  ;;  %5513 = vadd.xlane.f32.xlu0 %v5512_v32  ;;  %v9490_v19 = vpop.permute.xlu0 %4192 }
0x1000   :  { %v9462_v22 = vpop.eup %8395  ;;  %8405 = vpow2.f32 %v5484_v37 }
0x1001   :  { %v9464_v61 = vpop.eup %8397  ;;  %v5521_v48 = vsel %vm2018_vm4, %v9462_v22, 0.0 }
0x1002   :  { %5522 = vadd.xlane.f32.xlu1 %v5521_v48  ;;  %v5518_v63 = vsel %vm2018_vm4, %v9464_v61, 0.0 }
0x1003   :  { %5519 = vadd.xlane.f32.xlu0 %v5518_v63  ;;  %v9494_v29 = vpop.permute.xlu0 %4198 }
0x1004   :  { %v9470_v39 = vpop.eup %8399 }
0x1005   :  { %v9472_v12 = vpop.eup %8401  ;;  %v5527_v24 = vsel %vm2018_vm4, %v9470_v39, 0.0 }
0x1006   :  { %5528 = vadd.xlane.f32.xlu1 %v5527_v24  ;;  %v5524_v6 = vsel %vm2018_vm4, %v9472_v12, 0.0 }
0x1007   :  { %5525 = vadd.xlane.f32.xlu0 %v5524_v6 }
0x1009   :  { %v9478_v42 = vpop.eup %8403 }
0x100a   :  { %v9480_v18 = vpop.eup %8405  ;;  %v5533_v11 = vsel %vm2018_vm4, %v9478_v42, 0.0 }
0x100b   :  { %5534 = vadd.xlane.f32.xlu1 %v5533_v11  ;;  %v5530_v45 = vsel %vm2018_vm4, %v9480_v18, 0.0 }
0x100c   :  { %5531 = vadd.xlane.f32.xlu0 %v5530_v45 }
0x101c   :  { %4202 = vrot.lane.b32.xlu1 %v9224_v49, %s8574_s16 }
0x1022   :  { %4204 = vrot.lane.b32.xlu0 %v9222_v3, %s8574_s16 }
0x102f   :  { %v5493_v21 = vpop.xlane.xlu1 %5492 }
0x1030   :  { %8407 = vrcp.f32 %v5493_v21 }
0x1034   :  { %v5490_v53 = vpop.xlane.xlu0 %5489 }
0x1035   :  { %8409 = vrcp.f32 %v5490_v53  ;;  %v6807_v53 = vld [vmem:[#allocation7 + $0x288] sm:$0xff] }
0x103a   :  { %v8408_v1 = vpop.eup %8407 }
0x103b   :  { %v5553_v36 = vmul.f32 %v8408_v1, %v9408_v40 }
0x103d   :  { %7951 = vmatmul.mubr.msk.f32.vlgmr.msra.gmra.mrb[64].mxu1 %vm2018_vm4, %v5553_v36 }
0x103e   :  { %7959 = vmatpush3.msra.mxu1 %v9382_v13  ;;  %7960 = vmatprep.mubr.msk.f32.mxu1 %vm8567_vm2, %v8566_v15 }
0x103f   :  { %v8410_v3 = vpop.eup %8409  ;;  %7968 = vmatprep.subr.mxu1 %v8566_v15 }
0x1040   :  { %v5552_v49 = vmul.f32 %v8410_v3, %v9412_v41 }
0x1042   :  { %7946 = vmatmul.mubr.msk.f32.vlgmr.msra.gmra.mrb[58].mxu0 %vm2018_vm4, %v5552_v49 }
0x1043   :  { %7954 = vmatpush3.msra.mxu0 %v9384_v59  ;;  %7955 = vmatprep.mubr.msk.f32.mxu0 %vm8567_vm2, %v8566_v15 }
0x1044   :  { %7963 = vmatprep.subr.mxu0 %v8566_v15 }
0x107f   :  { %v5499_v40 = vpop.xlane.xlu1 %5498 }
0x1080   :  { %8411 = vrcp.f32 %v5499_v40  ;;  %v5496_v13 = vpop.xlane.xlu0 %5495  ;;  %v6808_v40 = vld [vmem:[#allocation7 + $0x290] sm:$0xff] }
0x1081   :  { %8413 = vrcp.f32 %v5496_v13  ;;  %v6809_v13 = vld [vmem:[#allocation7 + $0x298] sm:$0xff] }
0x1083   :  { %v5505_v60 = vpop.xlane.xlu1 %5504 }
0x1084   :  { %8415 = vrcp.f32 %v5505_v60  ;;  %v5502_v20 = vpop.xlane.xlu0 %5501 }
0x1085   :  { %8417 = vrcp.f32 %v5502_v20  ;;  %v8228_v20 = vpack.c.bf16 %v6809_v13, %v6808_v40  ;;  %v7239_v13 = vld [vmem:[#allocation8 + $0x10] ss:$0 sm:$0xff] }
0x1087   :  { %v5511_v26 = vpop.xlane.xlu1 %5510 }
0x1088   :  { %8419 = vrcp.f32 %v5511_v26  ;;  %v5508_v41 = vpop.xlane.xlu0 %5507 }
0x1089   :  { %8421 = vrcp.f32 %v5508_v41 }
0x108a   :  { %v8412_v30 = vpop.eup %8411 }
0x108b   :  { %v8414_v10 = vpop.eup %8413  ;;  %v5555_v59 = vmul.f32 %v8412_v30, %v9424_v28  ;;  %v5517_v0 = vpop.xlane.xlu1 %5516 }
0x108c   :  { %v5554_v57 = vmul.f32 %v8414_v10, %v9426_v9  ;;  %8423 = vrcp.f32 %v5517_v0  ;;  %v5514_v38 = vpop.xlane.xlu0 %5513  ;;  %v6898_v0 = vld [vmem:[#allocation7 + $0x2a0] sm:$0xff] }
0x108d   :  { %8425 = vrcp.f32 %v5514_v38  ;;  %7961 = vmatmul.mubr.msk.f32.vlgmr.msra.gmra.mrb[66].mxu1 %vm2018_vm4, %v5555_v59 }
0x108e   :  { %v8416_v50 = vpop.eup %8415  ;;  %7969 = vmatpush3.msra.mxu1 %v9388_v5  ;;  %7956 = vmatmul.mubr.msk.f32.vlgmr.msra.gmra.mrb[60].mxu0 %vm2018_vm4, %v5554_v57  ;;  %v6899_v57 = vld [vmem:[#allocation7 + $0x2a8] sm:$0xff] }
0x108f   :  { %v8418_v44 = vpop.eup %8417  ;;  %v5557_v46 = vmul.f32 %v8416_v50, %v9434_v51  ;;  %7964 = vmatpush3.msra.mxu0 %v9386_v33  ;;  %v5523_v47 = vpop.xlane.xlu1 %5522  ;;  %7970 = vmatprep.mubr.msk.f32.mxu1 %vm8567_vm2, %v8566_v15 }
0x1090   :  { %v5556_v28 = vmul.f32 %v8418_v44, %v9436_v43  ;;  %8427 = vrcp.f32 %v5523_v47  ;;  %v5520_v9 = vpop.xlane.xlu0 %5519  ;;  %7978 = vmatprep.subr.mxu1 %v8566_v15  ;;  %7965 = vmatprep.mubr.msk.f32.mxu0 %vm8567_vm2, %v8566_v15  ;;  %v8232_v44 = vpack.c.bf16 %v6899_v57, %v6898_v0  ;;  %v6997_v0 = vld [vmem:[#allocation7 + $0x2f8] sm:$0xff] }
0x1091   :  { %8429 = vrcp.f32 %v5520_v9  ;;  %7971 = vmatmul.mubr.msk.f32.vlgmr.msra.gmra.mrb[68].mxu1 %vm2018_vm4, %v5557_v46  ;;  %7973 = vmatprep.subr.mxu0 %v8566_v15 }
0x1092   :  { %v8420_v5 = vpop.eup %8419  ;;  %7979 = vmatpush3.msra.mxu1 %v9392_v4  ;;  %7966 = vmatmul.mubr.msk.f32.vlgmr.msra.gmra.mrb[62].mxu0 %vm2018_vm4, %v5556_v28 }
0x1093   :  { %v8422_v33 = vpop.eup %8421  ;;  %v5559_v51 = vmul.f32 %v8420_v5, %v9444_v62  ;;  %7974 = vmatpush3.msra.mxu0 %v9390_v34  ;;  %v5529_v43 = vpop.xlane.xlu1 %5528  ;;  %7980 = vmatprep.mubr.msk.f32.mxu1 %vm8567_vm2, %v8566_v15 }
0x1094   :  { %v5558_v14 = vmul.f32 %v8422_v33, %v9446_v35  ;;  %8431 = vrcp.f32 %v5529_v43  ;;  %v5526_v17 = vpop.xlane.xlu0 %5525  ;;  %7988 = vmatprep.subr.mxu1 %v8566_v15  ;;  %7975 = vmatprep.mubr.msk.f32.mxu0 %vm8567_vm2, %v8566_v15 }
0x1095   :  { %8433 = vrcp.f32 %v5526_v17  ;;  %7981 = vmatmul.mubr.msk.f32.vlgmr.msra.gmra.mrb[70].mxu1 %vm2018_vm4, %v5559_v51  ;;  %7983 = vmatprep.subr.mxu0 %v8566_v15 }
0x1096   :  { %v8424_v4 = vpop.eup %8423  ;;  %7989 = vmatpush3.msra.mxu1 %v9398_v8  ;;  %7976 = vmatmul.mubr.msk.f32.vlgmr.msra.gmra.mrb[64].mxu0 %vm2018_vm4, %v5558_v14 }
0x1097   :  { %v8426_v34 = vpop.eup %8425  ;;  %v5561_v62 = vmul.f32 %v8424_v4, %v9453_v54  ;;  %7984 = vmatpush3.msra.mxu0 %v9396_v56  ;;  %7990 = vmatprep.mubr.msk.f32.mxu1 %vm8567_vm2, %v8566_v15 }
0x1098   :  { %v5560_v35 = vmul.f32 %v8426_v34, %v9456_v55  ;;  %7998 = vmatprep.subr.mxu1 %v8566_v15  ;;  %v5535_v23 = vpop.xlane.xlu1 %5534  ;;  %7985 = vmatprep.mubr.msk.f32.mxu0 %vm8567_vm2, %v8566_v15 }
0x1099   :  { %8435 = vrcp.f32 %v5535_v23  ;;  %7993 = vmatprep.subr.mxu0 %v8566_v15  ;;  %v5532_v8 = vpop.xlane.xlu0 %5531  ;;  %7991 = vmatmul.mubr.msk.f32.vlgmr.msra.gmra.mrb[72].mxu1 %vm2018_vm4, %v5561_v62 }
0x109a   :  { %v8428_v16 = vpop.eup %8427  ;;  %8437 = vrcp.f32 %v5532_v8  ;;  %7999 = vmatpush3.msra.mxu1 %v9490_v19  ;;  %7986 = vmatmul.mubr.msk.f32.vlgmr.msra.gmra.mrb[66].mxu0 %vm2018_vm4, %v5560_v35 }
0x109b   :  { %v8430_v56 = vpop.eup %8429  ;;  %v5563_v54 = vmul.f32 %v8428_v16, %v9462_v22  ;;  %7994 = vmatpush3.msra.mxu0 %v9402_v7  ;;  %8000 = vmatprep.mubr.msk.f32.mxu1 %vm8567_vm2, %v8566_v15 }
0x109c   :  { %v5562_v31 = vmul.f32 %v8430_v56, %v9464_v61  ;;  %8008 = vmatprep.subr.mxu1 %v8566_v15  ;;  %7995 = vmatprep.mubr.msk.f32.mxu0 %vm8567_vm2, %v8566_v15  ;;  %v4203_v32 = vpop.permute.xlu1 %4202 }
0x109d   :  { %8003 = vmatprep.subr.mxu0 %v8566_v15  ;;  %8001 = vmatmul.mubr.msk.f32.vlgmr.msra.gmra.mrb[74].mxu1 %vm2018_vm4, %v5563_v54  ;;  %v4205_v37 = vpop.permute.xlu0 %4204 }
0x109e   :  { %v8432_v55 = vpop.eup %8431  ;;  %8009 = vmatpush3.msra.mxu1 %v9494_v29  ;;  %7996 = vmatmul.mubr.msk.f32.vlgmr.msra.gmra.mrb[68].mxu0 %vm2018_vm4, %v5562_v31  ;;  %v6806_v29 = vld [vmem:[#allocation7 + $0x280] sm:$0xff] }
0x109f   :  { %v8434_v7 = vpop.eup %8433  ;;  %v5565_v58 = vmul.f32 %v8432_v55, %v9470_v39  ;;  %8004 = vmatpush3.msra.mxu0 %v9492_v25  ;;  %8010 = vmatprep.mubr.msk.f32.mxu1 %vm8567_vm2, %v8566_v15  ;;  %v8224_v36 = vpack.c.bf16 %v6807_v53, %v6806_v29  ;;  %v6992_v29 = vld [vmem:[#allocation7 + $0x2d0] sm:$0xff] }
0x10a0   :  { %v5564_v52 = vmul.f32 %v8434_v7, %v9472_v12  ;;  %8018 = vmatprep.subr.mxu1 %v8566_v15  ;;  %8005 = vmatprep.mubr.msk.f32.mxu0 %vm8567_vm2, %v8566_v15 }
0x10a1   :  { %8011 = vmatmul.mubr.msk.f32.vlgmr.msra.gmra.mrb[76].mxu1 %vm2018_vm4, %v5565_v58  ;;  %8013 = vmatprep.subr.mxu0 %v8566_v15 }
0x10a2   :  { %8019 = vmatpush3.msra.mxu1 %v4205_v37  ;;  %8006 = vmatmul.mubr.msk.f32.vlgmr.msra.gmra.mrb[70].mxu0 %vm2018_vm4, %v5564_v52 }
0x10a3   :  { %v8436_v22 = vpop.eup %8435  ;;  %8014 = vmatpush3.msra.mxu0 %v4203_v32  ;;  %8020 = vmatprep.mubr.msk.f32.mxu1 %vm8567_vm2, %v8566_v15 }
0x10a4   :  { %v8438_v61 = vpop.eup %8437  ;;  %v5567_v48 = vmul.f32 %v8436_v22, %v9478_v42  ;;  %8015 = vmatprep.mubr.msk.f32.mxu0 %vm8567_vm2, %v8566_v15  ;;  %8225 = vmatprep.subr.bf16.mxu0 %v8224_v36 }
0x10a5   :  { %v5566_v63 = vmul.f32 %v8438_v61, %v9480_v18  ;;  %8233 = vmatprep.subr.bf16.mxu1 %v8232_v44 }
0x10a6   :  { %8021 = vmatmul.mubr.msk.f32.vlgmr.msra.gmra.mrb[78].mxu1 %vm2018_vm4, %v5567_v48 }
0x10a7   :  { %8016 = vmatmul.mubr.msk.f32.vlgmr.msra.gmra.mrb[72].mxu0 %vm2018_vm4, %v5566_v63  ;;  %8235 = vmatpush3.bf16.msra.mxu1 %v8232_v44 }
0x10a8   :  { %8227 = vmatpush3.bf16.msra.mxu0 %v8224_v36 }
0x10a9   :  { %8229 = vmatprep.subr.bf16.mxu0 %v8228_v20 }
0x10ac   :  { %8231 = vmatpush3.bf16.msra.mxu0 %v8228_v20 }
0x1110   :  { %v9580_v39 = vpop.f32.mrb[64].mxu1 }
0x1111   :  { %v7952_v12 = vpop.f32.mrb[65].mxu1 }
0x1115   :  { %v9582_v24 = vpop.f32.mrb[58].mxu0 }
0x1116   :  { %v7947_v6 = vpop.f32.mrb[59].mxu0 }
0x1160   :  { %v5856_v11 = vpop.f32.mrb[66].mxu1 }
0x1161   :  { %v5783_v45 = vpop.f32.mrb[60].mxu0  ;;  %6740 = vrot.lane.b32.xlu0 %v5856_v11, %s8575_s17  ;;  %v7962_v42 = vpop.f32.mrb[67].mxu1 }
0x1162   :  { %v7957_v19 = vpop.f32.mrb[61].mxu0  ;;  %6738 = vrot.lane.b32.xlu1 %v5783_v45, %s8575_s17 }
0x1163   :  { %v6900_v19 = vld [vmem:[#allocation7 + $0x2b0] sm:$0xff] }
0x1164   :  { %v6002_v15 = vpop.f32.mrb[68].mxu1 }
0x1165   :  { %v5929_v18 = vpop.f32.mrb[62].mxu0  ;;  %6748 = vrot.lane.b32.xlu0 %v6002_v15, %s8562_s28  ;;  %v7972_v25 = vpop.f32.mrb[69].mxu1  ;;  %v6901_v15 = vld [vmem:[#allocation7 + $0x2b8] sm:$0xff] }
0x1166   :  { %v7967_v21 = vpop.f32.mrb[63].mxu0  ;;  %6746 = vrot.lane.b32.xlu1 %v5929_v18, %s8562_s28  ;;  %v8236_v18 = vpack.c.bf16 %v6901_v15, %v6900_v19  ;;  %v6990_v25 = vld [vmem:[#allocation7 + $0x2c0] sm:$0xff] }
0x1167   :  { %v6991_v21 = vld [vmem:[#allocation7 + $0x2c8] sm:$0xff] }
0x1168   :  { %v6148_v1 = vpop.f32.mrb[70].mxu1  ;;  %8237 = vmatprep.subr.bf16.mxu1 %v8236_v18  ;;  %v8240_v53 = vpack.c.bf16 %v6991_v21, %v6990_v25 }
0x1169   :  { %v6075_v3 = vpop.f32.mrb[64].mxu0  ;;  %6756 = vrot.lane.b32.xlu0 %v6148_v1, %s8576_s19  ;;  %v7982_v49 = vpop.f32.mrb[71].mxu1  ;;  %8239 = vmatpush3.bf16.msra.mxu1 %v8236_v18  ;;  %v6993_v1 = vld [vmem:[#allocation7 + $0x2d8] sm:$0xff] }
0x116a   :  { %v7977_v60 = vpop.f32.mrb[65].mxu0  ;;  %6754 = vrot.lane.b32.xlu1 %v6075_v3, %s8576_s19  ;;  %v8244_v36 = vpack.c.bf16 %v6993_v1, %v6992_v29  ;;  %v6994_v3 = vld [vmem:[#allocation7 + $0x2e0] sm:$0xff]  ;;  %v6995_v49 = vld [vmem:[#allocation7 + $0x2e8] sm:$0xff]  ;;  %8241 = vmatprep.subr.bf16.mxu0 %v8240_v53 }
0x116b   :  { %v8248_v40 = vpack.c.bf16 %v6995_v49, %v6994_v3 }
0x116c   :  { %v6294_v26 = vpop.f32.mrb[72].mxu1 }
0x116d   :  { %v6221_v41 = vpop.f32.mrb[66].mxu0  ;;  %6764 = vrot.lane.b32.xlu0 %v6294_v26, %s8577_s20  ;;  %v7992_v30 = vpop.f32.mrb[73].mxu1 }
0x116e   :  { %v7987_v10 = vpop.f32.mrb[67].mxu0  ;;  %6762 = vrot.lane.b32.xlu1 %v6221_v41, %s8577_s20 }
0x1170   :  { %v6440_v59 = vpop.f32.mrb[74].mxu1 }
0x1171   :  { %v6367_v38 = vpop.f32.mrb[68].mxu0  ;;  %6772 = vrot.lane.b32.xlu0 %v6440_v59, %s8578_s21  ;;  %v8002_v50 = vpop.f32.mrb[75].mxu1  ;;  %v6996_v59 = vld [vmem:[#allocation7 + $0x2f0] sm:$0xff] }
0x1172   :  { %v7997_v46 = vpop.f32.mrb[69].mxu0  ;;  %6770 = vrot.lane.b32.xlu1 %v6367_v38, %s8578_s21  ;;  %v8252_v57 = vpack.c.bf16 %v6997_v0, %v6996_v59  ;;  %v7242_v38 = vld [vmem:[#allocation8 + $0x11] ss:$0 sm:$0xff] }
0x1174   :  { %v6586_v47 = vpop.f32.mrb[76].mxu1 }
0x1175   :  { %v6513_v28 = vpop.f32.mrb[70].mxu0  ;;  %6780 = vrot.lane.b32.xlu0 %v6586_v47, %s8579_s22  ;;  %v8012_v9 = vpop.f32.mrb[77].mxu1 }
0x1176   :  { %6778 = vrot.lane.b32.xlu1 %v6513_v28, %s8579_s22  ;;  %v8007_v5 = vpop.f32.mrb[71].mxu0 }
0x1179   :  { %v6732_v33 = vpop.f32.mrb[78].mxu1 }
0x117a   :  { %v6659_v51 = vpop.f32.mrb[72].mxu0  ;;  %6788 = vrot.lane.b32.xlu0 %v6732_v33, %s8580_s23  ;;  %v8022_v43 = vpop.f32.mrb[79].mxu1 }
0x117b   :  { %6786 = vrot.lane.b32.xlu1 %v6659_v51, %s8580_s23  ;;  %v8017_v14 = vpop.f32.mrb[73].mxu0 }
0x11d3   :  { %v6741_v17 = vpop.permute.xlu0 %6740 }
0x11d4   :  { %v6739_v4 = vpop.permute.xlu1 %6738  ;;  %v6793_v58 = vsel %vm833_vm3, %v9580_v39, %v6741_v17 }
0x11d5   :  { %v6792_v55 = vsel %vm833_vm3, %v9582_v24, %v6739_v4 }
0x11d7   :  { %v6749_v34 = vpop.permute.xlu0 %6748 }
0x11d8   :  { %v6747_v62 = vpop.permute.xlu1 %6746  ;;  %v6795_v37 = vsel %vm2018_vm4, %v6793_v58, %v6749_v34 }
0x11d9   :  { %v6794_v52 = vsel %vm2018_vm4, %v6792_v55, %v6747_v62 }
0x11db   :  { %v6757_v35 = vpop.permute.xlu0 %6756 }
0x11dc   :  { %v6755_v23 = vpop.permute.xlu1 %6754  ;;  %v6797_v22 = vsel %vm3423_vm5, %v6795_v37, %v6757_v35 }
0x11dd   :  { %v6796_v32 = vsel %vm3423_vm5, %v6794_v52, %v6755_v23 }
0x11df   :  { %v6765_v8 = vpop.permute.xlu0 %6764 }
0x11e0   :  { %v6763_v16 = vpop.permute.xlu1 %6762  ;;  %v6799_v48 = vsel %vm3426_vm6, %v6797_v22, %v6765_v8 }
0x11e1   :  { %v6798_v61 = vsel %vm3426_vm6, %v6796_v32, %v6763_v16 }
0x11e3   :  { %v6773_v56 = vpop.permute.xlu0 %6772 }
0x11e4   :  { %v6771_v54 = vpop.permute.xlu1 %6770  ;;  %v6801_v24 = vsel %vm3429_vm7, %v6799_v48, %v6773_v56 }
0x11e5   :  { %v6800_v63 = vsel %vm3429_vm7, %v6798_v61, %v6771_v54 }
0x11e7   :  { %v6781_v31 = vpop.permute.xlu0 %6780 }
0x11e8   :  { %v6779_v7 = vpop.permute.xlu1 %6778  ;;  %v6803_v11 = vsel %vm3432_vm8, %v6801_v24, %v6781_v31 }
0x11e9   :  { %v6802_v6 = vsel %vm3432_vm8, %v6800_v63, %v6779_v7 }
0x11ec   :  { %v6789_v12 = vpop.permute.xlu0 %6788 }
0x11ed   :  { %v6787_v39 = vpop.permute.xlu1 %6786  ;;  %v6805_v42 = vsel %vm3435_vm9, %v6803_v11, %v6789_v12 }
0x11ee   :  { %v6804_v45 = vsel %vm3435_vm9, %v6802_v6, %v6787_v39 }
0x11ef   :  { %8031 = vmatprep.mubr.msk.f32.mxu0 %vm85_vm0, %v6804_v45 }
0x11f0   :  { %8032 = vmatmul.mubr.msk.f32.vlgmr.msra.gmra.mrb[74].mxu0 %vm85_vm0, %v6805_v42 }
0x11f1   :  { %8243 = vmatpush3.bf16.msra.mxu0 %v8240_v53 }
0x11f2   :  { %8245 = vmatprep.subr.bf16.mxu0 %v8244_v36 }
0x11f5   :  { %8247 = vmatpush3.bf16.msra.mxu0 %v8244_v36 }
0x11f6   :  { %8249 = vmatprep.subr.bf16.mxu0 %v8248_v40 }
0x11f9   :  { %8251 = vmatpush3.bf16.msra.mxu0 %v8248_v40 }
0x11fa   :  { %8253 = vmatprep.subr.bf16.mxu0 %v8252_v57 }
0x11fd   :  { %8255 = vmatpush3.bf16.msra.mxu0 %v8252_v57 }
0x12c3   :  { %v8033_v60 = vpop.f32.mrb[74].mxu0 }
0x12c4   :  { %v6893_v20 = vadd.f32 %v8033_v60, %v7239_v13  ;;  %v6887_v26 = vpop.f32.mrb[75].mxu0 }
0x12c5   :  { %v6888_v41 = vadd.f32 %v7239_v13, %v6887_v26 }
0x12c6   :  { %v6897_v10 = vadd.f32 %v6893_v20, %v9172_v2 }
0x12c7   :  { %v6896_v30 = vadd.f32 %v6888_v41, %v9169_v27  ;;  %v7245_v27 = vld [vmem:[#allocation8 + $0x12] ss:$0 sm:$0xff] }
0x12c9   :  { %8042 = vmatprep.mubr.msk.f32.mxu1 %vm85_vm0, %v6896_v30 }
0x12ca   :  { %8043 = vmatmul.mubr.msk.f32.vlgmr.msra.gmra.mrb[80].mxu1 %vm85_vm0, %v6897_v10 }
0x139d   :  { %v8044_v50 = vpop.f32.mrb[80].mxu1 }
0x139e   :  { %v6985_v44 = vadd.f32 %v8044_v50, %v7242_v38  ;;  %v6979_v46 = vpop.f32.mrb[81].mxu1 }
0x139f   :  { %v6980_v47 = vadd.f32 %v7242_v38, %v6979_v46 }
0x13a0   :  { %v6989_v9 = vmax.f32 %v6985_v44, 0.0 }
0x13a1   :  { %v6988_v28 = vmax.f32 %v6980_v47, 0.0 }
0x13a3   :  { %8061 = vmatprep.mubr.msk.f32.mxu0 %vm369_vm1, %v6988_v28 }
0x13a4   :  { %8062 = vmatmul.mubr.msk.f32.vlgmr.msra.gmra.mrb[76].mxu0 %vm369_vm1, %v6989_v9 }
0x1477   :  { %v8063_v2 = vpop.f32.mrb[76].mxu0 }
0x1478   :  { %v7081_v5 = vadd.f32 %v8063_v2, %v7245_v27  ;;  %v7075_v33 = vpop.f32.mrb[77].mxu0 }
0x1479   :  { %v7076_v51 = vadd.f32 %v7245_v27, %v7075_v33 }
0x147a   :  { %7085 = vst.msk [vmem:[#allocation10 + $0x8] sm:$0xff] %vm85_vm0, %v7081_v5 }
0x147b   :  { %7084 = vst.msk [vmem:[#allocation10] sm:$0xff] %vm85_vm0, %v7076_v51 }
0x147c   :  { %8540 = shalt.err (!%p8537_p8)
}
0x147d   :  { %s8541_s29 = scalar_lea.hbm %s9643_s4, 256 }
0x147e   :  { %p8542_p9 = scmp.ne.s32.totalorder %s9643_s4, %s8541_s29  ;;  %p8545_p10 = scmp.lt.u32.totalorder %s8541_s29, %s9643_s4 }
0x1480   :  { %p8547_p11 = pnand %p8545_p10, %p8542_p9 }
0x1482   :  { %8550 = shalt.err (!%p8547_p11)
}
0x1483   :  { %7097 = dma.vmem_to_hbm [thread:$0]  %s7092_s25, 256, %s9643_s4, [#allocation4], %s8561_s27, %s8561_s27, %s8562_s28  }
0x1484   :  { %8557 = dma.done.wait [#allocation4], 256  }
0x1485   :  { %8558 = vsyncadd [#allocation4], 4294967040 }
0x1486   :  { %7101 = vsyncpa [#allocation3], 1 }
0x1487   :  { %7102 = vsyncpa [#allocation6], 1 }
0x1488   :  { %7103 = vsyncpa [#allocation9], 1 }
0x1489   :  { %7104 = vsyncpa [#allocation4], 1 }

</bundles_post_ra>
